<compile_context>
chip_gen: v6e
topology: v6e:2x2x1
jax: 0.10.0
libtpu: 0.0.40
codegen_flags: <defaults>
</compile_context>

<pallas_src>
import functools

import jax
import jax.numpy as jnp
from jax import lax
from jax.experimental import pallas as pl
from jax.experimental.pallas import tpu as pltpu

_MIB = 1024 * 1024


# ----------------------------------------------------------------------------
# small helpers
# ----------------------------------------------------------------------------
def _round_up(x, m):
    return ((x + m - 1) // m) * m


def _pick_row_tile(m, cap=512):
    """Largest multiple of 8 that divides m and is <= cap (m is a multiple of 8)."""
    t = min(m, cap)
    t -= t % 8
    while t > 8 and m % t != 0:
        t -= 8
    return max(t, 8)


def _pick_time_chunk(S, Bp, *, max_rows=2048):
    """Largest divisor of S whose chunk (TS*Bp rows) stays below max_rows."""
    ts = max(1, min(S, max_rows // max(Bp, 1)))
    while S % ts:
        ts -= 1
    return ts


def _vmem_limit(est_bytes):
    # portable across v5e/v6e/v7x: never below 32 MiB request, never above 48 MiB
    return int(min(max(2 * est_bytes, 32 * _MIB), 48 * _MIB))


# ----------------------------------------------------------------------------
# Tiled linear (MLP) and fused head kernels
# ----------------------------------------------------------------------------
def _linear_kernel(x_ref, w_ref, b_ref, o_ref, *, relu):
    y = jnp.dot(x_ref[...], w_ref[...], preferred_element_type=jnp.float32)
    y = y + b_ref[...]
    if relu:
        y = jnp.maximum(y, 0.0)
    o_ref[...] = y.astype(o_ref.dtype)


def pallas_linear(x, w, b, *, relu=False, row_tile=512):
    """y = relu?(x @ w + b); x: (M, K), w: (K, N), b: (1, N).  Grid over rows."""
    M, K = x.shape
    N = w.shape[1]
    tm = _pick_row_tile(M, row_tile)
    est = 4 * (2 * tm * K + K * N + N + 2 * tm * N)
    return pl.pallas_call(
        functools.partial(_linear_kernel, relu=relu),
        out_shape=jax.ShapeDtypeStruct((M, N), jnp.float32),
        grid=(M // tm,),
        in_specs=[pl.BlockSpec((tm, K), lambda i: (i, 0)),
                  pl.BlockSpec((K, N), lambda i: (0, 0)),
                  pl.BlockSpec((1, N), lambda i: (0, 0))],
        out_specs=pl.BlockSpec((tm, N), lambda i: (i, 0)),
        compiler_params=pltpu.CompilerParams(
            dimension_semantics=("parallel",),
            vmem_limit_bytes=_vmem_limit(est)),
    )(x, w, b)


def _head_kernel(xf_ref, xb_ref, w1f_ref, w1b_ref, b1_ref, w2_ref, b2_ref, o_ref):
    # concat([xf, xb]) @ W1 expressed as two GEMMs on row-split weights, so the
    # bidirectional concat never exists in HBM.
    h = jnp.dot(xf_ref[...], w1f_ref[...], preferred_element_type=jnp.float32)
    h = h + jnp.dot(xb_ref[...], w1b_ref[...], preferred_element_type=jnp.float32)
    h = jnp.maximum(h + b1_ref[...], 0.0)
    y = jnp.dot(h, w2_ref[...], preferred_element_type=jnp.float32) + b2_ref[...]
    o_ref[...] = y.astype(o_ref.dtype)


def pallas_head(xf, xb, w1f, w1b, b1, w2, b2, *, row_tile=512):
    """Fused Linear+ReLU+Linear on (fwd, bwd) parts; intermediate stays in VMEM."""
    M, K = xf.shape
    N1 = w1f.shape[1]
    N2 = w2.shape[1]
    tm = _pick_row_tile(M, row_tile)
    est = 4 * (4 * tm * K + 2 * K * N1 + N1 * N2 + tm * N1 + 2 * tm * N2)
    return pl.pallas_call(
        _head_kernel,
        out_shape=jax.ShapeDtypeStruct((M, N2), jnp.float32),
        grid=(M // tm,),
        in_specs=[pl.BlockSpec((tm, K), lambda i: (i, 0)),
                  pl.BlockSpec((tm, K), lambda i: (i, 0)),
                  pl.BlockSpec((K, N1), lambda i: (0, 0)),
                  pl.BlockSpec((K, N1), lambda i: (0, 0)),
                  pl.BlockSpec((1, N1), lambda i: (0, 0)),
                  pl.BlockSpec((N1, N2), lambda i: (0, 0)),
                  pl.BlockSpec((1, N2), lambda i: (0, 0))],
        out_specs=pl.BlockSpec((tm, N2), lambda i: (i, 0)),
        compiler_params=pltpu.CompilerParams(
            dimension_semantics=("parallel",),
            vmem_limit_bytes=_vmem_limit(est)),
    )(xf, xb, w1f, w1b, b1, w2, b2)


# ----------------------------------------------------------------------------
# Fused, time-chunked bidirectional GRU layer kernel
# ----------------------------------------------------------------------------
def _bigru_layer_kernel(*refs, TS, Bp, H, n_parts, unroll):
    # ref layout (see pallas_bigru_layer):
    #   xf[0..n_parts)  : (TS*Bp, Din_p)  forward time chunk t   (time-major rows)
    #   xb[0..n_parts)  : (TS*Bp, Din_p)  time chunk nT-1-t      (for bwd direction)
    #   wf[0..n_parts)  : (Din_p, 3H)     W_ih^T fwd direction, gate order (r,z,n)
    #   wb[0..n_parts)  : (Din_p, 3H)     W_ih^T bwd direction
    #   bf, bb          : (1, 3H)         b_ih with b_hh folded for r,z (not n)
    #   whh             : (2H, 6H)        gate-major, per-direction block-diag W_hh^T
    #   bhn             : (1, 2H)         b_hn for [fwd | bwd]
    #   out_f, out_b    : (TS*Bp, H)      fwd/bwd halves, both in time order
    #   igf, igb        : (TS*Bp, 3H)     chunk-local input-gate scratch per direction
    #   hbuf            : (TS*Bp, 2H)     chunk-local hidden-state buffer
    #   h               : (Bp, 2H)        packed [h_fwd | h_bwd] carried across chunks
    nx = n_parts
    xf = refs[0:nx]
    xb = refs[nx:2 * nx]
    wf = refs[2 * nx:3 * nx]
    wb = refs[3 * nx:4 * nx]
    (bf_ref, bb_ref, whh_ref, bhn_ref,
     outf_ref, outb_ref, igf_ref, igb_ref, hbuf_ref, h_ref) = refs[4 * nx:]

    # ---- init the carried state on the first time chunk ---------------------
    @pl.when(pl.program_id(0) == 0)
    def _():
        h_ref[...] = jnp.zeros((Bp, 2 * H), jnp.float32)

    # ---- input-gate GEMMs for this chunk, both directions (off serial path) -
    gf = jnp.dot(xf[0][...], wf[0][...], preferred_element_type=jnp.float32)
    gb = jnp.dot(xb[0][...], wb[0][...], preferred_element_type=jnp.float32)
    for i in range(1, nx):
        gf = gf + jnp.dot(xf[i][...], wf[i][...], preferred_element_type=jnp.float32)
        gb = gb + jnp.dot(xb[i][...], wb[i][...], preferred_element_type=jnp.float32)
    igf_ref[...] = gf + bf_ref[...]
    igb_ref[...] = gb + bb_ref[...]

    whh = whh_ref[...]            # hoisted out of the loop
    bhn = bhn_ref[...]

    # ---- serial recurrence: both directions in one packed (Bp, 2H) state ----
    def step(s, h):
        lo_f = pl.multiple_of(s * Bp, Bp)
        lo_b = pl.multiple_of((TS - 1 - s) * Bp, Bp)
        a = igf_ref[pl.ds(lo_f, Bp), :]            # (Bp, 3H) fwd gates at time s
        b = igb_ref[pl.ds(lo_b, Bp), :]            # (Bp, 3H) bwd gates (reversed read)
        # gx_* depend only on precomputed gate buffers -> off the h-critical path
        gx_r = jnp.concatenate([a[:, 0:H], b[:, 0:H]], axis=-1)
        gx_z = jnp.concatenate([a[:, H:2 * H], b[:, H:2 * H]], axis=-1)
        gx_n = jnp.concatenate([a[:, 2 * H:3 * H], b[:, 2 * H:3 * H]], axis=-1)
        # ONE fused hidden-state matmul per step covering both directions
        gh = jnp.dot(h, whh, preferred_element_type=jnp.float32)    # (Bp, 6H)
        r = jax.nn.sigmoid(gx_r + gh[:, 0:2 * H])
        z = jax.nn.sigmoid(gx_z + gh[:, 2 * H:4 * H])
        n = jnp.tanh(gx_n + r * (gh[:, 4 * H:6 * H] + bhn))
        h_new = (1.0 - z) * n + z * h
        hbuf_ref[pl.ds(lo_f, Bp), :] = h_new       # single lane-denser store per step
        return h_new

    h_ref[...] = lax.fori_loop(0, TS, step, h_ref[...], unroll=unroll)

    # ---- bulk writeback (off the serial path, overlapped by the pipeline) ---
    outf_ref[...] = hbuf_ref[:, 0:H]               # fwd half already in time order

    def rev_copy(s, carry):
        src = pl.multiple_of(s * Bp, Bp)
        dst = pl.multiple_of((TS - 1 - s) * Bp, Bp)
        outb_ref[pl.ds(dst, Bp), :] = hbuf_ref[pl.ds(src, Bp), :][:, H:2 * H]
        return carry

    lax.fori_loop(0, TS, rev_copy, 0, unroll=unroll)


def pallas_bigru_layer(x_parts, lp, *, S, Bp, H, TS):
    """One bidirectional GRU layer.

    x_parts: tuple of 1 or 2 arrays, each (S*Bp, Din_p), time-major rows.
    Returns (out_fwd, out_bwd), each (S*Bp, H), both in time order.
    """
    nT = S // TS
    rows = TS * Bp
    n_parts = len(x_parts)
    wf_parts, wb_parts = lp["wx_f"], lp["wx_b"]
    assert len(wf_parts) == n_parts and len(wb_parts) == n_parts

    fwd_map = lambda t: (t, 0)
    bwd_map = lambda t: (nT - 1 - t, 0)
    const_map = lambda t: (0, 0)

    in_specs, args = [], []
    for p in x_parts:                              # forward-chunk streams
        in_specs.append(pl.BlockSpec((rows, p.shape[1]), fwd_map))
        args.append(p)
    for p in x_parts:                              # reversed-chunk streams (bwd dir)
        in_specs.append(pl.BlockSpec((rows, p.shape[1]), bwd_map))
        args.append(p)
    for w in wf_parts:
        in_specs.append(pl.BlockSpec(w.shape, const_map))
        args.append(w)
    for w in wb_parts:
        in_specs.append(pl.BlockSpec(w.shape, const_map))
        args.append(w)
    for w in (lp["bias_f"], lp["bias_b"], lp["whh"], lp["bhn"]):
        in_specs.append(pl.BlockSpec(w.shape, const_map))
        args.append(w)

    out_shape = (jax.ShapeDtypeStruct((S * Bp, H), jnp.float32),
                 jax.ShapeDtypeStruct((S * Bp, H), jnp.float32))
    out_specs = (pl.BlockSpec((rows, H), fwd_map),
                 pl.BlockSpec((rows, H), bwd_map))

    din_total = sum(p.shape[1] for p in x_parts)
    est = 4 * rows * (4 * din_total               # double-buffered fwd+bwd input streams
                      + 4 * H                     # double-buffered two outputs
                      + 6 * H + 2 * H)            # ig scratches + hbuf
    est += 4 * (2 * din_total * 3 * H + 2 * H * 6 * H + 16 * H)

    kernel = functools.partial(_bigru_layer_kernel, TS=TS, Bp=Bp, H=H,
                               n_parts=n_parts,
                               unroll=(True if TS <= 8 else 8))
    return pl.pallas_call(
        kernel,
        out_shape=out_shape,
        grid=(nT,),
        in_specs=in_specs,
        out_specs=out_specs,
        scratch_shapes=[pltpu.VMEM((rows, 3 * H), jnp.float32),   # igf
                        pltpu.VMEM((rows, 3 * H), jnp.float32),   # igb
                        pltpu.VMEM((rows, 2 * H), jnp.float32),   # hbuf
                        pltpu.VMEM((Bp, 2 * H), jnp.float32)],    # carried state
        compiler_params=pltpu.CompilerParams(
            dimension_semantics=("arbitrary",),
            vmem_limit_bytes=_vmem_limit(est)),
    )(*args)


# ----------------------------------------------------------------------------
# Parameter init (deterministic, PyTorch-style uniform scales)
# ----------------------------------------------------------------------------
def _uniform(key, shape, scale):
    return jax.random.uniform(key, shape, jnp.float32, -scale, scale)


def init_params(key, n_feat, n_channel, n_rc_layer):
    H = n_channel
    keys = iter(jax.random.split(key, 8 + 8 * n_rc_layer))
    p = {}
    s = 1.0 / jnp.sqrt(n_feat)
    p["mlp_w"] = _uniform(next(keys), (n_feat, 64), s)
    p["mlp_b"] = _uniform(next(keys), (64,), s)

    p["gru"] = []
    sg = 1.0 / jnp.sqrt(H)
    for l in range(n_rc_layer):
        in_l = 64 if l == 0 else 2 * H
        dirs = []
        for _d in range(2):
            dirs.append({
                "w_ih": _uniform(next(keys), (in_l, 3 * H), sg),   # = W_ih^T
                "b_ih": _uniform(next(keys), (3 * H,), sg),
                "w_hh_t": _uniform(next(keys), (H, 3 * H), sg),    # = W_hh^T
                "b_hh": _uniform(next(keys), (3 * H,), sg),
            })
        p["gru"].append(dirs)

    s1 = 1.0 / jnp.sqrt(2 * H)
    p["head1_w"] = _uniform(next(keys), (2 * H, 64), s1)
    p["head1_b"] = _uniform(next(keys), (64,), s1)
    s2 = 1.0 / jnp.sqrt(64)
    p["head2_w"] = _uniform(next(keys), (64, 1), s2)
    p["head2_b"] = _uniform(next(keys), (1,), s2)
    return p


# ----------------------------------------------------------------------------
# One-time parameter packing (folded biases, block-diag W_hh, split rows)
# ----------------------------------------------------------------------------
def pack_params(params, n_channel, n_rc_layer):
    H = n_channel
    pp = {"mlp_w": params["mlp_w"], "mlp_b": params["mlp_b"].reshape(1, -1)}

    def fold_bias(p):
        # fold b_hh into the r,z input biases (NOT n, because of r*(Whh h + bhn))
        bias = p["b_ih"] + jnp.concatenate(
            [p["b_hh"][:2 * H], jnp.zeros((H,), jnp.float32)])
        return bias.reshape(1, 3 * H), p["b_hh"][2 * H:]

    pp["gru"] = []
    for l in range(n_rc_layer):
        pf, pb = params["gru"][l]
        bias_f, bhn_f = fold_bias(pf)
        bias_b, bhn_b = fold_bias(pb)
        # gate-major (r,z,n), per-direction block-diagonal W_hh^T: (2H, 6H)
        whh = jnp.zeros((2 * H, 6 * H), jnp.float32)
        for g in range(3):
            whh = whh.at[0:H, g * 2 * H:g * 2 * H + H].set(
                pf["w_hh_t"][:, g * H:(g + 1) * H])
            whh = whh.at[H:2 * H, g * 2 * H + H:(g + 1) * 2 * H].set(
                pb["w_hh_t"][:, g * H:(g + 1) * H])
        lp = {"bias_f": bias_f, "bias_b": bias_b, "whh": whh,
              "bhn": jnp.concatenate([bhn_f, bhn_b]).reshape(1, 2 * H)}
        if l == 0:
            lp["wx_f"] = (pf["w_ih"],)
            lp["wx_b"] = (pb["w_ih"],)
        else:
            # split W_ih^T rows into the (fwd, bwd) halves of the previous layer
            lp["wx_f"] = (pf["w_ih"][:H], pf["w_ih"][H:])
            lp["wx_b"] = (pb["w_ih"][:H], pb["w_ih"][H:])
        pp["gru"].append(lp)

    pp["head1_wf"] = params["head1_w"][:H]
    pp["head1_wb"] = params["head1_w"][H:]
    pp["head1_b"] = params["head1_b"].reshape(1, -1)
    pp["head2_w"] = params["head2_w"]
    pp["head2_b"] = params["head2_b"].reshape(1, -1)
    return pp


# ----------------------------------------------------------------------------
# Forward passes
# ----------------------------------------------------------------------------
def dnn_forward_pallas(pp, x, *, n_channel, n_rc_layer, time_chunk=None):
    B, S, F = x.shape
    H = n_channel
    Bp = _round_up(B, 8)                       # pad batch to a full sublane tile
    TS = time_chunk if time_chunk is not None else _pick_time_chunk(S, Bp)
    assert S % TS == 0

    # one boundary layout change: batch-first -> time-major padded 2-D rows
    xt = jnp.transpose(x, (1, 0, 2))           # (S, B, F)
    if Bp != B:
        xt = jnp.pad(xt, ((0, 0), (0, Bp - B), (0, 0)))
    h2d = xt.reshape(S * Bp, F)

    # TODO(synk): the MLP could be fused into the layer-0 BiGRU prologue (at the
    # cost of computing it twice per row) to remove this HBM round trip.
    h2d = pallas_linear(h2d, pp["mlp_w"], pp["mlp_b"], relu=True)   # (S*Bp, 64)

    parts = (h2d,)
    for l in range(n_rc_layer):
        parts = pallas_bigru_layer(parts, pp["gru"][l], S=S, Bp=Bp, H=H, TS=TS)
        # TODO(synk): inter-layer dropout (train mode only) is identity in eval mode.

    y2d = pallas_head(parts[0], parts[1], pp["head1_wf"], pp["head1_wb"],
                      pp["head1_b"], pp["head2_w"], pp["head2_b"])   # (S*Bp, 1)
    y = y2d.reshape(S, Bp, 1)[:, :B, :]
    return jnp.transpose(y, (1, 0, 2))                               # (B, S, 1)


def dnn_forward_ref(params, x, n_channel, n_rc_layer):
    """Pure-JAX reference (same math, no Pallas) for validation."""
    B, S, _ = x.shape
    H = n_channel
    h = jnp.maximum(x @ params["mlp_w"] + params["mlp_b"], 0.0)  # (B, S, 64)

    layer_in = h
    for l in range(n_rc_layer):
        outs = []
        for d in range(2):
            p = params["gru"][l][d]
            xs = layer_in if d == 0 else layer_in[:, ::-1, :]

            def step(hprev, x_t, p=p):
                gx = x_t @ p["w_ih"] + p["b_ih"]
                gh = hprev @ p["w_hh_t"] + p["b_hh"]
                r = jax.nn.sigmoid(gx[:, :H] + gh[:, :H])
                z = jax.nn.sigmoid(gx[:, H:2 * H] + gh[:, H:2 * H])
                n = jnp.tanh(gx[:, 2 * H:] + r * gh[:, 2 * H:])
                hn = (1.0 - z) * n + z * hprev
                return hn, hn

            _, ys = lax.scan(step, jnp.zeros((B, H), jnp.float32),
                             jnp.swapaxes(xs, 0, 1))
            ys = jnp.swapaxes(ys, 0, 1)  # (B, S, H)
            if d == 1:
                ys = ys[:, ::-1, :]
            outs.append(ys)
        layer_in = jnp.concatenate(outs, axis=-1)  # (B, S, 2H)

    h = jnp.maximum(layer_in @ params["head1_w"] + params["head1_b"], 0.0)
    y = h @ params["head2_w"] + params["head2_b"]
    return y  # (B, S, 1)


# ----------------------------------------------------------------------------
if __name__ == "__main__":
    n_feat, n_channel, n_rc_layer = 16, 16, 2
    batch, seq = 2, 8

    key = jax.random.PRNGKey(0)
    kx, kp = jax.random.split(key)
    x = jax.random.normal(kx, (batch, seq, n_feat), dtype=jnp.float32)
    params = init_params(kp, n_feat, n_channel, n_rc_layer)
    packed = pack_params(params, n_channel, n_rc_layer)   # one-time host-side prep

    # time_chunk=4 -> 2 time chunks: exercises the cross-chunk state carry and
    # the reversed-chunk index maps of the pipelined BiGRU kernel.
    fwd = jax.jit(functools.partial(dnn_forward_pallas, n_channel=n_channel,
                                    n_rc_layer=n_rc_layer, time_chunk=4))
    y = jax.block_until_ready(fwd(packed, x))

    y_ref = jax.block_until_ready(dnn_forward_ref(params, x, n_channel, n_rc_layer))

    assert y.shape == (batch, seq, 1), y.shape
    assert jnp.all(jnp.isfinite(y)), "non-finite output"
    max_err = float(jnp.max(jnp.abs(y - y_ref)))
    assert jnp.allclose(y, y_ref, atol=1e-2, rtol=1e-2), (
        "mismatch vs reference: max abs err = %f" % max_err)

    print("KERNEL_OK")
</pallas_src>

<mosaic_0001>
module attributes {stable_mosaic.version = 11 : i64} {
  func.func @_linear_kernel(%arg0: i32, %arg1: memref<64x16xf32, #tpu.memory_space<vmem>>, %arg2: memref<16x64xf32, #tpu.memory_space<vmem>>, %arg3: memref<1x64xf32, #tpu.memory_space<vmem>>, %arg4: memref<64x64xf32, #tpu.memory_space<vmem>>) attributes {dimension_semantics = [#tpu.dimension_semantics<parallel>], iteration_bounds = array<i64: 1>, scalar_prefetch = 0 : i64, scratch_operands = 0 : i64, tpu.core_type = #tpu.core_type<tc>, window_params = [{transform_indices = @transform_0, window_bounds = array<i64: 64, 16>}, {pipeline_mode = #tpu.pipeline_mode<synchronous>, transform_indices = @transform_1, window_bounds = array<i64: 16, 64>}, {pipeline_mode = #tpu.pipeline_mode<synchronous>, transform_indices = @transform_2, window_bounds = array<i64: 1, 64>}, {transform_indices = @transform_3, window_bounds = array<i64: 64, 64>}]} {
    %c0 = arith.constant 0 : index
    %c0_0 = arith.constant 0 : index
    %0 = vector.load %arg1[%c0, %c0_0] : memref<64x16xf32, #tpu.memory_space<vmem>>, vector<64x16xf32>
    %c0_1 = arith.constant 0 : index
    %c0_2 = arith.constant 0 : index
    %1 = vector.load %arg2[%c0_1, %c0_2] : memref<16x64xf32, #tpu.memory_space<vmem>>, vector<16x64xf32>
    %cst = arith.constant dense<0.000000e+00> : vector<64x64xf32>
    %2 = tpu.matmul %0, %1, %cst {dimension_numbers = #tpu.dot_dimension_numbers<[1], [0], [0], [1], [0, 0, 1, 1], [], []>} : vector<64x16xf32>, vector<16x64xf32>, vector<64x64xf32> -> vector<64x64xf32>
    %c0_3 = arith.constant 0 : index
    %c0_4 = arith.constant 0 : index
    %3 = vector.load %arg3[%c0_3, %c0_4] : memref<1x64xf32, #tpu.memory_space<vmem>>, vector<1x64xf32>
    %4 = vector.broadcast %3 : vector<1x64xf32> to vector<64x64xf32>
    %5 = arith.addf %2, %4 : vector<64x64xf32>
    %cst_5 = arith.constant 0.000000e+00 : f32
    %6 = vector.broadcast %cst_5 : f32 to vector<64x64xf32>
    %7 = arith.maximumf %5, %6 : vector<64x64xf32>
    %c0_6 = arith.constant 0 : index
    %c0_7 = arith.constant 0 : index
    %8 = vector.load %arg4[%c0_6, %c0_7] : memref<64x64xf32, #tpu.memory_space<vmem>>, vector<64x64xf32>
    tpu.vector_store %arg4[%c0_6, %c0_7], %7 {strides = array<i32>} : memref<64x64xf32, #tpu.memory_space<vmem>>, vector<64x64xf32>,
    return
  }
  func.func @transform_0(%arg0: i32) -> (i32, i32) {
    %c0_i32 = arith.constant 0 : i32
    %c0_i32_0 = arith.constant 0 : i32
    return %arg0, %c0_i32 : i32, i32
  }
  func.func @transform_1(%arg0: i32) -> (i32, i32) {
    %c0_i32 = arith.constant 0 : i32
    %c0_i32_0 = arith.constant 0 : i32
    %c0_i32_1 = arith.constant 0 : i32
    return %c0_i32, %c0_i32_0 : i32, i32
  }
  func.func @transform_2(%arg0: i32) -> (i32, i32) {
    %c0_i32 = arith.constant 0 : i32
    %c0_i32_0 = arith.constant 0 : i32
    %c0_i32_1 = arith.constant 0 : i32
    return %c0_i32, %c0_i32_0 : i32, i32
  }
  func.func @transform_3(%arg0: i32) -> (i32, i32) {
    %c0_i32 = arith.constant 0 : i32
    %c0_i32_0 = arith.constant 0 : i32
    return %arg0, %c0_i32 : i32, i32
  }
}

module attributes {stable_mosaic.version = 11 : i64} {
  func.func @_bigru_layer_kernel(%arg0: i32, %arg1: memref<32x64xf32, #tpu.memory_space<vmem>>, %arg2: memref<32x64xf32, #tpu.memory_space<vmem>>, %arg3: memref<64x48xf32, #tpu.memory_space<vmem>>, %arg4: memref<64x48xf32, #tpu.memory_space<vmem>>, %arg5: memref<1x48xf32, #tpu.memory_space<vmem>>, %arg6: memref<1x48xf32, #tpu.memory_space<vmem>>, %arg7: memref<32x96xf32, #tpu.memory_space<vmem>>, %arg8: memref<1x32xf32, #tpu.memory_space<vmem>>, %arg9: memref<32x16xf32, #tpu.memory_space<vmem>>, %arg10: memref<32x16xf32, #tpu.memory_space<vmem>>, %arg11: memref<32x48xf32, #tpu.memory_space<vmem>>, %arg12: memref<32x48xf32, #tpu.memory_space<vmem>>, %arg13: memref<32x32xf32, #tpu.memory_space<vmem>>, %arg14: memref<8x32xf32, #tpu.memory_space<vmem>>) attributes {dimension_semantics = [#tpu.dimension_semantics<arbitrary>], iteration_bounds = array<i64: 2>, scalar_prefetch = 0 : i64, scratch_operands = 4 : i64, tpu.core_type = #tpu.core_type<tc>, window_params = [{transform_indices = @transform_0, window_bounds = array<i64: 32, 64>}, {transform_indices = @transform_1, window_bounds = array<i64: 32, 64>}, {pipeline_mode = #tpu.pipeline_mode<synchronous>, transform_indices = @transform_2, window_bounds = array<i64: 64, 48>}, {pipeline_mode = #tpu.pipeline_mode<synchronous>, transform_indices = @transform_3, window_bounds = array<i64: 64, 48>}, {pipeline_mode = #tpu.pipeline_mode<synchronous>, transform_indices = @transform_4, window_bounds = array<i64: 1, 48>}, {pipeline_mode = #tpu.pipeline_mode<synchronous>, transform_indices = @transform_5, window_bounds = array<i64: 1, 48>}, {pipeline_mode = #tpu.pipeline_mode<synchronous>, transform_indices = @transform_6, window_bounds = array<i64: 32, 96>}, {pipeline_mode = #tpu.pipeline_mode<synchronous>, transform_indices = @transform_7, window_bounds = array<i64: 1, 32>}, {transform_indices = @transform_8, window_bounds = array<i64: 32, 16>}, {transform_indices = @transform_9, window_bounds = array<i64: 32, 16>}]} {
    %c0_i32 = arith.constant 0 : i32
    %0 = arith.cmpi eq, %arg0, %c0_i32 : i32
    %1 = arith.extui %0 : i1 to i32
    %c0_i32_0 = arith.constant 0 : i32
    %2 = arith.cmpi ne, %1, %c0_i32_0 : i32
    scf.if %2 {
      %cst_94 = arith.constant 0.000000e+00 : f32
      %247 = vector.broadcast %cst_94 : f32 to vector<8x32xf32>
      %c0_95 = arith.constant 0 : index
      %c0_96 = arith.constant 0 : index
      %248 = vector.load %arg14[%c0_95, %c0_96] : memref<8x32xf32, #tpu.memory_space<vmem>>, vector<8x32xf32>
      tpu.vector_store %arg14[%c0_95, %c0_96], %247 {strides = array<i32>} : memref<8x32xf32, #tpu.memory_space<vmem>>, vector<8x32xf32>,
    } else {
    }
    %c0 = arith.constant 0 : index
    %c0_1 = arith.constant 0 : index
    %3 = vector.load %arg1[%c0, %c0_1] : memref<32x64xf32, #tpu.memory_space<vmem>>, vector<32x64xf32>
    %c0_2 = arith.constant 0 : index
    %c0_3 = arith.constant 0 : index
    %4 = vector.load %arg3[%c0_2, %c0_3] : memref<64x48xf32, #tpu.memory_space<vmem>>, vector<64x48xf32>
    %cst = arith.constant dense<0.000000e+00> : vector<32x48xf32>
    %5 = tpu.matmul %3, %4, %cst {dimension_numbers = #tpu.dot_dimension_numbers<[1], [0], [0], [1], [0, 0, 1, 1], [], []>} : vector<32x64xf32>, vector<64x48xf32>, vector<32x48xf32> -> vector<32x48xf32>
    %c0_4 = arith.constant 0 : index
    %c0_5 = arith.constant 0 : index
    %6 = vector.load %arg2[%c0_4, %c0_5] : memref<32x64xf32, #tpu.memory_space<vmem>>, vector<32x64xf32>
    %c0_6 = arith.constant 0 : index
    %c0_7 = arith.constant 0 : index
    %7 = vector.load %arg4[%c0_6, %c0_7] : memref<64x48xf32, #tpu.memory_space<vmem>>, vector<64x48xf32>
    %cst_8 = arith.constant dense<0.000000e+00> : vector<32x48xf32>
    %8 = tpu.matmul %6, %7, %cst_8 {dimension_numbers = #tpu.dot_dimension_numbers<[1], [0], [0], [1], [0, 0, 1, 1], [], []>} : vector<32x64xf32>, vector<64x48xf32>, vector<32x48xf32> -> vector<32x48xf32>
    %c0_9 = arith.constant 0 : index
    %c0_10 = arith.constant 0 : index
    %9 = vector.load %arg5[%c0_9, %c0_10] : memref<1x48xf32, #tpu.memory_space<vmem>>, vector<1x48xf32>
    %10 = vector.broadcast %9 : vector<1x48xf32> to vector<32x48xf32>
    %11 = arith.addf %5, %10 : vector<32x48xf32>
    %c0_11 = arith.constant 0 : index
    %c0_12 = arith.constant 0 : index
    %12 = vector.load %arg11[%c0_11, %c0_12] : memref<32x48xf32, #tpu.memory_space<vmem>>, vector<32x48xf32>
    tpu.vector_store %arg11[%c0_11, %c0_12], %11 {strides = array<i32>} : memref<32x48xf32, #tpu.memory_space<vmem>>, vector<32x48xf32>,
    %c0_13 = arith.constant 0 : index
    %c0_14 = arith.constant 0 : index
    %13 = vector.load %arg6[%c0_13, %c0_14] : memref<1x48xf32, #tpu.memory_space<vmem>>, vector<1x48xf32>
    %14 = vector.broadcast %13 : vector<1x48xf32> to vector<32x48xf32>
    %15 = arith.addf %8, %14 : vector<32x48xf32>
    %c0_15 = arith.constant 0 : index
    %c0_16 = arith.constant 0 : index
    %16 = vector.load %arg12[%c0_15, %c0_16] : memref<32x48xf32, #tpu.memory_space<vmem>>, vector<32x48xf32>
    tpu.vector_store %arg12[%c0_15, %c0_16], %15 {strides = array<i32>} : memref<32x48xf32, #tpu.memory_space<vmem>>, vector<32x48xf32>,
    %c0_17 = arith.constant 0 : index
    %c0_18 = arith.constant 0 : index
    %17 = vector.load %arg7[%c0_17, %c0_18] : memref<32x96xf32, #tpu.memory_space<vmem>>, vector<32x96xf32>
    %c0_19 = arith.constant 0 : index
    %c0_20 = arith.constant 0 : index
    %18 = vector.load %arg8[%c0_19, %c0_20] : memref<1x32xf32, #tpu.memory_space<vmem>>, vector<1x32xf32>
    %c0_21 = arith.constant 0 : index
    %c0_22 = arith.constant 0 : index
    %19 = vector.load %arg14[%c0_21, %c0_22] : memref<8x32xf32, #tpu.memory_space<vmem>>, vector<8x32xf32>
    %c0_i32_23 = arith.constant 0 : i32
    %c8_i32 = arith.constant 8 : i32
    %20 = arith.muli %c0_i32_23, %c8_i32 : i32
    %21 = tpu.assume_multiple %20, 8 : i32
    %c3_i32 = arith.constant 3 : i32
    %22 = arith.subi %c3_i32, %c0_i32_23 : i32
    %c8_i32_24 = arith.constant 8 : i32
    %23 = arith.muli %22, %c8_i32_24 : i32
    %24 = tpu.assume_multiple %23, 8 : i32
    %25 = arith.index_cast %21 : i32 to index
    %c0_25 = arith.constant 0 : index
    %26 = vector.load %arg11[%25, %c0_25] : memref<32x48xf32, #tpu.memory_space<vmem>>, vector<8x48xf32>
    %27 = arith.index_cast %24 : i32 to index
    %c0_26 = arith.constant 0 : index
    %28 = vector.load %arg12[%27, %c0_26] : memref<32x48xf32, #tpu.memory_space<vmem>>, vector<8x48xf32>
    %29 = vector.extract_strided_slice %26 {offsets = [0, 0], sizes = [8, 16], strides = [1, 1]} : vector<8x48xf32> to vector<8x16xf32>
    %30 = vector.extract_strided_slice %28 {offsets = [0, 0], sizes = [8, 16], strides = [1, 1]} : vector<8x48xf32> to vector<8x16xf32>
    %31 = tpu.concatenate %29, %30 in 1 : vector<8x16xf32>, vector<8x16xf32> -> vector<8x32xf32>
    %32 = vector.extract_strided_slice %26 {offsets = [0, 16], sizes = [8, 16], strides = [1, 1]} : vector<8x48xf32> to vector<8x16xf32>
    %33 = vector.extract_strided_slice %28 {offsets = [0, 16], sizes = [8, 16], strides = [1, 1]} : vector<8x48xf32> to vector<8x16xf32>
    %34 = tpu.concatenate %32, %33 in 1 : vector<8x16xf32>, vector<8x16xf32> -> vector<8x32xf32>
    %35 = vector.extract_strided_slice %26 {offsets = [0, 32], sizes = [8, 16], strides = [1, 1]} : vector<8x48xf32> to vector<8x16xf32>
    %36 = vector.extract_strided_slice %28 {offsets = [0, 32], sizes = [8, 16], strides = [1, 1]} : vector<8x48xf32> to vector<8x16xf32>
    %37 = tpu.concatenate %35, %36 in 1 : vector<8x16xf32>, vector<8x16xf32> -> vector<8x32xf32>
    %cst_27 = arith.constant dense<0.000000e+00> : vector<8x96xf32>
    %38 = tpu.matmul %19, %17, %cst_27 {dimension_numbers = #tpu.dot_dimension_numbers<[1], [0], [0], [1], [0, 0, 1, 1], [], []>} : vector<8x32xf32>, vector<32x96xf32>, vector<8x96xf32> -> vector<8x96xf32>
    %39 = vector.extract_strided_slice %38 {offsets = [0, 0], sizes = [8, 32], strides = [1, 1]} : vector<8x96xf32> to vector<8x32xf32>
    %40 = arith.addf %31, %39 : vector<8x32xf32>
    %41 = arith.negf %40 : vector<8x32xf32>
    %42 = math.exp %41 : vector<8x32xf32>
    %cst_28 = arith.constant 1.000000e+00 : f32
    %43 = vector.broadcast %cst_28 : f32 to vector<8x32xf32>
    %44 = arith.addf %43, %42 : vector<8x32xf32>
    %45 = arith.divf %43, %44 : vector<8x32xf32>
    %46 = vector.extract_strided_slice %38 {offsets = [0, 32], sizes = [8, 32], strides = [1, 1]} : vector<8x96xf32> to vector<8x32xf32>
    %47 = arith.addf %34, %46 : vector<8x32xf32>
    %48 = arith.negf %47 : vector<8x32xf32>
    %49 = math.exp %48 : vector<8x32xf32>
    %cst_29 = arith.constant 1.000000e+00 : f32
    %50 = vector.broadcast %cst_29 : f32 to vector<8x32xf32>
    %51 = arith.addf %50, %49 : vector<8x32xf32>
    %52 = arith.divf %50, %51 : vector<8x32xf32>
    %53 = vector.extract_strided_slice %38 {offsets = [0, 64], sizes = [8, 32], strides = [1, 1]} : vector<8x96xf32> to vector<8x32xf32>
    %54 = vector.broadcast %18 : vector<1x32xf32> to vector<8x32xf32>
    %55 = arith.addf %53, %54 : vector<8x32xf32>
    %56 = arith.mulf %45, %55 : vector<8x32xf32>
    %57 = arith.addf %37, %56 : vector<8x32xf32>
    %58 = math.tanh %57 : vector<8x32xf32>
    %cst_30 = arith.constant 1.000000e+00 : f32
    %59 = vector.broadcast %cst_30 : f32 to vector<8x32xf32>
    %60 = arith.subf %59, %52 : vector<8x32xf32>
    %61 = arith.mulf %60, %58 : vector<8x32xf32>
    %62 = arith.mulf %52, %19 : vector<8x32xf32>
    %63 = arith.addf %61, %62 : vector<8x32xf32>
    %64 = arith.index_cast %21 : i32 to index
    %c0_31 = arith.constant 0 : index
    %65 = vector.load %arg13[%64, %c0_31] : memref<32x32xf32, #tpu.memory_space<vmem>>, vector<8x32xf32>
    tpu.vector_store %arg13[%64, %c0_31], %63 {strides = array<i32>} : memref<32x32xf32, #tpu.memory_space<vmem>>, vector<8x32xf32>,
    %c1_i32 = arith.constant 1 : i32
    %c8_i32_32 = arith.constant 8 : i32
    %66 = arith.muli %c1_i32, %c8_i32_32 : i32
    %67 = tpu.assume_multiple %66, 8 : i32
    %c3_i32_33 = arith.constant 3 : i32
    %68 = arith.subi %c3_i32_33, %c1_i32 : i32
    %c8_i32_34 = arith.constant 8 : i32
    %69 = arith.muli %68, %c8_i32_34 : i32
    %70 = tpu.assume_multiple %69, 8 : i32
    %71 = arith.index_cast %67 : i32 to index
    %c0_35 = arith.constant 0 : index
    %72 = vector.load %arg11[%71, %c0_35] : memref<32x48xf32, #tpu.memory_space<vmem>>, vector<8x48xf32>
    %73 = arith.index_cast %70 : i32 to index
    %c0_36 = arith.constant 0 : index
    %74 = vector.load %arg12[%73, %c0_36] : memref<32x48xf32, #tpu.memory_space<vmem>>, vector<8x48xf32>
    %75 = vector.extract_strided_slice %72 {offsets = [0, 0], sizes = [8, 16], strides = [1, 1]} : vector<8x48xf32> to vector<8x16xf32>
    %76 = vector.extract_strided_slice %74 {offsets = [0, 0], sizes = [8, 16], strides = [1, 1]} : vector<8x48xf32> to vector<8x16xf32>
    %77 = tpu.concatenate %75, %76 in 1 : vector<8x16xf32>, vector<8x16xf32> -> vector<8x32xf32>
    %78 = vector.extract_strided_slice %72 {offsets = [0, 16], sizes = [8, 16], strides = [1, 1]} : vector<8x48xf32> to vector<8x16xf32>
    %79 = vector.extract_strided_slice %74 {offsets = [0, 16], sizes = [8, 16], strides = [1, 1]} : vector<8x48xf32> to vector<8x16xf32>
    %80 = tpu.concatenate %78, %79 in 1 : vector<8x16xf32>, vector<8x16xf32> -> vector<8x32xf32>
    %81 = vector.extract_strided_slice %72 {offsets = [0, 32], sizes = [8, 16], strides = [1, 1]} : vector<8x48xf32> to vector<8x16xf32>
    %82 = vector.extract_strided_slice %74 {offsets = [0, 32], sizes = [8, 16], strides = [1, 1]} : vector<8x48xf32> to vector<8x16xf32>
    %83 = tpu.concatenate %81, %82 in 1 : vector<8x16xf32>, vector<8x16xf32> -> vector<8x32xf32>
    %cst_37 = arith.constant dense<0.000000e+00> : vector<8x96xf32>
    %84 = tpu.matmul %63, %17, %cst_37 {dimension_numbers = #tpu.dot_dimension_numbers<[1], [0], [0], [1], [0, 0, 1, 1], [], []>} : vector<8x32xf32>, vector<32x96xf32>, vector<8x96xf32> -> vector<8x96xf32>
    %85 = vector.extract_strided_slice %84 {offsets = [0, 0], sizes = [8, 32], strides = [1, 1]} : vector<8x96xf32> to vector<8x32xf32>
    %86 = arith.addf %77, %85 : vector<8x32xf32>
    %87 = arith.negf %86 : vector<8x32xf32>
    %88 = math.exp %87 : vector<8x32xf32>
    %cst_38 = arith.constant 1.000000e+00 : f32
    %89 = vector.broadcast %cst_38 : f32 to vector<8x32xf32>
    %90 = arith.addf %89, %88 : vector<8x32xf32>
    %91 = arith.divf %89, %90 : vector<8x32xf32>
    %92 = vector.extract_strided_slice %84 {offsets = [0, 32], sizes = [8, 32], strides = [1, 1]} : vector<8x96xf32> to vector<8x32xf32>
    %93 = arith.addf %80, %92 : vector<8x32xf32>
    %94 = arith.negf %93 : vector<8x32xf32>
    %95 = math.exp %94 : vector<8x32xf32>
    %cst_39 = arith.constant 1.000000e+00 : f32
    %96 = vector.broadcast %cst_39 : f32 to vector<8x32xf32>
    %97 = arith.addf %96, %95 : vector<8x32xf32>
    %98 = arith.divf %96, %97 : vector<8x32xf32>
    %99 = vector.extract_strided_slice %84 {offsets = [0, 64], sizes = [8, 32], strides = [1, 1]} : vector<8x96xf32> to vector<8x32xf32>
    %100 = vector.broadcast %18 : vector<1x32xf32> to vector<8x32xf32>
    %101 = arith.addf %99, %100 : vector<8x32xf32>
    %102 = arith.mulf %91, %101 : vector<8x32xf32>
    %103 = arith.addf %83, %102 : vector<8x32xf32>
    %104 = math.tanh %103 : vector<8x32xf32>
    %cst_40 = arith.constant 1.000000e+00 : f32
    %105 = vector.broadcast %cst_40 : f32 to vector<8x32xf32>
    %106 = arith.subf %105, %98 : vector<8x32xf32>
    %107 = arith.mulf %106, %104 : vector<8x32xf32>
    %108 = arith.mulf %98, %63 : vector<8x32xf32>
    %109 = arith.addf %107, %108 : vector<8x32xf32>
    %110 = arith.index_cast %67 : i32 to index
    %c0_41 = arith.constant 0 : index
    %111 = vector.load %arg13[%110, %c0_41] : memref<32x32xf32, #tpu.memory_space<vmem>>, vector<8x32xf32>
    tpu.vector_store %arg13[%110, %c0_41], %109 {strides = array<i32>} : memref<32x32xf32, #tpu.memory_space<vmem>>, vector<8x32xf32>,
    %c2_i32 = arith.constant 2 : i32
    %c8_i32_42 = arith.constant 8 : i32
    %112 = arith.muli %c2_i32, %c8_i32_42 : i32
    %113 = tpu.assume_multiple %112, 8 : i32
    %c3_i32_43 = arith.constant 3 : i32
    %114 = arith.subi %c3_i32_43, %c2_i32 : i32
    %c8_i32_44 = arith.constant 8 : i32
    %115 = arith.muli %114, %c8_i32_44 : i32
    %116 = tpu.assume_multiple %115, 8 : i32
    %117 = arith.index_cast %113 : i32 to index
    %c0_45 = arith.constant 0 : index
    %118 = vector.load %arg11[%117, %c0_45] : memref<32x48xf32, #tpu.memory_space<vmem>>, vector<8x48xf32>
    %119 = arith.index_cast %116 : i32 to index
    %c0_46 = arith.constant 0 : index
    %120 = vector.load %arg12[%119, %c0_46] : memref<32x48xf32, #tpu.memory_space<vmem>>, vector<8x48xf32>
    %121 = vector.extract_strided_slice %118 {offsets = [0, 0], sizes = [8, 16], strides = [1, 1]} : vector<8x48xf32> to vector<8x16xf32>
    %122 = vector.extract_strided_slice %120 {offsets = [0, 0], sizes = [8, 16], strides = [1, 1]} : vector<8x48xf32> to vector<8x16xf32>
    %123 = tpu.concatenate %121, %122 in 1 : vector<8x16xf32>, vector<8x16xf32> -> vector<8x32xf32>
    %124 = vector.extract_strided_slice %118 {offsets = [0, 16], sizes = [8, 16], strides = [1, 1]} : vector<8x48xf32> to vector<8x16xf32>
    %125 = vector.extract_strided_slice %120 {offsets = [0, 16], sizes = [8, 16], strides = [1, 1]} : vector<8x48xf32> to vector<8x16xf32>
    %126 = tpu.concatenate %124, %125 in 1 : vector<8x16xf32>, vector<8x16xf32> -> vector<8x32xf32>
    %127 = vector.extract_strided_slice %118 {offsets = [0, 32], sizes = [8, 16], strides = [1, 1]} : vector<8x48xf32> to vector<8x16xf32>
    %128 = vector.extract_strided_slice %120 {offsets = [0, 32], sizes = [8, 16], strides = [1, 1]} : vector<8x48xf32> to vector<8x16xf32>
    %129 = tpu.concatenate %127, %128 in 1 : vector<8x16xf32>, vector<8x16xf32> -> vector<8x32xf32>
    %cst_47 = arith.constant dense<0.000000e+00> : vector<8x96xf32>
    %130 = tpu.matmul %109, %17, %cst_47 {dimension_numbers = #tpu.dot_dimension_numbers<[1], [0], [0], [1], [0, 0, 1, 1], [], []>} : vector<8x32xf32>, vector<32x96xf32>, vector<8x96xf32> -> vector<8x96xf32>
    %131 = vector.extract_strided_slice %130 {offsets = [0, 0], sizes = [8, 32], strides = [1, 1]} : vector<8x96xf32> to vector<8x32xf32>
    %132 = arith.addf %123, %131 : vector<8x32xf32>
    %133 = arith.negf %132 : vector<8x32xf32>
    %134 = math.exp %133 : vector<8x32xf32>
    %cst_48 = arith.constant 1.000000e+00 : f32
    %135 = vector.broadcast %cst_48 : f32 to vector<8x32xf32>
    %136 = arith.addf %135, %134 : vector<8x32xf32>
    %137 = arith.divf %135, %136 : vector<8x32xf32>
    %138 = vector.extract_strided_slice %130 {offsets = [0, 32], sizes = [8, 32], strides = [1, 1]} : vector<8x96xf32> to vector<8x32xf32>
    %139 = arith.addf %126, %138 : vector<8x32xf32>
    %140 = arith.negf %139 : vector<8x32xf32>
    %141 = math.exp %140 : vector<8x32xf32>
    %cst_49 = arith.constant 1.000000e+00 : f32
    %142 = vector.broadcast %cst_49 : f32 to vector<8x32xf32>
    %143 = arith.addf %142, %141 : vector<8x32xf32>
    %144 = arith.divf %142, %143 : vector<8x32xf32>
    %145 = vector.extract_strided_slice %130 {offsets = [0, 64], sizes = [8, 32], strides = [1, 1]} : vector<8x96xf32> to vector<8x32xf32>
    %146 = vector.broadcast %18 : vector<1x32xf32> to vector<8x32xf32>
    %147 = arith.addf %145, %146 : vector<8x32xf32>
    %148 = arith.mulf %137, %147 : vector<8x32xf32>
    %149 = arith.addf %129, %148 : vector<8x32xf32>
    %150 = math.tanh %149 : vector<8x32xf32>
    %cst_50 = arith.constant 1.000000e+00 : f32
    %151 = vector.broadcast %cst_50 : f32 to vector<8x32xf32>
    %152 = arith.subf %151, %144 : vector<8x32xf32>
    %153 = arith.mulf %152, %150 : vector<8x32xf32>
    %154 = arith.mulf %144, %109 : vector<8x32xf32>
    %155 = arith.addf %153, %154 : vector<8x32xf32>
    %156 = arith.index_cast %113 : i32 to index
    %c0_51 = arith.constant 0 : index
    %157 = vector.load %arg13[%156, %c0_51] : memref<32x32xf32, #tpu.memory_space<vmem>>, vector<8x32xf32>
    tpu.vector_store %arg13[%156, %c0_51], %155 {strides = array<i32>} : memref<32x32xf32, #tpu.memory_space<vmem>>, vector<8x32xf32>,
    %c3_i32_52 = arith.constant 3 : i32
    %c8_i32_53 = arith.constant 8 : i32
    %158 = arith.muli %c3_i32_52, %c8_i32_53 : i32
    %159 = tpu.assume_multiple %158, 8 : i32
    %c3_i32_54 = arith.constant 3 : i32
    %160 = arith.subi %c3_i32_54, %c3_i32_52 : i32
    %c8_i32_55 = arith.constant 8 : i32
    %161 = arith.muli %160, %c8_i32_55 : i32
    %162 = tpu.assume_multiple %161, 8 : i32
    %163 = arith.index_cast %159 : i32 to index
    %c0_56 = arith.constant 0 : index
    %164 = vector.load %arg11[%163, %c0_56] : memref<32x48xf32, #tpu.memory_space<vmem>>, vector<8x48xf32>
    %165 = arith.index_cast %162 : i32 to index
    %c0_57 = arith.constant 0 : index
    %166 = vector.load %arg12[%165, %c0_57] : memref<32x48xf32, #tpu.memory_space<vmem>>, vector<8x48xf32>
    %167 = vector.extract_strided_slice %164 {offsets = [0, 0], sizes = [8, 16], strides = [1, 1]} : vector<8x48xf32> to vector<8x16xf32>
    %168 = vector.extract_strided_slice %166 {offsets = [0, 0], sizes = [8, 16], strides = [1, 1]} : vector<8x48xf32> to vector<8x16xf32>
    %169 = tpu.concatenate %167, %168 in 1 : vector<8x16xf32>, vector<8x16xf32> -> vector<8x32xf32>
    %170 = vector.extract_strided_slice %164 {offsets = [0, 16], sizes = [8, 16], strides = [1, 1]} : vector<8x48xf32> to vector<8x16xf32>
    %171 = vector.extract_strided_slice %166 {offsets = [0, 16], sizes = [8, 16], strides = [1, 1]} : vector<8x48xf32> to vector<8x16xf32>
    %172 = tpu.concatenate %170, %171 in 1 : vector<8x16xf32>, vector<8x16xf32> -> vector<8x32xf32>
    %173 = vector.extract_strided_slice %164 {offsets = [0, 32], sizes = [8, 16], strides = [1, 1]} : vector<8x48xf32> to vector<8x16xf32>
    %174 = vector.extract_strided_slice %166 {offsets = [0, 32], sizes = [8, 16], strides = [1, 1]} : vector<8x48xf32> to vector<8x16xf32>
    %175 = tpu.concatenate %173, %174 in 1 : vector<8x16xf32>, vector<8x16xf32> -> vector<8x32xf32>
    %cst_58 = arith.constant dense<0.000000e+00> : vector<8x96xf32>
    %176 = tpu.matmul %155, %17, %cst_58 {dimension_numbers = #tpu.dot_dimension_numbers<[1], [0], [0], [1], [0, 0, 1, 1], [], []>} : vector<8x32xf32>, vector<32x96xf32>, vector<8x96xf32> -> vector<8x96xf32>
    %177 = vector.extract_strided_slice %176 {offsets = [0, 0], sizes = [8, 32], strides = [1, 1]} : vector<8x96xf32> to vector<8x32xf32>
    %178 = arith.addf %169, %177 : vector<8x32xf32>
    %179 = arith.negf %178 : vector<8x32xf32>
    %180 = math.exp %179 : vector<8x32xf32>
    %cst_59 = arith.constant 1.000000e+00 : f32
    %181 = vector.broadcast %cst_59 : f32 to vector<8x32xf32>
    %182 = arith.addf %181, %180 : vector<8x32xf32>
    %183 = arith.divf %181, %182 : vector<8x32xf32>
    %184 = vector.extract_strided_slice %176 {offsets = [0, 32], sizes = [8, 32], strides = [1, 1]} : vector<8x96xf32> to vector<8x32xf32>
    %185 = arith.addf %172, %184 : vector<8x32xf32>
    %186 = arith.negf %185 : vector<8x32xf32>
    %187 = math.exp %186 : vector<8x32xf32>
    %cst_60 = arith.constant 1.000000e+00 : f32
    %188 = vector.broadcast %cst_60 : f32 to vector<8x32xf32>
    %189 = arith.addf %188, %187 : vector<8x32xf32>
    %190 = arith.divf %188, %189 : vector<8x32xf32>
    %191 = vector.extract_strided_slice %176 {offsets = [0, 64], sizes = [8, 32], strides = [1, 1]} : vector<8x96xf32> to vector<8x32xf32>
    %192 = vector.broadcast %18 : vector<1x32xf32> to vector<8x32xf32>
    %193 = arith.addf %191, %192 : vector<8x32xf32>
    %194 = arith.mulf %183, %193 : vector<8x32xf32>
    %195 = arith.addf %175, %194 : vector<8x32xf32>
    %196 = math.tanh %195 : vector<8x32xf32>
    %cst_61 = arith.constant 1.000000e+00 : f32
    %197 = vector.broadcast %cst_61 : f32 to vector<8x32xf32>
    %198 = arith.subf %197, %190 : vector<8x32xf32>
    %199 = arith.mulf %198, %196 : vector<8x32xf32>
    %200 = arith.mulf %190, %155 : vector<8x32xf32>
    %201 = arith.addf %199, %200 : vector<8x32xf32>
    %202 = arith.index_cast %159 : i32 to index
    %c0_62 = arith.constant 0 : index
    %203 = vector.load %arg13[%202, %c0_62] : memref<32x32xf32, #tpu.memory_space<vmem>>, vector<8x32xf32>
    tpu.vector_store %arg13[%202, %c0_62], %201 {strides = array<i32>} : memref<32x32xf32, #tpu.memory_space<vmem>>, vector<8x32xf32>,
    %c4_i32 = arith.constant 4 : i32
    %c0_63 = arith.constant 0 : index
    %c0_64 = arith.constant 0 : index
    %204 = vector.load %arg14[%c0_63, %c0_64] : memref<8x32xf32, #tpu.memory_space<vmem>>, vector<8x32xf32>
    tpu.vector_store %arg14[%c0_63, %c0_64], %201 {strides = array<i32>} : memref<8x32xf32, #tpu.memory_space<vmem>>, vector<8x32xf32>,
    %c0_65 = arith.constant 0 : index
    %c0_66 = arith.constant 0 : index
    %205 = vector.load %arg13[%c0_65, %c0_66] : memref<32x32xf32, #tpu.memory_space<vmem>>, vector<32x16xf32>
    %c0_67 = arith.constant 0 : index
    %c0_68 = arith.constant 0 : index
    %206 = vector.load %arg9[%c0_67, %c0_68] : memref<32x16xf32, #tpu.memory_space<vmem>>, vector<32x16xf32>
    tpu.vector_store %arg9[%c0_67, %c0_68], %205 {strides = array<i32>} : memref<32x16xf32, #tpu.memory_space<vmem>>, vector<32x16xf32>,
    %c0_i32_69 = arith.constant 0 : i32
    %c8_i32_70 = arith.constant 8 : i32
    %207 = arith.muli %c0_i32_69, %c8_i32_70 : i32
    %208 = tpu.assume_multiple %207, 8 : i32
    %c3_i32_71 = arith.constant 3 : i32
    %209 = arith.subi %c3_i32_71, %c0_i32_69 : i32
    %c8_i32_72 = arith.constant 8 : i32
    %210 = arith.muli %209, %c8_i32_72 : i32
    %211 = tpu.assume_multiple %210, 8 : i32
    %212 = arith.index_cast %208 : i32 to index
    %c0_73 = arith.constant 0 : index
    %213 = vector.load %arg13[%212, %c0_73] : memref<32x32xf32, #tpu.memory_space<vmem>>, vector<8x32xf32>
    %214 = vector.extract_strided_slice %213 {offsets = [0, 16], sizes = [8, 16], strides = [1, 1]} : vector<8x32xf32> to vector<8x16xf32>
    %215 = arith.index_cast %211 : i32 to index
    %c0_74 = arith.constant 0 : index
    %216 = vector.load %arg10[%215, %c0_74] : memref<32x16xf32, #tpu.memory_space<vmem>>, vector<8x16xf32>
    tpu.vector_store %arg10[%215, %c0_74], %214 {strides = array<i32>} : memref<32x16xf32, #tpu.memory_space<vmem>>, vector<8x16xf32>,
    %c1_i32_75 = arith.constant 1 : i32
    %c8_i32_76 = arith.constant 8 : i32
    %217 = arith.muli %c1_i32_75, %c8_i32_76 : i32
    %218 = tpu.assume_multiple %217, 8 : i32
    %c3_i32_77 = arith.constant 3 : i32
    %219 = arith.subi %c3_i32_77, %c1_i32_75 : i32
    %c8_i32_78 = arith.constant 8 : i32
    %220 = arith.muli %219, %c8_i32_78 : i32
    %221 = tpu.assume_multiple %220, 8 : i32
    %222 = arith.index_cast %218 : i32 to index
    %c0_79 = arith.constant 0 : index
    %223 = vector.load %arg13[%222, %c0_79] : memref<32x32xf32, #tpu.memory_space<vmem>>, vector<8x32xf32>
    %224 = vector.extract_strided_slice %223 {offsets = [0, 16], sizes = [8, 16], strides = [1, 1]} : vector<8x32xf32> to vector<8x16xf32>
    %225 = arith.index_cast %221 : i32 to index
    %c0_80 = arith.constant 0 : index
    %226 = vector.load %arg10[%225, %c0_80] : memref<32x16xf32, #tpu.memory_space<vmem>>, vector<8x16xf32>
    tpu.vector_store %arg10[%225, %c0_80], %224 {strides = array<i32>} : memref<32x16xf32, #tpu.memory_space<vmem>>, vector<8x16xf32>,
    %c2_i32_81 = arith.constant 2 : i32
    %c8_i32_82 = arith.constant 8 : i32
    %227 = arith.muli %c2_i32_81, %c8_i32_82 : i32
    %228 = tpu.assume_multiple %227, 8 : i32
    %c3_i32_83 = arith.constant 3 : i32
    %229 = arith.subi %c3_i32_83, %c2_i32_81 : i32
    %c8_i32_84 = arith.constant 8 : i32
    %230 = arith.muli %229, %c8_i32_84 : i32
    %231 = tpu.assume_multiple %230, 8 : i32
    %232 = arith.index_cast %228 : i32 to index
    %c0_85 = arith.constant 0 : index
    %233 = vector.load %arg13[%232, %c0_85] : memref<32x32xf32, #tpu.memory_space<vmem>>, vector<8x32xf32>
    %234 = vector.extract_strided_slice %233 {offsets = [0, 16], sizes = [8, 16], strides = [1, 1]} : vector<8x32xf32> to vector<8x16xf32>
    %235 = arith.index_cast %231 : i32 to index
    %c0_86 = arith.constant 0 : index
    %236 = vector.load %arg10[%235, %c0_86] : memref<32x16xf32, #tpu.memory_space<vmem>>, vector<8x16xf32>
    tpu.vector_store %arg10[%235, %c0_86], %234 {strides = array<i32>} : memref<32x16xf32, #tpu.memory_space<vmem>>, vector<8x16xf32>,
    %c3_i32_87 = arith.constant 3 : i32
    %c8_i32_88 = arith.constant 8 : i32
    %237 = arith.muli %c3_i32_87, %c8_i32_88 : i32
    %238 = tpu.assume_multiple %237, 8 : i32
    %c3_i32_89 = arith.constant 3 : i32
    %239 = arith.subi %c3_i32_89, %c3_i32_87 : i32
    %c8_i32_90 = arith.constant 8 : i32
    %240 = arith.muli %239, %c8_i32_90 : i32
    %241 = tpu.assume_multiple %240, 8 : i32
    %242 = arith.index_cast %238 : i32 to index
    %c0_91 = arith.constant 0 : index
    %243 = vector.load %arg13[%242, %c0_91] : memref<32x32xf32, #tpu.memory_space<vmem>>, vector<8x32xf32>
    %244 = vector.extract_strided_slice %243 {offsets = [0, 16], sizes = [8, 16], strides = [1, 1]} : vector<8x32xf32> to vector<8x16xf32>
    %245 = arith.index_cast %241 : i32 to index
    %c0_92 = arith.constant 0 : index
    %246 = vector.load %arg10[%245, %c0_92] : memref<32x16xf32, #tpu.memory_space<vmem>>, vector<8x16xf32>
    tpu.vector_store %arg10[%245, %c0_92], %244 {strides = array<i32>} : memref<32x16xf32, #tpu.memory_space<vmem>>, vector<8x16xf32>,
    %c4_i32_93 = arith.constant 4 : i32
    return
  }
  func.func @transform_0(%arg0: i32) -> (i32, i32) {
    %c0_i32 = arith.constant 0 : i32
    %c0_i32_0 = arith.constant 0 : i32
    return %arg0, %c0_i32 : i32, i32
  }
  func.func @transform_1(%arg0: i32) -> (i32, i32) {
    %c1_i32 = arith.constant 1 : i32
    %0 = arith.subi %c1_i32, %arg0 : i32
    %c0_i32 = arith.constant 0 : i32
    %c0_i32_0 = arith.constant 0 : i32
    return %0, %c0_i32 : i32, i32
  }
  func.func @transform_2(%arg0: i32) -> (i32, i32) {
    %c0_i32 = arith.constant 0 : i32
    %c0_i32_0 = arith.constant 0 : i32
    %c0_i32_1 = arith.constant 0 : i32
    return %c0_i32, %c0_i32_0 : i32, i32
  }
  func.func @transform_3(%arg0: i32) -> (i32, i32) {
    %c0_i32 = arith.constant 0 : i32
    %c0_i32_0 = arith.constant 0 : i32
    %c0_i32_1 = arith.constant 0 : i32
    return %c0_i32, %c0_i32_0 : i32, i32
  }
  func.func @transform_4(%arg0: i32) -> (i32, i32) {
    %c0_i32 = arith.constant 0 : i32
    %c0_i32_0 = arith.constant 0 : i32
    %c0_i32_1 = arith.constant 0 : i32
    return %c0_i32, %c0_i32_0 : i32, i32
  }
  func.func @transform_5(%arg0: i32) -> (i32, i32) {
    %c0_i32 = arith.constant 0 : i32
    %c0_i32_0 = arith.constant 0 : i32
    %c0_i32_1 = arith.constant 0 : i32
    return %c0_i32, %c0_i32_0 : i32, i32
  }
  func.func @transform_6(%arg0: i32) -> (i32, i32) {
    %c0_i32 = arith.constant 0 : i32
    %c0_i32_0 = arith.constant 0 : i32
    %c0_i32_1 = arith.constant 0 : i32
    return %c0_i32, %c0_i32_0 : i32, i32
  }
  func.func @transform_7(%arg0: i32) -> (i32, i32) {
    %c0_i32 = arith.constant 0 : i32
    %c0_i32_0 = arith.constant 0 : i32
    %c0_i32_1 = arith.constant 0 : i32
    return %c0_i32, %c0_i32_0 : i32, i32
  }
  func.func @transform_8(%arg0: i32) -> (i32, i32) {
    %c0_i32 = arith.constant 0 : i32
    %c0_i32_0 = arith.constant 0 : i32
    return %arg0, %c0_i32 : i32, i32
  }
  func.func @transform_9(%arg0: i32) -> (i32, i32) {
    %c1_i32 = arith.constant 1 : i32
    %0 = arith.subi %c1_i32, %arg0 : i32
    %c0_i32 = arith.constant 0 : i32
    %c0_i32_0 = arith.constant 0 : i32
    return %0, %c0_i32 : i32, i32
  }
}

module attributes {stable_mosaic.version = 11 : i64} {
  func.func @_bigru_layer_kernel(%arg0: i32, %arg1: memref<32x16xf32, #tpu.memory_space<vmem>>, %arg2: memref<32x16xf32, #tpu.memory_space<vmem>>, %arg3: memref<32x16xf32, #tpu.memory_space<vmem>>, %arg4: memref<32x16xf32, #tpu.memory_space<vmem>>, %arg5: memref<16x48xf32, #tpu.memory_space<vmem>>, %arg6: memref<16x48xf32, #tpu.memory_space<vmem>>, %arg7: memref<16x48xf32, #tpu.memory_space<vmem>>, %arg8: memref<16x48xf32, #tpu.memory_space<vmem>>, %arg9: memref<1x48xf32, #tpu.memory_space<vmem>>, %arg10: memref<1x48xf32, #tpu.memory_space<vmem>>, %arg11: memref<32x96xf32, #tpu.memory_space<vmem>>, %arg12: memref<1x32xf32, #tpu.memory_space<vmem>>, %arg13: memref<32x16xf32, #tpu.memory_space<vmem>>, %arg14: memref<32x16xf32, #tpu.memory_space<vmem>>, %arg15: memref<32x48xf32, #tpu.memory_space<vmem>>, %arg16: memref<32x48xf32, #tpu.memory_space<vmem>>, %arg17: memref<32x32xf32, #tpu.memory_space<vmem>>, %arg18: memref<8x32xf32, #tpu.memory_space<vmem>>) attributes {dimension_semantics = [#tpu.dimension_semantics<arbitrary>], iteration_bounds = array<i64: 2>, scalar_prefetch = 0 : i64, scratch_operands = 4 : i64, tpu.core_type = #tpu.core_type<tc>, window_params = [{transform_indices = @transform_0, window_bounds = array<i64: 32, 16>}, {transform_indices = @transform_1, window_bounds = array<i64: 32, 16>}, {transform_indices = @transform_2, window_bounds = array<i64: 32, 16>}, {transform_indices = @transform_3, window_bounds = array<i64: 32, 16>}, {pipeline_mode = #tpu.pipeline_mode<synchronous>, transform_indices = @transform_4, window_bounds = array<i64: 16, 48>}, {pipeline_mode = #tpu.pipeline_mode<synchronous>, transform_indices = @transform_5, window_bounds = array<i64: 16, 48>}, {pipeline_mode = #tpu.pipeline_mode<synchronous>, transform_indices = @transform_6, window_bounds = array<i64: 16, 48>}, {pipeline_mode = #tpu.pipeline_mode<synchronous>, transform_indices = @transform_7, window_bounds = array<i64: 16, 48>}, {pipeline_mode = #tpu.pipeline_mode<synchronous>, transform_indices = @transform_8, window_bounds = array<i64: 1, 48>}, {pipeline_mode = #tpu.pipeline_mode<synchronous>, transform_indices = @transform_9, window_bounds = array<i64: 1, 48>}, {pipeline_mode = #tpu.pipeline_mode<synchronous>, transform_indices = @transform_10, window_bounds = array<i64: 32, 96>}, {pipeline_mode = #tpu.pipeline_mode<synchronous>, transform_indices = @transform_11, window_bounds = array<i64: 1, 32>}, {transform_indices = @transform_12, window_bounds = array<i64: 32, 16>}, {transform_indices = @transform_13, window_bounds = array<i64: 32, 16>}]} {
    %c0_i32 = arith.constant 0 : i32
    %0 = arith.cmpi eq, %arg0, %c0_i32 : i32
    %1 = arith.extui %0 : i1 to i32
    %c0_i32_0 = arith.constant 0 : i32
    %2 = arith.cmpi ne, %1, %c0_i32_0 : i32
    scf.if %2 {
      %cst_104 = arith.constant 0.000000e+00 : f32
      %255 = vector.broadcast %cst_104 : f32 to vector<8x32xf32>
      %c0_105 = arith.constant 0 : index
      %c0_106 = arith.constant 0 : index
      %256 = vector.load %arg18[%c0_105, %c0_106] : memref<8x32xf32, #tpu.memory_space<vmem>>, vector<8x32xf32>
      tpu.vector_store %arg18[%c0_105, %c0_106], %255 {strides = array<i32>} : memref<8x32xf32, #tpu.memory_space<vmem>>, vector<8x32xf32>,
    } else {
    }
    %c0 = arith.constant 0 : index
    %c0_1 = arith.constant 0 : index
    %3 = vector.load %arg1[%c0, %c0_1] : memref<32x16xf32, #tpu.memory_space<vmem>>, vector<32x16xf32>
    %c0_2 = arith.constant 0 : index
    %c0_3 = arith.constant 0 : index
    %4 = vector.load %arg5[%c0_2, %c0_3] : memref<16x48xf32, #tpu.memory_space<vmem>>, vector<16x48xf32>
    %cst = arith.constant dense<0.000000e+00> : vector<32x48xf32>
    %5 = tpu.matmul %3, %4, %cst {dimension_numbers = #tpu.dot_dimension_numbers<[1], [0], [0], [1], [0, 0, 1, 1], [], []>} : vector<32x16xf32>, vector<16x48xf32>, vector<32x48xf32> -> vector<32x48xf32>
    %c0_4 = arith.constant 0 : index
    %c0_5 = arith.constant 0 : index
    %6 = vector.load %arg3[%c0_4, %c0_5] : memref<32x16xf32, #tpu.memory_space<vmem>>, vector<32x16xf32>
    %c0_6 = arith.constant 0 : index
    %c0_7 = arith.constant 0 : index
    %7 = vector.load %arg7[%c0_6, %c0_7] : memref<16x48xf32, #tpu.memory_space<vmem>>, vector<16x48xf32>
    %cst_8 = arith.constant dense<0.000000e+00> : vector<32x48xf32>
    %8 = tpu.matmul %6, %7, %cst_8 {dimension_numbers = #tpu.dot_dimension_numbers<[1], [0], [0], [1], [0, 0, 1, 1], [], []>} : vector<32x16xf32>, vector<16x48xf32>, vector<32x48xf32> -> vector<32x48xf32>
    %c0_9 = arith.constant 0 : index
    %c0_10 = arith.constant 0 : index
    %9 = vector.load %arg2[%c0_9, %c0_10] : memref<32x16xf32, #tpu.memory_space<vmem>>, vector<32x16xf32>
    %c0_11 = arith.constant 0 : index
    %c0_12 = arith.constant 0 : index
    %10 = vector.load %arg6[%c0_11, %c0_12] : memref<16x48xf32, #tpu.memory_space<vmem>>, vector<16x48xf32>
    %cst_13 = arith.constant dense<0.000000e+00> : vector<32x48xf32>
    %11 = tpu.matmul %9, %10, %cst_13 {dimension_numbers = #tpu.dot_dimension_numbers<[1], [0], [0], [1], [0, 0, 1, 1], [], []>} : vector<32x16xf32>, vector<16x48xf32>, vector<32x48xf32> -> vector<32x48xf32>
    %12 = arith.addf %5, %11 : vector<32x48xf32>
    %c0_14 = arith.constant 0 : index
    %c0_15 = arith.constant 0 : index
    %13 = vector.load %arg4[%c0_14, %c0_15] : memref<32x16xf32, #tpu.memory_space<vmem>>, vector<32x16xf32>
    %c0_16 = arith.constant 0 : index
    %c0_17 = arith.constant 0 : index
    %14 = vector.load %arg8[%c0_16, %c0_17] : memref<16x48xf32, #tpu.memory_space<vmem>>, vector<16x48xf32>
    %cst_18 = arith.constant dense<0.000000e+00> : vector<32x48xf32>
    %15 = tpu.matmul %13, %14, %cst_18 {dimension_numbers = #tpu.dot_dimension_numbers<[1], [0], [0], [1], [0, 0, 1, 1], [], []>} : vector<32x16xf32>, vector<16x48xf32>, vector<32x48xf32> -> vector<32x48xf32>
    %16 = arith.addf %8, %15 : vector<32x48xf32>
    %c0_19 = arith.constant 0 : index
    %c0_20 = arith.constant 0 : index
    %17 = vector.load %arg9[%c0_19, %c0_20] : memref<1x48xf32, #tpu.memory_space<vmem>>, vector<1x48xf32>
    %18 = vector.broadcast %17 : vector<1x48xf32> to vector<32x48xf32>
    %19 = arith.addf %12, %18 : vector<32x48xf32>
    %c0_21 = arith.constant 0 : index
    %c0_22 = arith.constant 0 : index
    %20 = vector.load %arg15[%c0_21, %c0_22] : memref<32x48xf32, #tpu.memory_space<vmem>>, vector<32x48xf32>
    tpu.vector_store %arg15[%c0_21, %c0_22], %19 {strides = array<i32>} : memref<32x48xf32, #tpu.memory_space<vmem>>, vector<32x48xf32>,
    %c0_23 = arith.constant 0 : index
    %c0_24 = arith.constant 0 : index
    %21 = vector.load %arg10[%c0_23, %c0_24] : memref<1x48xf32, #tpu.memory_space<vmem>>, vector<1x48xf32>
    %22 = vector.broadcast %21 : vector<1x48xf32> to vector<32x48xf32>
    %23 = arith.addf %16, %22 : vector<32x48xf32>
    %c0_25 = arith.constant 0 : index
    %c0_26 = arith.constant 0 : index
    %24 = vector.load %arg16[%c0_25, %c0_26] : memref<32x48xf32, #tpu.memory_space<vmem>>, vector<32x48xf32>
    tpu.vector_store %arg16[%c0_25, %c0_26], %23 {strides = array<i32>} : memref<32x48xf32, #tpu.memory_space<vmem>>, vector<32x48xf32>,
    %c0_27 = arith.constant 0 : index
    %c0_28 = arith.constant 0 : index
    %25 = vector.load %arg11[%c0_27, %c0_28] : memref<32x96xf32, #tpu.memory_space<vmem>>, vector<32x96xf32>
    %c0_29 = arith.constant 0 : index
    %c0_30 = arith.constant 0 : index
    %26 = vector.load %arg12[%c0_29, %c0_30] : memref<1x32xf32, #tpu.memory_space<vmem>>, vector<1x32xf32>
    %c0_31 = arith.constant 0 : index
    %c0_32 = arith.constant 0 : index
    %27 = vector.load %arg18[%c0_31, %c0_32] : memref<8x32xf32, #tpu.memory_space<vmem>>, vector<8x32xf32>
    %c0_i32_33 = arith.constant 0 : i32
    %c8_i32 = arith.constant 8 : i32
    %28 = arith.muli %c0_i32_33, %c8_i32 : i32
    %29 = tpu.assume_multiple %28, 8 : i32
    %c3_i32 = arith.constant 3 : i32
    %30 = arith.subi %c3_i32, %c0_i32_33 : i32
    %c8_i32_34 = arith.constant 8 : i32
    %31 = arith.muli %30, %c8_i32_34 : i32
    %32 = tpu.assume_multiple %31, 8 : i32
    %33 = arith.index_cast %29 : i32 to index
    %c0_35 = arith.constant 0 : index
    %34 = vector.load %arg15[%33, %c0_35] : memref<32x48xf32, #tpu.memory_space<vmem>>, vector<8x48xf32>
    %35 = arith.index_cast %32 : i32 to index
    %c0_36 = arith.constant 0 : index
    %36 = vector.load %arg16[%35, %c0_36] : memref<32x48xf32, #tpu.memory_space<vmem>>, vector<8x48xf32>
    %37 = vector.extract_strided_slice %34 {offsets = [0, 0], sizes = [8, 16], strides = [1, 1]} : vector<8x48xf32> to vector<8x16xf32>
    %38 = vector.extract_strided_slice %36 {offsets = [0, 0], sizes = [8, 16], strides = [1, 1]} : vector<8x48xf32> to vector<8x16xf32>
    %39 = tpu.concatenate %37, %38 in 1 : vector<8x16xf32>, vector<8x16xf32> -> vector<8x32xf32>
    %40 = vector.extract_strided_slice %34 {offsets = [0, 16], sizes = [8, 16], strides = [1, 1]} : vector<8x48xf32> to vector<8x16xf32>
    %41 = vector.extract_strided_slice %36 {offsets = [0, 16], sizes = [8, 16], strides = [1, 1]} : vector<8x48xf32> to vector<8x16xf32>
    %42 = tpu.concatenate %40, %41 in 1 : vector<8x16xf32>, vector<8x16xf32> -> vector<8x32xf32>
    %43 = vector.extract_strided_slice %34 {offsets = [0, 32], sizes = [8, 16], strides = [1, 1]} : vector<8x48xf32> to vector<8x16xf32>
    %44 = vector.extract_strided_slice %36 {offsets = [0, 32], sizes = [8, 16], strides = [1, 1]} : vector<8x48xf32> to vector<8x16xf32>
    %45 = tpu.concatenate %43, %44 in 1 : vector<8x16xf32>, vector<8x16xf32> -> vector<8x32xf32>
    %cst_37 = arith.constant dense<0.000000e+00> : vector<8x96xf32>
    %46 = tpu.matmul %27, %25, %cst_37 {dimension_numbers = #tpu.dot_dimension_numbers<[1], [0], [0], [1], [0, 0, 1, 1], [], []>} : vector<8x32xf32>, vector<32x96xf32>, vector<8x96xf32> -> vector<8x96xf32>
    %47 = vector.extract_strided_slice %46 {offsets = [0, 0], sizes = [8, 32], strides = [1, 1]} : vector<8x96xf32> to vector<8x32xf32>
    %48 = arith.addf %39, %47 : vector<8x32xf32>
    %49 = arith.negf %48 : vector<8x32xf32>
    %50 = math.exp %49 : vector<8x32xf32>
    %cst_38 = arith.constant 1.000000e+00 : f32
    %51 = vector.broadcast %cst_38 : f32 to vector<8x32xf32>
    %52 = arith.addf %51, %50 : vector<8x32xf32>
    %53 = arith.divf %51, %52 : vector<8x32xf32>
    %54 = vector.extract_strided_slice %46 {offsets = [0, 32], sizes = [8, 32], strides = [1, 1]} : vector<8x96xf32> to vector<8x32xf32>
    %55 = arith.addf %42, %54 : vector<8x32xf32>
    %56 = arith.negf %55 : vector<8x32xf32>
    %57 = math.exp %56 : vector<8x32xf32>
    %cst_39 = arith.constant 1.000000e+00 : f32
    %58 = vector.broadcast %cst_39 : f32 to vector<8x32xf32>
    %59 = arith.addf %58, %57 : vector<8x32xf32>
    %60 = arith.divf %58, %59 : vector<8x32xf32>
    %61 = vector.extract_strided_slice %46 {offsets = [0, 64], sizes = [8, 32], strides = [1, 1]} : vector<8x96xf32> to vector<8x32xf32>
    %62 = vector.broadcast %26 : vector<1x32xf32> to vector<8x32xf32>
    %63 = arith.addf %61, %62 : vector<8x32xf32>
    %64 = arith.mulf %53, %63 : vector<8x32xf32>
    %65 = arith.addf %45, %64 : vector<8x32xf32>
    %66 = math.tanh %65 : vector<8x32xf32>
    %cst_40 = arith.constant 1.000000e+00 : f32
    %67 = vector.broadcast %cst_40 : f32 to vector<8x32xf32>
    %68 = arith.subf %67, %60 : vector<8x32xf32>
    %69 = arith.mulf %68, %66 : vector<8x32xf32>
    %70 = arith.mulf %60, %27 : vector<8x32xf32>
    %71 = arith.addf %69, %70 : vector<8x32xf32>
    %72 = arith.index_cast %29 : i32 to index
    %c0_41 = arith.constant 0 : index
    %73 = vector.load %arg17[%72, %c0_41] : memref<32x32xf32, #tpu.memory_space<vmem>>, vector<8x32xf32>
    tpu.vector_store %arg17[%72, %c0_41], %71 {strides = array<i32>} : memref<32x32xf32, #tpu.memory_space<vmem>>, vector<8x32xf32>,
    %c1_i32 = arith.constant 1 : i32
    %c8_i32_42 = arith.constant 8 : i32
    %74 = arith.muli %c1_i32, %c8_i32_42 : i32
    %75 = tpu.assume_multiple %74, 8 : i32
    %c3_i32_43 = arith.constant 3 : i32
    %76 = arith.subi %c3_i32_43, %c1_i32 : i32
    %c8_i32_44 = arith.constant 8 : i32
    %77 = arith.muli %76, %c8_i32_44 : i32
    %78 = tpu.assume_multiple %77, 8 : i32
    %79 = arith.index_cast %75 : i32 to index
    %c0_45 = arith.constant 0 : index
    %80 = vector.load %arg15[%79, %c0_45] : memref<32x48xf32, #tpu.memory_space<vmem>>, vector<8x48xf32>
    %81 = arith.index_cast %78 : i32 to index
    %c0_46 = arith.constant 0 : index
    %82 = vector.load %arg16[%81, %c0_46] : memref<32x48xf32, #tpu.memory_space<vmem>>, vector<8x48xf32>
    %83 = vector.extract_strided_slice %80 {offsets = [0, 0], sizes = [8, 16], strides = [1, 1]} : vector<8x48xf32> to vector<8x16xf32>
    %84 = vector.extract_strided_slice %82 {offsets = [0, 0], sizes = [8, 16], strides = [1, 1]} : vector<8x48xf32> to vector<8x16xf32>
    %85 = tpu.concatenate %83, %84 in 1 : vector<8x16xf32>, vector<8x16xf32> -> vector<8x32xf32>
    %86 = vector.extract_strided_slice %80 {offsets = [0, 16], sizes = [8, 16], strides = [1, 1]} : vector<8x48xf32> to vector<8x16xf32>
    %87 = vector.extract_strided_slice %82 {offsets = [0, 16], sizes = [8, 16], strides = [1, 1]} : vector<8x48xf32> to vector<8x16xf32>
    %88 = tpu.concatenate %86, %87 in 1 : vector<8x16xf32>, vector<8x16xf32> -> vector<8x32xf32>
    %89 = vector.extract_strided_slice %80 {offsets = [0, 32], sizes = [8, 16], strides = [1, 1]} : vector<8x48xf32> to vector<8x16xf32>
    %90 = vector.extract_strided_slice %82 {offsets = [0, 32], sizes = [8, 16], strides = [1, 1]} : vector<8x48xf32> to vector<8x16xf32>
    %91 = tpu.concatenate %89, %90 in 1 : vector<8x16xf32>, vector<8x16xf32> -> vector<8x32xf32>
    %cst_47 = arith.constant dense<0.000000e+00> : vector<8x96xf32>
    %92 = tpu.matmul %71, %25, %cst_47 {dimension_numbers = #tpu.dot_dimension_numbers<[1], [0], [0], [1], [0, 0, 1, 1], [], []>} : vector<8x32xf32>, vector<32x96xf32>, vector<8x96xf32> -> vector<8x96xf32>
    %93 = vector.extract_strided_slice %92 {offsets = [0, 0], sizes = [8, 32], strides = [1, 1]} : vector<8x96xf32> to vector<8x32xf32>
    %94 = arith.addf %85, %93 : vector<8x32xf32>
    %95 = arith.negf %94 : vector<8x32xf32>
    %96 = math.exp %95 : vector<8x32xf32>
    %cst_48 = arith.constant 1.000000e+00 : f32
    %97 = vector.broadcast %cst_48 : f32 to vector<8x32xf32>
    %98 = arith.addf %97, %96 : vector<8x32xf32>
    %99 = arith.divf %97, %98 : vector<8x32xf32>
    %100 = vector.extract_strided_slice %92 {offsets = [0, 32], sizes = [8, 32], strides = [1, 1]} : vector<8x96xf32> to vector<8x32xf32>
    %101 = arith.addf %88, %100 : vector<8x32xf32>
    %102 = arith.negf %101 : vector<8x32xf32>
    %103 = math.exp %102 : vector<8x32xf32>
    %cst_49 = arith.constant 1.000000e+00 : f32
    %104 = vector.broadcast %cst_49 : f32 to vector<8x32xf32>
    %105 = arith.addf %104, %103 : vector<8x32xf32>
    %106 = arith.divf %104, %105 : vector<8x32xf32>
    %107 = vector.extract_strided_slice %92 {offsets = [0, 64], sizes = [8, 32], strides = [1, 1]} : vector<8x96xf32> to vector<8x32xf32>
    %108 = vector.broadcast %26 : vector<1x32xf32> to vector<8x32xf32>
    %109 = arith.addf %107, %108 : vector<8x32xf32>
    %110 = arith.mulf %99, %109 : vector<8x32xf32>
    %111 = arith.addf %91, %110 : vector<8x32xf32>
    %112 = math.tanh %111 : vector<8x32xf32>
    %cst_50 = arith.constant 1.000000e+00 : f32
    %113 = vector.broadcast %cst_50 : f32 to vector<8x32xf32>
    %114 = arith.subf %113, %106 : vector<8x32xf32>
    %115 = arith.mulf %114, %112 : vector<8x32xf32>
    %116 = arith.mulf %106, %71 : vector<8x32xf32>
    %117 = arith.addf %115, %116 : vector<8x32xf32>
    %118 = arith.index_cast %75 : i32 to index
    %c0_51 = arith.constant 0 : index
    %119 = vector.load %arg17[%118, %c0_51] : memref<32x32xf32, #tpu.memory_space<vmem>>, vector<8x32xf32>
    tpu.vector_store %arg17[%118, %c0_51], %117 {strides = array<i32>} : memref<32x32xf32, #tpu.memory_space<vmem>>, vector<8x32xf32>,
    %c2_i32 = arith.constant 2 : i32
    %c8_i32_52 = arith.constant 8 : i32
    %120 = arith.muli %c2_i32, %c8_i32_52 : i32
    %121 = tpu.assume_multiple %120, 8 : i32
    %c3_i32_53 = arith.constant 3 : i32
    %122 = arith.subi %c3_i32_53, %c2_i32 : i32
    %c8_i32_54 = arith.constant 8 : i32
    %123 = arith.muli %122, %c8_i32_54 : i32
    %124 = tpu.assume_multiple %123, 8 : i32
    %125 = arith.index_cast %121 : i32 to index
    %c0_55 = arith.constant 0 : index
    %126 = vector.load %arg15[%125, %c0_55] : memref<32x48xf32, #tpu.memory_space<vmem>>, vector<8x48xf32>
    %127 = arith.index_cast %124 : i32 to index
    %c0_56 = arith.constant 0 : index
    %128 = vector.load %arg16[%127, %c0_56] : memref<32x48xf32, #tpu.memory_space<vmem>>, vector<8x48xf32>
    %129 = vector.extract_strided_slice %126 {offsets = [0, 0], sizes = [8, 16], strides = [1, 1]} : vector<8x48xf32> to vector<8x16xf32>
    %130 = vector.extract_strided_slice %128 {offsets = [0, 0], sizes = [8, 16], strides = [1, 1]} : vector<8x48xf32> to vector<8x16xf32>
    %131 = tpu.concatenate %129, %130 in 1 : vector<8x16xf32>, vector<8x16xf32> -> vector<8x32xf32>
    %132 = vector.extract_strided_slice %126 {offsets = [0, 16], sizes = [8, 16], strides = [1, 1]} : vector<8x48xf32> to vector<8x16xf32>
    %133 = vector.extract_strided_slice %128 {offsets = [0, 16], sizes = [8, 16], strides = [1, 1]} : vector<8x48xf32> to vector<8x16xf32>
    %134 = tpu.concatenate %132, %133 in 1 : vector<8x16xf32>, vector<8x16xf32> -> vector<8x32xf32>
    %135 = vector.extract_strided_slice %126 {offsets = [0, 32], sizes = [8, 16], strides = [1, 1]} : vector<8x48xf32> to vector<8x16xf32>
    %136 = vector.extract_strided_slice %128 {offsets = [0, 32], sizes = [8, 16], strides = [1, 1]} : vector<8x48xf32> to vector<8x16xf32>
    %137 = tpu.concatenate %135, %136 in 1 : vector<8x16xf32>, vector<8x16xf32> -> vector<8x32xf32>
    %cst_57 = arith.constant dense<0.000000e+00> : vector<8x96xf32>
    %138 = tpu.matmul %117, %25, %cst_57 {dimension_numbers = #tpu.dot_dimension_numbers<[1], [0], [0], [1], [0, 0, 1, 1], [], []>} : vector<8x32xf32>, vector<32x96xf32>, vector<8x96xf32> -> vector<8x96xf32>
    %139 = vector.extract_strided_slice %138 {offsets = [0, 0], sizes = [8, 32], strides = [1, 1]} : vector<8x96xf32> to vector<8x32xf32>
    %140 = arith.addf %131, %139 : vector<8x32xf32>
    %141 = arith.negf %140 : vector<8x32xf32>
    %142 = math.exp %141 : vector<8x32xf32>
    %cst_58 = arith.constant 1.000000e+00 : f32
    %143 = vector.broadcast %cst_58 : f32 to vector<8x32xf32>
    %144 = arith.addf %143, %142 : vector<8x32xf32>
    %145 = arith.divf %143, %144 : vector<8x32xf32>
    %146 = vector.extract_strided_slice %138 {offsets = [0, 32], sizes = [8, 32], strides = [1, 1]} : vector<8x96xf32> to vector<8x32xf32>
    %147 = arith.addf %134, %146 : vector<8x32xf32>
    %148 = arith.negf %147 : vector<8x32xf32>
    %149 = math.exp %148 : vector<8x32xf32>
    %cst_59 = arith.constant 1.000000e+00 : f32
    %150 = vector.broadcast %cst_59 : f32 to vector<8x32xf32>
    %151 = arith.addf %150, %149 : vector<8x32xf32>
    %152 = arith.divf %150, %151 : vector<8x32xf32>
    %153 = vector.extract_strided_slice %138 {offsets = [0, 64], sizes = [8, 32], strides = [1, 1]} : vector<8x96xf32> to vector<8x32xf32>
    %154 = vector.broadcast %26 : vector<1x32xf32> to vector<8x32xf32>
    %155 = arith.addf %153, %154 : vector<8x32xf32>
    %156 = arith.mulf %145, %155 : vector<8x32xf32>
    %157 = arith.addf %137, %156 : vector<8x32xf32>
    %158 = math.tanh %157 : vector<8x32xf32>
    %cst_60 = arith.constant 1.000000e+00 : f32
    %159 = vector.broadcast %cst_60 : f32 to vector<8x32xf32>
    %160 = arith.subf %159, %152 : vector<8x32xf32>
    %161 = arith.mulf %160, %158 : vector<8x32xf32>
    %162 = arith.mulf %152, %117 : vector<8x32xf32>
    %163 = arith.addf %161, %162 : vector<8x32xf32>
    %164 = arith.index_cast %121 : i32 to index
    %c0_61 = arith.constant 0 : index
    %165 = vector.load %arg17[%164, %c0_61] : memref<32x32xf32, #tpu.memory_space<vmem>>, vector<8x32xf32>
    tpu.vector_store %arg17[%164, %c0_61], %163 {strides = array<i32>} : memref<32x32xf32, #tpu.memory_space<vmem>>, vector<8x32xf32>,
    %c3_i32_62 = arith.constant 3 : i32
    %c8_i32_63 = arith.constant 8 : i32
    %166 = arith.muli %c3_i32_62, %c8_i32_63 : i32
    %167 = tpu.assume_multiple %166, 8 : i32
    %c3_i32_64 = arith.constant 3 : i32
    %168 = arith.subi %c3_i32_64, %c3_i32_62 : i32
    %c8_i32_65 = arith.constant 8 : i32
    %169 = arith.muli %168, %c8_i32_65 : i32
    %170 = tpu.assume_multiple %169, 8 : i32
    %171 = arith.index_cast %167 : i32 to index
    %c0_66 = arith.constant 0 : index
    %172 = vector.load %arg15[%171, %c0_66] : memref<32x48xf32, #tpu.memory_space<vmem>>, vector<8x48xf32>
    %173 = arith.index_cast %170 : i32 to index
    %c0_67 = arith.constant 0 : index
    %174 = vector.load %arg16[%173, %c0_67] : memref<32x48xf32, #tpu.memory_space<vmem>>, vector<8x48xf32>
    %175 = vector.extract_strided_slice %172 {offsets = [0, 0], sizes = [8, 16], strides = [1, 1]} : vector<8x48xf32> to vector<8x16xf32>
    %176 = vector.extract_strided_slice %174 {offsets = [0, 0], sizes = [8, 16], strides = [1, 1]} : vector<8x48xf32> to vector<8x16xf32>
    %177 = tpu.concatenate %175, %176 in 1 : vector<8x16xf32>, vector<8x16xf32> -> vector<8x32xf32>
    %178 = vector.extract_strided_slice %172 {offsets = [0, 16], sizes = [8, 16], strides = [1, 1]} : vector<8x48xf32> to vector<8x16xf32>
    %179 = vector.extract_strided_slice %174 {offsets = [0, 16], sizes = [8, 16], strides = [1, 1]} : vector<8x48xf32> to vector<8x16xf32>
    %180 = tpu.concatenate %178, %179 in 1 : vector<8x16xf32>, vector<8x16xf32> -> vector<8x32xf32>
    %181 = vector.extract_strided_slice %172 {offsets = [0, 32], sizes = [8, 16], strides = [1, 1]} : vector<8x48xf32> to vector<8x16xf32>
    %182 = vector.extract_strided_slice %174 {offsets = [0, 32], sizes = [8, 16], strides = [1, 1]} : vector<8x48xf32> to vector<8x16xf32>
    %183 = tpu.concatenate %181, %182 in 1 : vector<8x16xf32>, vector<8x16xf32> -> vector<8x32xf32>
    %cst_68 = arith.constant dense<0.000000e+00> : vector<8x96xf32>
    %184 = tpu.matmul %163, %25, %cst_68 {dimension_numbers = #tpu.dot_dimension_numbers<[1], [0], [0], [1], [0, 0, 1, 1], [], []>} : vector<8x32xf32>, vector<32x96xf32>, vector<8x96xf32> -> vector<8x96xf32>
    %185 = vector.extract_strided_slice %184 {offsets = [0, 0], sizes = [8, 32], strides = [1, 1]} : vector<8x96xf32> to vector<8x32xf32>
    %186 = arith.addf %177, %185 : vector<8x32xf32>
    %187 = arith.negf %186 : vector<8x32xf32>
    %188 = math.exp %187 : vector<8x32xf32>
    %cst_69 = arith.constant 1.000000e+00 : f32
    %189 = vector.broadcast %cst_69 : f32 to vector<8x32xf32>
    %190 = arith.addf %189, %188 : vector<8x32xf32>
    %191 = arith.divf %189, %190 : vector<8x32xf32>
    %192 = vector.extract_strided_slice %184 {offsets = [0, 32], sizes = [8, 32], strides = [1, 1]} : vector<8x96xf32> to vector<8x32xf32>
    %193 = arith.addf %180, %192 : vector<8x32xf32>
    %194 = arith.negf %193 : vector<8x32xf32>
    %195 = math.exp %194 : vector<8x32xf32>
    %cst_70 = arith.constant 1.000000e+00 : f32
    %196 = vector.broadcast %cst_70 : f32 to vector<8x32xf32>
    %197 = arith.addf %196, %195 : vector<8x32xf32>
    %198 = arith.divf %196, %197 : vector<8x32xf32>
    %199 = vector.extract_strided_slice %184 {offsets = [0, 64], sizes = [8, 32], strides = [1, 1]} : vector<8x96xf32> to vector<8x32xf32>
    %200 = vector.broadcast %26 : vector<1x32xf32> to vector<8x32xf32>
    %201 = arith.addf %199, %200 : vector<8x32xf32>
    %202 = arith.mulf %191, %201 : vector<8x32xf32>
    %203 = arith.addf %183, %202 : vector<8x32xf32>
    %204 = math.tanh %203 : vector<8x32xf32>
    %cst_71 = arith.constant 1.000000e+00 : f32
    %205 = vector.broadcast %cst_71 : f32 to vector<8x32xf32>
    %206 = arith.subf %205, %198 : vector<8x32xf32>
    %207 = arith.mulf %206, %204 : vector<8x32xf32>
    %208 = arith.mulf %198, %163 : vector<8x32xf32>
    %209 = arith.addf %207, %208 : vector<8x32xf32>
    %210 = arith.index_cast %167 : i32 to index
    %c0_72 = arith.constant 0 : index
    %211 = vector.load %arg17[%210, %c0_72] : memref<32x32xf32, #tpu.memory_space<vmem>>, vector<8x32xf32>
    tpu.vector_store %arg17[%210, %c0_72], %209 {strides = array<i32>} : memref<32x32xf32, #tpu.memory_space<vmem>>, vector<8x32xf32>,
    %c4_i32 = arith.constant 4 : i32
    %c0_73 = arith.constant 0 : index
    %c0_74 = arith.constant 0 : index
    %212 = vector.load %arg18[%c0_73, %c0_74] : memref<8x32xf32, #tpu.memory_space<vmem>>, vector<8x32xf32>
    tpu.vector_store %arg18[%c0_73, %c0_74], %209 {strides = array<i32>} : memref<8x32xf32, #tpu.memory_space<vmem>>, vector<8x32xf32>,
    %c0_75 = arith.constant 0 : index
    %c0_76 = arith.constant 0 : index
    %213 = vector.load %arg17[%c0_75, %c0_76] : memref<32x32xf32, #tpu.memory_space<vmem>>, vector<32x16xf32>
    %c0_77 = arith.constant 0 : index
    %c0_78 = arith.constant 0 : index
    %214 = vector.load %arg13[%c0_77, %c0_78] : memref<32x16xf32, #tpu.memory_space<vmem>>, vector<32x16xf32>
    tpu.vector_store %arg13[%c0_77, %c0_78], %213 {strides = array<i32>} : memref<32x16xf32, #tpu.memory_space<vmem>>, vector<32x16xf32>,
    %c0_i32_79 = arith.constant 0 : i32
    %c8_i32_80 = arith.constant 8 : i32
    %215 = arith.muli %c0_i32_79, %c8_i32_80 : i32
    %216 = tpu.assume_multiple %215, 8 : i32
    %c3_i32_81 = arith.constant 3 : i32
    %217 = arith.subi %c3_i32_81, %c0_i32_79 : i32
    %c8_i32_82 = arith.constant 8 : i32
    %218 = arith.muli %217, %c8_i32_82 : i32
    %219 = tpu.assume_multiple %218, 8 : i32
    %220 = arith.index_cast %216 : i32 to index
    %c0_83 = arith.constant 0 : index
    %221 = vector.load %arg17[%220, %c0_83] : memref<32x32xf32, #tpu.memory_space<vmem>>, vector<8x32xf32>
    %222 = vector.extract_strided_slice %221 {offsets = [0, 16], sizes = [8, 16], strides = [1, 1]} : vector<8x32xf32> to vector<8x16xf32>
    %223 = arith.index_cast %219 : i32 to index
    %c0_84 = arith.constant 0 : index
    %224 = vector.load %arg14[%223, %c0_84] : memref<32x16xf32, #tpu.memory_space<vmem>>, vector<8x16xf32>
    tpu.vector_store %arg14[%223, %c0_84], %222 {strides = array<i32>} : memref<32x16xf32, #tpu.memory_space<vmem>>, vector<8x16xf32>,
    %c1_i32_85 = arith.constant 1 : i32
    %c8_i32_86 = arith.constant 8 : i32
    %225 = arith.muli %c1_i32_85, %c8_i32_86 : i32
    %226 = tpu.assume_multiple %225, 8 : i32
    %c3_i32_87 = arith.constant 3 : i32
    %227 = arith.subi %c3_i32_87, %c1_i32_85 : i32
    %c8_i32_88 = arith.constant 8 : i32
    %228 = arith.muli %227, %c8_i32_88 : i32
    %229 = tpu.assume_multiple %228, 8 : i32
    %230 = arith.index_cast %226 : i32 to index
    %c0_89 = arith.constant 0 : index
    %231 = vector.load %arg17[%230, %c0_89] : memref<32x32xf32, #tpu.memory_space<vmem>>, vector<8x32xf32>
    %232 = vector.extract_strided_slice %231 {offsets = [0, 16], sizes = [8, 16], strides = [1, 1]} : vector<8x32xf32> to vector<8x16xf32>
    %233 = arith.index_cast %229 : i32 to index
    %c0_90 = arith.constant 0 : index
    %234 = vector.load %arg14[%233, %c0_90] : memref<32x16xf32, #tpu.memory_space<vmem>>, vector<8x16xf32>
    tpu.vector_store %arg14[%233, %c0_90], %232 {strides = array<i32>} : memref<32x16xf32, #tpu.memory_space<vmem>>, vector<8x16xf32>,
    %c2_i32_91 = arith.constant 2 : i32
    %c8_i32_92 = arith.constant 8 : i32
    %235 = arith.muli %c2_i32_91, %c8_i32_92 : i32
    %236 = tpu.assume_multiple %235, 8 : i32
    %c3_i32_93 = arith.constant 3 : i32
    %237 = arith.subi %c3_i32_93, %c2_i32_91 : i32
    %c8_i32_94 = arith.constant 8 : i32
    %238 = arith.muli %237, %c8_i32_94 : i32
    %239 = tpu.assume_multiple %238, 8 : i32
    %240 = arith.index_cast %236 : i32 to index
    %c0_95 = arith.constant 0 : index
    %241 = vector.load %arg17[%240, %c0_95] : memref<32x32xf32, #tpu.memory_space<vmem>>, vector<8x32xf32>
    %242 = vector.extract_strided_slice %241 {offsets = [0, 16], sizes = [8, 16], strides = [1, 1]} : vector<8x32xf32> to vector<8x16xf32>
    %243 = arith.index_cast %239 : i32 to index
    %c0_96 = arith.constant 0 : index
    %244 = vector.load %arg14[%243, %c0_96] : memref<32x16xf32, #tpu.memory_space<vmem>>, vector<8x16xf32>
    tpu.vector_store %arg14[%243, %c0_96], %242 {strides = array<i32>} : memref<32x16xf32, #tpu.memory_space<vmem>>, vector<8x16xf32>,
    %c3_i32_97 = arith.constant 3 : i32
    %c8_i32_98 = arith.constant 8 : i32
    %245 = arith.muli %c3_i32_97, %c8_i32_98 : i32
    %246 = tpu.assume_multiple %245, 8 : i32
    %c3_i32_99 = arith.constant 3 : i32
    %247 = arith.subi %c3_i32_99, %c3_i32_97 : i32
    %c8_i32_100 = arith.constant 8 : i32
    %248 = arith.muli %247, %c8_i32_100 : i32
    %249 = tpu.assume_multiple %248, 8 : i32
    %250 = arith.index_cast %246 : i32 to index
    %c0_101 = arith.constant 0 : index
    %251 = vector.load %arg17[%250, %c0_101] : memref<32x32xf32, #tpu.memory_space<vmem>>, vector<8x32xf32>
    %252 = vector.extract_strided_slice %251 {offsets = [0, 16], sizes = [8, 16], strides = [1, 1]} : vector<8x32xf32> to vector<8x16xf32>
    %253 = arith.index_cast %249 : i32 to index
    %c0_102 = arith.constant 0 : index
    %254 = vector.load %arg14[%253, %c0_102] : memref<32x16xf32, #tpu.memory_space<vmem>>, vector<8x16xf32>
    tpu.vector_store %arg14[%253, %c0_102], %252 {strides = array<i32>} : memref<32x16xf32, #tpu.memory_space<vmem>>, vector<8x16xf32>,
    %c4_i32_103 = arith.constant 4 : i32
    return
  }
  func.func @transform_0(%arg0: i32) -> (i32, i32) {
    %c0_i32 = arith.constant 0 : i32
    %c0_i32_0 = arith.constant 0 : i32
    return %arg0, %c0_i32 : i32, i32
  }
  func.func @transform_1(%arg0: i32) -> (i32, i32) {
    %c0_i32 = arith.constant 0 : i32
    %c0_i32_0 = arith.constant 0 : i32
    return %arg0, %c0_i32 : i32, i32
  }
  func.func @transform_2(%arg0: i32) -> (i32, i32) {
    %c1_i32 = arith.constant 1 : i32
    %0 = arith.subi %c1_i32, %arg0 : i32
    %c0_i32 = arith.constant 0 : i32
    %c0_i32_0 = arith.constant 0 : i32
    return %0, %c0_i32 : i32, i32
  }
  func.func @transform_3(%arg0: i32) -> (i32, i32) {
    %c1_i32 = arith.constant 1 : i32
    %0 = arith.subi %c1_i32, %arg0 : i32
    %c0_i32 = arith.constant 0 : i32
    %c0_i32_0 = arith.constant 0 : i32
    return %0, %c0_i32 : i32, i32
  }
  func.func @transform_4(%arg0: i32) -> (i32, i32) {
    %c0_i32 = arith.constant 0 : i32
    %c0_i32_0 = arith.constant 0 : i32
    %c0_i32_1 = arith.constant 0 : i32
    return %c0_i32, %c0_i32_0 : i32, i32
  }
  func.func @transform_5(%arg0: i32) -> (i32, i32) {
    %c0_i32 = arith.constant 0 : i32
    %c0_i32_0 = arith.constant 0 : i32
    %c0_i32_1 = arith.constant 0 : i32
    return %c0_i32, %c0_i32_0 : i32, i32
  }
  func.func @transform_6(%arg0: i32) -> (i32, i32) {
    %c0_i32 = arith.constant 0 : i32
    %c0_i32_0 = arith.constant 0 : i32
    %c0_i32_1 = arith.constant 0 : i32
    return %c0_i32, %c0_i32_0 : i32, i32
  }
  func.func @transform_7(%arg0: i32) -> (i32, i32) {
    %c0_i32 = arith.constant 0 : i32
    %c0_i32_0 = arith.constant 0 : i32
    %c0_i32_1 = arith.constant 0 : i32
    return %c0_i32, %c0_i32_0 : i32, i32
  }
  func.func @transform_8(%arg0: i32) -> (i32, i32) {
    %c0_i32 = arith.constant 0 : i32
    %c0_i32_0 = arith.constant 0 : i32
    %c0_i32_1 = arith.constant 0 : i32
    return %c0_i32, %c0_i32_0 : i32, i32
  }
  func.func @transform_9(%arg0: i32) -> (i32, i32) {
    %c0_i32 = arith.constant 0 : i32
    %c0_i32_0 = arith.constant 0 : i32
    %c0_i32_1 = arith.constant 0 : i32
    return %c0_i32, %c0_i32_0 : i32, i32
  }
  func.func @transform_10(%arg0: i32) -> (i32, i32) {
    %c0_i32 = arith.constant 0 : i32
    %c0_i32_0 = arith.constant 0 : i32
    %c0_i32_1 = arith.constant 0 : i32
    return %c0_i32, %c0_i32_0 : i32, i32
  }
  func.func @transform_11(%arg0: i32) -> (i32, i32) {
    %c0_i32 = arith.constant 0 : i32
    %c0_i32_0 = arith.constant 0 : i32
    %c0_i32_1 = arith.constant 0 : i32
    return %c0_i32, %c0_i32_0 : i32, i32
  }
  func.func @transform_12(%arg0: i32) -> (i32, i32) {
    %c0_i32 = arith.constant 0 : i32
    %c0_i32_0 = arith.constant 0 : i32
    return %arg0, %c0_i32 : i32, i32
  }
  func.func @transform_13(%arg0: i32) -> (i32, i32) {
    %c1_i32 = arith.constant 1 : i32
    %0 = arith.subi %c1_i32, %arg0 : i32
    %c0_i32 = arith.constant 0 : i32
    %c0_i32_0 = arith.constant 0 : i32
    return %0, %c0_i32 : i32, i32
  }
}

module attributes {stable_mosaic.version = 11 : i64} {
  func.func @_head_kernel(%arg0: i32, %arg1: memref<64x16xf32, #tpu.memory_space<vmem>>, %arg2: memref<64x16xf32, #tpu.memory_space<vmem>>, %arg3: memref<16x64xf32, #tpu.memory_space<vmem>>, %arg4: memref<16x64xf32, #tpu.memory_space<vmem>>, %arg5: memref<1x64xf32, #tpu.memory_space<vmem>>, %arg6: memref<64x1xf32, #tpu.memory_space<vmem>>, %arg7: memref<1x1xf32, #tpu.memory_space<vmem>>, %arg8: memref<64x1xf32, #tpu.memory_space<vmem>>) attributes {dimension_semantics = [#tpu.dimension_semantics<parallel>], iteration_bounds = array<i64: 1>, scalar_prefetch = 0 : i64, scratch_operands = 0 : i64, tpu.core_type = #tpu.core_type<tc>, window_params = [{transform_indices = @transform_0, window_bounds = array<i64: 64, 16>}, {transform_indices = @transform_1, window_bounds = array<i64: 64, 16>}, {pipeline_mode = #tpu.pipeline_mode<synchronous>, transform_indices = @transform_2, window_bounds = array<i64: 16, 64>}, {pipeline_mode = #tpu.pipeline_mode<synchronous>, transform_indices = @transform_3, window_bounds = array<i64: 16, 64>}, {pipeline_mode = #tpu.pipeline_mode<synchronous>, transform_indices = @transform_4, window_bounds = array<i64: 1, 64>}, {pipeline_mode = #tpu.pipeline_mode<synchronous>, transform_indices = @transform_5, window_bounds = array<i64: 64, 1>}, {pipeline_mode = #tpu.pipeline_mode<synchronous>, transform_indices = @transform_6, window_bounds = array<i64: 1, 1>}, {transform_indices = @transform_7, window_bounds = array<i64: 64, 1>}]} {
    %c0 = arith.constant 0 : index
    %c0_0 = arith.constant 0 : index
    %0 = vector.load %arg1[%c0, %c0_0] : memref<64x16xf32, #tpu.memory_space<vmem>>, vector<64x16xf32>
    %c0_1 = arith.constant 0 : index
    %c0_2 = arith.constant 0 : index
    %1 = vector.load %arg3[%c0_1, %c0_2] : memref<16x64xf32, #tpu.memory_space<vmem>>, vector<16x64xf32>
    %cst = arith.constant dense<0.000000e+00> : vector<64x64xf32>
    %2 = tpu.matmul %0, %1, %cst {dimension_numbers = #tpu.dot_dimension_numbers<[1], [0], [0], [1], [0, 0, 1, 1], [], []>} : vector<64x16xf32>, vector<16x64xf32>, vector<64x64xf32> -> vector<64x64xf32>
    %c0_3 = arith.constant 0 : index
    %c0_4 = arith.constant 0 : index
    %3 = vector.load %arg2[%c0_3, %c0_4] : memref<64x16xf32, #tpu.memory_space<vmem>>, vector<64x16xf32>
    %c0_5 = arith.constant 0 : index
    %c0_6 = arith.constant 0 : index
    %4 = vector.load %arg4[%c0_5, %c0_6] : memref<16x64xf32, #tpu.memory_space<vmem>>, vector<16x64xf32>
    %cst_7 = arith.constant dense<0.000000e+00> : vector<64x64xf32>
    %5 = tpu.matmul %3, %4, %cst_7 {dimension_numbers = #tpu.dot_dimension_numbers<[1], [0], [0], [1], [0, 0, 1, 1], [], []>} : vector<64x16xf32>, vector<16x64xf32>, vector<64x64xf32> -> vector<64x64xf32>
    %6 = arith.addf %2, %5 : vector<64x64xf32>
    %c0_8 = arith.constant 0 : index
    %c0_9 = arith.constant 0 : index
    %7 = vector.load %arg5[%c0_8, %c0_9] : memref<1x64xf32, #tpu.memory_space<vmem>>, vector<1x64xf32>
    %8 = vector.broadcast %7 : vector<1x64xf32> to vector<64x64xf32>
    %9 = arith.addf %6, %8 : vector<64x64xf32>
    %cst_10 = arith.constant 0.000000e+00 : f32
    %10 = vector.broadcast %cst_10 : f32 to vector<64x64xf32>
    %11 = arith.maximumf %9, %10 : vector<64x64xf32>
    %c0_11 = arith.constant 0 : index
    %c0_12 = arith.constant 0 : index
    %12 = vector.load %arg6[%c0_11, %c0_12] : memref<64x1xf32, #tpu.memory_space<vmem>>, vector<64x1xf32>
    %cst_13 = arith.constant dense<0.000000e+00> : vector<64x1xf32>
    %13 = tpu.matmul %11, %12, %cst_13 {dimension_numbers = #tpu.dot_dimension_numbers<[1], [0], [0], [1], [0, 0, 1, 1], [], []>} : vector<64x64xf32>, vector<64x1xf32>, vector<64x1xf32> -> vector<64x1xf32>
    %c0_14 = arith.constant 0 : index
    %c0_15 = arith.constant 0 : index
    %14 = vector.load %arg7[%c0_14, %c0_15] : memref<1x1xf32, #tpu.memory_space<vmem>>, vector<1x1xf32>
    %15 = vector.broadcast %14 : vector<1x1xf32> to vector<64x1xf32>
    %16 = arith.addf %13, %15 : vector<64x1xf32>
    %c0_16 = arith.constant 0 : index
    %c0_17 = arith.constant 0 : index
    %17 = vector.load %arg8[%c0_16, %c0_17] : memref<64x1xf32, #tpu.memory_space<vmem>>, vector<64x1xf32>
    tpu.vector_store %arg8[%c0_16, %c0_17], %16 {strides = array<i32>} : memref<64x1xf32, #tpu.memory_space<vmem>>, vector<64x1xf32>,
    return
  }
  func.func @transform_0(%arg0: i32) -> (i32, i32) {
    %c0_i32 = arith.constant 0 : i32
    %c0_i32_0 = arith.constant 0 : i32
    return %arg0, %c0_i32 : i32, i32
  }
  func.func @transform_1(%arg0: i32) -> (i32, i32) {
    %c0_i32 = arith.constant 0 : i32
    %c0_i32_0 = arith.constant 0 : i32
    return %arg0, %c0_i32 : i32, i32
  }
  func.func @transform_2(%arg0: i32) -> (i32, i32) {
    %c0_i32 = arith.constant 0 : i32
    %c0_i32_0 = arith.constant 0 : i32
    %c0_i32_1 = arith.constant 0 : i32
    return %c0_i32, %c0_i32_0 : i32, i32
  }
  func.func @transform_3(%arg0: i32) -> (i32, i32) {
    %c0_i32 = arith.constant 0 : i32
    %c0_i32_0 = arith.constant 0 : i32
    %c0_i32_1 = arith.constant 0 : i32
    return %c0_i32, %c0_i32_0 : i32, i32
  }
  func.func @transform_4(%arg0: i32) -> (i32, i32) {
    %c0_i32 = arith.constant 0 : i32
    %c0_i32_0 = arith.constant 0 : i32
    %c0_i32_1 = arith.constant 0 : i32
    return %c0_i32, %c0_i32_0 : i32, i32
  }
  func.func @transform_5(%arg0: i32) -> (i32, i32) {
    %c0_i32 = arith.constant 0 : i32
    %c0_i32_0 = arith.constant 0 : i32
    %c0_i32_1 = arith.constant 0 : i32
    return %c0_i32, %c0_i32_0 : i32, i32
  }
  func.func @transform_6(%arg0: i32) -> (i32, i32) {
    %c0_i32 = arith.constant 0 : i32
    %c0_i32_0 = arith.constant 0 : i32
    %c0_i32_1 = arith.constant 0 : i32
    return %c0_i32, %c0_i32_0 : i32, i32
  }
  func.func @transform_7(%arg0: i32) -> (i32, i32) {
    %c0_i32 = arith.constant 0 : i32
    %c0_i32_0 = arith.constant 0 : i32
    return %arg0, %c0_i32 : i32, i32
  }
}

</mosaic_0001>

<bundles_post_ra>
// kernel: dnn_forward_pallas.4
= control target key start
LH: loop header
LB: loop body
LE: loop exit
PB: predicated region body
PF: predicated region fallthrough
CT: control target
= control target key end

     0   :  { %vm31_vm0 = vcmask 130048   ;;  %vm169_vm1 = vcmask 523264   ;;  %s314_s1 = inlined_call_operand.vmem [shape: f32[16,64], index: 1, kind: input, shape index: {}]   ;;  %s315_s0 = inlined_call_operand.vmem [shape: f32[64,16], index: 0, kind: input, shape index: {}]   ;;  %s316_s2 = inlined_call_operand.vmem [shape: f32[1,64], index: 2, kind: input, shape index: {}]   ;;  %s317_s3 = inlined_call_operand.vmem [shape: f32[64,64], index: 3, kind: output, shape index: {}]  }
   0x1   :  { %v23_v0 = vld [vmem:[%s314_s1 + $0x8] sm:$0xff]  ;;  %v22_v1 = vld [vmem:[%s314_s1] sm:$0xff]  ;;  %v16_v6 = vld [vmem:[%s315_s0 + $0x10] sm:$0xff] }
   0x2   :  { %201 = vmatprep.subr.mxu0 %v23_v0  ;;  %217 = vmatprep.subr.mxu1 %v23_v0  ;;  %v14_v2 = vld [vmem:[%s315_s0] sm:$0xff]  ;;  %v15_v4 = vld [vmem:[%s315_s0 + $0x8] sm:$0xff]  ;;  %v20_v7 = vld [vmem:[%s315_s0 + $0x30] sm:$0xff] }
   0x3   :  { %202 = vmatpush3.msra.mxu0 %v23_v0  ;;  %219 = vmatpush3.msra.mxu1 %v23_v0  ;;  %v18_v3 = vld [vmem:[%s315_s0 + $0x20] sm:$0xff]  ;;  %v19_v5 = vld [vmem:[%s315_s0 + $0x28] sm:$0xff]  ;;  %v17_v8 = vld [vmem:[%s315_s0 + $0x18] sm:$0xff] }
   0x4   :  { %203 = vmatprep.subr.mxu0 %v22_v1  ;;  %218 = vmatprep.subr.mxu1 %v22_v1  ;;  %v21_v9 = vld [vmem:[%s315_s0 + $0x38] sm:$0xff]  ;;  %v182_v10 = vld [vmem:[%s316_s2] ss:$0 sm:$0xff] }
   0x5   :  { %204 = vmatpush3.msra.mxu0 %v22_v1  ;;  %220 = vmatpush3.msra.mxu1 %v22_v1 }
   0x6   :  { %205 = vmatprep.mubr.msk.f32.mxu0 %vm31_vm0, %v14_v2  ;;  %211 = vmatprep.mubr.msk.f32.mxu1 %vm31_vm0, %v18_v3 }
   0x7   :  { %206 = vmatmul.mubr.msk.f32.vlgmr.msra.gmra.mxu0 %vm31_vm0, %v15_v4  ;;  %212 = vmatmul.mubr.msk.f32.vlgmr.msra.gmra.mxu1 %vm31_vm0, %v19_v5 }
   0x8   :  { %208 = vmatprep.mubr.msk.f32.mxu0 %vm31_vm0, %v16_v6  ;;  %214 = vmatprep.mubr.msk.f32.mxu1 %vm31_vm0, %v20_v7 }
   0xb   :  { %209 = vmatmul.mubr.msk.f32.gmra.mxu0 %vm31_vm0, %v17_v8  ;;  %215 = vmatmul.mubr.msk.f32.gmra.mxu1 %vm31_vm0, %v21_v9 }
  0xc7   :  { %v207_v11 = vpop.f32.mrf.mxu0  ;;  %v213_v12 = vpop.f32.mrf.mxu1 }
  0xc8   :  { %v128_v13 = vadd.f32 %v207_v11, %v182_v10  ;;  %v148_v14 = vadd.f32 %v213_v12, %v182_v10 }
  0xc9   :  { %v122_v15 = vpop.f32.mrf.mxu0  ;;  %v142_v16 = vpop.f32.mrf.mxu1 }
  0xca   :  { %v162_v17 = vmax.f32 %v128_v13, 0.0  ;;  %v166_v18 = vmax.f32 %v148_v14, 0.0  ;;  %v123_v19 = vadd.f32 %v182_v10, %v122_v15  ;;  %v143_v20 = vadd.f32 %v182_v10, %v142_v16 }
  0xcb   :  { %v210_v21 = vpop.f32.mrf.mxu0  ;;  %v216_v22 = vpop.f32.mrf.mxu1 }
  0xcc   :  { %171 = vst.msk [vmem:[%s317_s3 + $0x8] sm:$0xff] %vm169_vm1, %v162_v17  ;;  %175 = vst.msk [vmem:[%s317_s3 + $0x28] sm:$0xff] %vm169_vm1, %v166_v18  ;;  %v161_v23 = vmax.f32 %v123_v19, 0.0  ;;  %v165_v24 = vmax.f32 %v143_v20, 0.0  ;;  %v138_v25 = vadd.f32 %v210_v21, %v182_v10  ;;  %v158_v26 = vadd.f32 %v216_v22, %v182_v10 }
  0xcd   :  { %v132_v27 = vpop.f32.mrf.mxu0  ;;  %v152_v28 = vpop.f32.mrf.mxu1 }
  0xce   :  { %170 = vst.msk [vmem:[%s317_s3] sm:$0xff] %vm169_vm1, %v161_v23  ;;  %174 = vst.msk [vmem:[%s317_s3 + $0x20] sm:$0xff] %vm169_vm1, %v165_v24  ;;  %v164_v29 = vmax.f32 %v138_v25, 0.0  ;;  %v168_v30 = vmax.f32 %v158_v26, 0.0  ;;  %v133_v31 = vadd.f32 %v182_v10, %v132_v27  ;;  %v153_v32 = vadd.f32 %v182_v10, %v152_v28 }
  0xd0   :  { %173 = vst.msk [vmem:[%s317_s3 + $0x18] sm:$0xff] %vm169_vm1, %v164_v29  ;;  %177 = vst.msk [vmem:[%s317_s3 + $0x38] sm:$0xff] %vm169_vm1, %v168_v30  ;;  %v163_v33 = vmax.f32 %v133_v31, 0.0  ;;  %v167_v34 = vmax.f32 %v153_v32, 0.0 }
  0xd2   :  { %172 = vst.msk [vmem:[%s317_s3 + $0x10] sm:$0xff] %vm169_vm1, %v163_v33  ;;  %176 = vst.msk [vmem:[%s317_s3 + $0x30] sm:$0xff] %vm169_vm1, %v167_v34 }

// kernel: dnn_forward_pallas.5
= control target key start
LH: loop header
LB: loop body
LE: loop exit
PB: predicated region body
PF: predicated region fallthrough
CT: control target
= control target key end

     0   :  { %s1584_s30 = smov 0   ;;  %s1841_s0 = inlined_call_operand.vmem [shape: f32[64,64], index: 0, kind: input, shape index: {}, may-alias: {0,1}]   ;;  %s1842_s1 = inlined_call_operand.vmem [shape: f32[64,64], index: 1, kind: input, shape index: {}, may-alias: {0,1}]   ;;  %s1843_s2 = inlined_call_operand.vmem [shape: f32[64,48], index: 2, kind: input, shape index: {}]   ;;  %s1844_s3 = inlined_call_operand.vmem [shape: f32[64,48], index: 3, kind: input, shape index: {}]   ;;  %s1845_s4 = inlined_call_operand.vmem [shape: f32[1,48], index: 4, kind: input, shape index: {}]   ;;  %s1846_s5 = inlined_call_operand.vmem [shape: f32[1,48], index: 5, kind: input, shape index: {}]   ;;  %s1847_s6 = inlined_call_operand.vmem [shape: f32[32,96], index: 6, kind: input, shape index: {}]   ;;  %s1848_s7 = inlined_call_operand.vmem [shape: f32[1,32], index: 7, kind: input, shape index: {}]   ;;  %s1849_s8 = inlined_call_operand.vmem [shape: f32[64,16], index: 8, kind: output, shape index: {0}]   ;;  %s1850_s9 = inlined_call_operand.vmem [shape: f32[64,16], index: 9, kind: output, shape index: {1}]  }
   0x1 LB: > { %s1290_s10 = sadd.s32 4294967295, %s1525_s30   ;;  %p1294_p0 = scmp.ge.s32.totalorder %s1525_s30, 1  ;;  %s1525_s30 = sphi %s1584_s30, %s20_s30  }
   0x2   : > { %p308_p1 = scmp.lt.s32.totalorder %s1525_s30, 3 }
   0x4   : > { %p309_p2 = pnand %p1294_p0, %p308_p1 }
   0x5   : > { %s1295_s11 = sshll.u32 (!%p309_p2), %s1290_s10, 2  ;;  %s362_s12 = ssub.s32 (!%p309_p2), 1, %s1290_s10 }
   0x6   : > { %312 = sbr.rel (%p309_p2) target bundleno = 1588 (0x634), region = 52  ;;  %p357_p3 = scmp.lt.s32.totalorder (!%p309_p2), %s1295_s11, 7 }
   0x7   : > { %s1297_s13 = sshll.u32 (!%p309_p2), %s362_s12, 2  ;;  %p1303_p5 = scmp.ne.s32.totalorder (!%p309_p2), %s1290_s10, 0 }
   0x8   : > { %p364_p4 = scmp.lt.s32.totalorder (!%p309_p2), %s1297_s13, 7 }
   0xb   : > { %s1852_s11 = smov (!%p357_p3, %s1295_s11), 7  ;;  %s1854_s13 = smov (!%p364_p4, %s1297_s13), 7 }
   0xc   : > { %s1296_s14 = sshll.u32 %s1852_s11, 3  ;;  %s1298_s18 = sshll.u32 %s1854_s13, 3 }
   0xd   : > { %s1595_s17 = scalar_lea.vmem %s1841_s0, %s1296_s14  ;;  %s1600_s21 = scalar_lea.vmem %s1842_s1, %s1298_s18 }
   0xe   : > { %s1605_s24 = scalar_lea.vmem %s1849_s8, %s1296_s14  ;;  %s1610_s27 = scalar_lea.vmem %s1850_s9, %s1298_s18 }
   0xf   : > { %387 = sbr.rel (%p1303_p5) target bundleno = 22 (0x16), region = 56 }
  0x14   : > { %vm388_vm0 = vcmask 261120   ;;  %v1527_v0 = vmov 0.0  }
  0x15   : > { %389 = vst.msk [vmem:[#allocation5] sm:$0xff] %vm388_vm0, %v1527_v0 }
  0x16 PF: > { %v401_v1 = vld [vmem:[%s1843_s2 + $0x38] sm:$0xff]  ;;  %v400_v3 = vld [vmem:[%s1843_s2 + $0x30] sm:$0xff]  ;;  %v399_v5 = vld [vmem:[%s1843_s2 + $0x28] sm:$0xff]  ;;  %vm421_vm1 = vcmask 523264   ;;  %v1528_v26 = vmov 0.0   ;;  %vm1530_vm2 = vmmov 0  }
  0x17   : > { %v413_v2 = vld [vmem:[%s1844_s3 + $0x38] sm:$0xff]  ;;  %1376 = vmatprep.subr.mxu0 %v401_v1  ;;  %v412_v4 = vld [vmem:[%s1844_s3 + $0x30] sm:$0xff]  ;;  %v411_v6 = vld [vmem:[%s1844_s3 + $0x28] sm:$0xff]  ;;  %vm659_vm3 = vcmask 261120   ;;  %vm519_vm4 = vcmask 392192   ;;  %s1531_s23 = smov 112  }
  0x18   : > { %1398 = vmatprep.subr.mxu1 %v413_v2  ;;  %1377 = vmatpush3.msra.mxu0 %v401_v1  ;;  %v398_v7 = vld [vmem:[%s1843_s2 + $0x20] sm:$0xff]  ;;  %v397_v9 = vld [vmem:[%s1843_s2 + $0x18] sm:$0xff]  ;;  %v396_v11 = vld [vmem:[%s1843_s2 + $0x10] sm:$0xff]  ;;  %s1532_s25 = smov 16   ;;  %s1533_s26 = smov 96   ;;  %vm645_vm5 = vcmask 130048  }
  0x19   : > { %1399 = vmatpush3.msra.mxu1 %v413_v2  ;;  %1378 = vmatprep.subr.mxu0 %v400_v3  ;;  %v410_v8 = vld [vmem:[%s1844_s3 + $0x20] sm:$0xff]  ;;  %v409_v10 = vld [vmem:[%s1844_s3 + $0x18] sm:$0xff]  ;;  %v408_v12 = vld [vmem:[%s1844_s3 + $0x10] sm:$0xff] }
  0x1a   : > { %1400 = vmatprep.subr.mxu1 %v412_v4  ;;  %1379 = vmatpush3.msra.mxu0 %v400_v3  ;;  %v395_v13 = vld [vmem:[%s1843_s2 + $0x8] sm:$0xff]  ;;  %v394_v15 = vld [vmem:[%s1843_s2] sm:$0xff]  ;;  %v404_v21 = vld [vmem:[%s1600_s21 + $0x10] sm:$0xff] }
  0x1b   : > { %1401 = vmatpush3.msra.mxu1 %v412_v4  ;;  %1380 = vmatprep.subr.mxu0 %v399_v5  ;;  %v407_v14 = vld [vmem:[%s1844_s3 + $0x8] sm:$0xff]  ;;  %v406_v16 = vld [vmem:[%s1844_s3] sm:$0xff]  ;;  %v1670_v22 = vld [vmem:[%s1847_s6 + $0x18] sm:$0xff] }
  0x1c   : > { %1402 = vmatprep.subr.mxu1 %v411_v6  ;;  %1381 = vmatpush3.msra.mxu0 %v399_v5  ;;  %v390_v17 = vld [vmem:[%s1595_s17] sm:$0xff]  ;;  %v391_v19 = vld [vmem:[%s1595_s17 + $0x8] sm:$0xff]  ;;  %v392_v23 = vld [vmem:[%s1595_s17 + $0x10] sm:$0xff] }
  0x1d   : > { %1403 = vmatpush3.msra.mxu1 %v411_v6  ;;  %1382 = vmatprep.subr.mxu0 %v398_v7  ;;  %v402_v18 = vld [vmem:[%s1600_s21] sm:$0xff]  ;;  %v403_v20 = vld [vmem:[%s1600_s21 + $0x8] sm:$0xff]  ;;  %v405_v25 = vld [vmem:[%s1600_s21 + $0x18] sm:$0xff]  ;;  %s1529_s21 = smov 64  }
  0x1e   : > { %1404 = vmatprep.subr.mxu1 %v410_v8  ;;  %1383 = vmatpush3.msra.mxu0 %v398_v7  ;;  %v1317_v24 = vld [vmem:[%s1848_s7] ss:$0 sm:$0xff]  ;;  %v1684_v27 = vld [vmem:[%s1847_s6 + $0x10] sm:$0xff]  ;;  %v393_v28 = vld [vmem:[%s1595_s17 + $0x18] sm:$0xff] }
  0x1f   : > { %1405 = vmatpush3.msra.mxu1 %v410_v8  ;;  %1384 = vmatprep.subr.mxu0 %v397_v9  ;;  %v1693_v29 = vld [vmem:[%s1847_s6 + $0x8] sm:$0xff]  ;;  %v1703_v30 = vld [vmem:[%s1847_s6] sm:$0xff] }
  0x20   : > { %1406 = vmatprep.subr.mxu1 %v409_v10  ;;  %1385 = vmatpush3.msra.mxu0 %v397_v9  ;;  %v1708_v31 = vld [vmem:[#allocation5] sm:$0xff] }
  0x21   : > { %1407 = vmatpush3.msra.mxu1 %v409_v10  ;;  %1386 = vmatprep.subr.mxu0 %v396_v11  ;;  %v1309_v32 = vld [vmem:[%s1846_s5] ss:$0 sm:$0xff] }
  0x22   : > { %1408 = vmatprep.subr.mxu1 %v408_v12  ;;  %1387 = vmatpush3.msra.mxu0 %v396_v11  ;;  %v1304_v34 = vld [vmem:[%s1845_s4] ss:$0 sm:$0xff] }
  0x23   : > { %1409 = vmatpush3.msra.mxu1 %v408_v12  ;;  %1388 = vmatprep.subr.mxu0 %v395_v13 }
  0x24   : > { %1410 = vmatprep.subr.mxu1 %v407_v14  ;;  %1389 = vmatpush3.msra.mxu0 %v395_v13 }
  0x25   : > { %1411 = vmatpush3.msra.mxu1 %v407_v14  ;;  %1390 = vmatprep.subr.mxu0 %v394_v15 }
  0x26   : > { %1412 = vmatprep.subr.mxu1 %v406_v16  ;;  %1391 = vmatpush3.msra.mxu0 %v394_v15 }
  0x27   : > { %1392 = vmatprep.mubr.msk.f32.mxu0 %vm421_vm1, %v390_v17  ;;  %1413 = vmatpush3.msra.mxu1 %v406_v16 }
  0x28   : > { %1414 = vmatprep.mubr.msk.f32.mxu1 %vm421_vm1, %v402_v18  ;;  %1393 = vmatmul.mubr.msk.f32.vlgmr.msra.gmra.mxu0 %vm421_vm1, %v391_v19 }
  0x29   : > { %1415 = vmatmul.mubr.msk.f32.vlgmr.msra.gmra.mxu1 %vm421_vm1, %v403_v20  ;;  %1420 = vmatprep.subr.mxu0 %v1528_v26 }
  0x2a   : > { %1417 = vmatprep.mubr.msk.f32.mxu1 %vm421_vm1, %v404_v21  ;;  %1421 = vmatpush3.msra.mxu0 %v1670_v22 }
  0x2b   : > { %1395 = vmatprep.mubr.msk.f32.mxu0 %vm421_vm1, %v392_v23  ;;  %1422 = vmatprep.subr.mxu0 %v1528_v26 }
  0x2c   : > { %756 = vrot.lane.b32.xlu0 %v1317_v24, %s1529_s21  ;;  %1423 = vmatpush3.msra.mxu0 %v1684_v27 }
  0x2d   : > { %1418 = vmatmul.mubr.msk.f32.gmra.mxu1 %vm421_vm1, %v405_v25  ;;  %1396 = vmatmul.mubr.msk.f32.gmra.mxu0 %vm421_vm1, %v393_v28 }
  0x2e   : > { %1424 = vmatprep.subr.mxu0 %v1528_v26  ;;  %1428 = vmatprep.mubr.msk.f32.mxu0 %vm1530_vm2, %v1528_v26 }
  0x2f   : > { %1425 = vmatpush3.msra.mxu0 %v1693_v29  ;;  %1431 = vmatprep.subr.mxu1 %v1528_v26 }
  0x30   : > { %1426 = vmatprep.subr.mxu0 %v1528_v26  ;;  %1432 = vmatpush3.msra.mxu1 %v1670_v22 }
  0x31   : > { %1427 = vmatpush3.msra.mxu0 %v1703_v30  ;;  %1433 = vmatprep.subr.mxu1 %v1528_v26 }
  0x32   : > { %1429 = vmatmul.mubr.msk.f32.vlgmr.msra.gmra.mxu0 %vm659_vm3, %v1708_v31  ;;  %1434 = vmatpush3.msra.mxu1 %v1684_v27 }
  0x33   : > { %1439 = vmatprep.mubr.msk.f32.mxu1 %vm1530_vm2, %v1528_v26  ;;  %1435 = vmatprep.subr.mxu1 %v1528_v26 }
  0x34   : > { %1442 = vmatprep.subr.mxu0 %v1528_v26  ;;  %1436 = vmatpush3.msra.mxu1 %v1693_v29 }
  0x35   : > { %1443 = vmatpush3.msra.mxu0 %v1670_v22  ;;  %1437 = vmatprep.subr.mxu1 %v1528_v26 }
  0x36   : > { %1444 = vmatprep.subr.mxu0 %v1528_v26  ;;  %1438 = vmatpush3.msra.mxu1 %v1703_v30 }
  0x37   : > { %1445 = vmatpush3.msra.mxu0 %v1684_v27  ;;  %1450 = vmatprep.mubr.msk.f32.mxu0 %vm1530_vm2, %v1528_v26 }
  0x38   : > { %1446 = vmatprep.subr.mxu0 %v1528_v26  ;;  %1453 = vmatprep.subr.mxu1 %v1528_v26 }
  0x39   : > { %1447 = vmatpush3.msra.mxu0 %v1693_v29 }
  0x3a   : > { %1448 = vmatprep.subr.mxu0 %v1528_v26 }
  0x3b   : > { %1449 = vmatpush3.msra.mxu0 %v1703_v30 }
  0x9e   : > { %v1749_v53 = vpop.permute.xlu0 %756 }
  0xe8   : > { %v1394_v33 = vpop.f32.mrf.mxu0 }
  0xe9   : > { %v1416_v35 = vpop.f32.mrf.mxu1  ;;  %v506_v36 = vadd.f32 %v1394_v33, %v1304_v34 }
  0xea   : > { %v615_v37 = vadd.f32 %v1416_v35, %v1309_v32  ;;  %v500_v38 = vpop.f32.mrf.mxu0 }
  0xeb   : > { %v609_v39 = vpop.f32.mrf.mxu1  ;;  %521 = vst.msk [vmem:[#allocation2 + $0x8] sm:$0xff] %vm519_vm4, %v506_v36  ;;  %v501_v40 = vadd.f32 %v1304_v34, %v500_v38 }
  0xec   : > { %629 = vst.msk [vmem:[#allocation3 + $0x8] sm:$0xff] %vm519_vm4, %v615_v37  ;;  %v610_v41 = vadd.f32 %v1309_v32, %v609_v39 }
  0xed   : > { %v1419_v42 = vpop.f32.mrf.mxu1  ;;  %520 = vst.msk [vmem:[#allocation2] sm:$0xff] %vm519_vm4, %v501_v40  ;;  %v1397_v44 = vpop.f32.mrf.mxu0 }
  0xee   : > { %628 = vst.msk [vmem:[#allocation3] sm:$0xff] %vm519_vm4, %v610_v41  ;;  %v625_v43 = vadd.f32 %v1419_v42, %v1309_v32  ;;  %v516_v46 = vadd.f32 %v1397_v44, %v1304_v34 }
  0xef   : > { %v619_v45 = vpop.f32.mrf.mxu1  ;;  %v510_v48 = vpop.f32.mrf.mxu0 }
  0xf0   : > { %631 = vst.msk [vmem:[#allocation3 + $0x18] sm:$0xff] %vm519_vm4, %v625_v43  ;;  %v620_v47 = vadd.f32 %v1309_v32, %v619_v45  ;;  %523 = vst.msk [vmem:[#allocation2 + $0x18] sm:$0xff] %vm519_vm4, %v516_v46  ;;  %v511_v49 = vadd.f32 %v1304_v34, %v510_v48 }
  0xf2   : > { %630 = vst.msk [vmem:[#allocation3 + $0x10] sm:$0xff] %vm519_vm4, %v620_v47  ;;  %v729_v50 = vpop.f32.mrf.mxu0  ;;  %522 = vst.msk [vmem:[#allocation2 + $0x10] sm:$0xff] %vm519_vm4, %v511_v49  ;;  %v773_v57 = vld [vmem:[#allocation2 + $0x8] sm:$0xff] }
  0xf3   : > { %v759_v55 = vadd.f32 %v1749_v53, %v729_v50  ;;  %v901_v24 = vld [vmem:[#allocation3 + $0x8] sm:$0xff] }
  0xf4   : > { %v1430_v51 = vpop.f32.mrf.mxu0  ;;  %v638_v52 = vld [vmem:[#allocation2] sm:$0xff] }
  0xf5   : > { %648 = vrot.lane.b32.xlu1 %v638_v52, %s1531_s23 }
  0xf7   : > { %v640_v54 = vld [vmem:[#allocation3 + $0x18] sm:$0xff] }
  0xf8   : > { %642 = vrot.lane.b32.xlu0 %v640_v54, %s1532_s25 }
  0xf9   : > { %741 = vrot.lane.b32.xlu1 %v729_v50, %s1533_s26  ;;  %v1758_v56 = vld [vmem:[#allocation3 + $0x10] sm:$0xff] }
  0xfa   : > { %v899_v25 = vld [vmem:[#allocation2 + $0x10] sm:$0xff] }
  0xfc   : > { %761 = vrot.lane.b32.xlu0 %v759_v55, %s1529_s21 }
  0xfd   : > { %652 = vrot.lane.b32.xlu1 %v638_v52, %s1533_s26 }
 0x100   : > { %655 = vrot.lane.b32.xlu0 %v640_v54, %s1531_s23 }
 0x101   : > { %777 = vrot.lane.b32.xlu1 %v1758_v56, %s1532_s25 }
 0x104   : > { %782 = vrot.lane.b32.xlu0 %v773_v57, %s1531_s23 }
 0x167   : > { %v649_v58 = vpop.permute.xlu1 %648 }
 0x168   : > { %v651_v0 = vsel %vm645_vm5, %v649_v58, %v640_v54  ;;  %v1025_v58 = vld [vmem:[#allocation2 + $0x18] sm:$0xff] }
 0x16a   : > { %v643_v59 = vpop.permute.xlu0 %642 }
 0x16b   : > { %v646_v60 = vsel %vm645_vm5, %v638_v52, %v643_v59  ;;  %v742_v63 = vpop.permute.xlu1 %741 }
 0x16c   : > { %v733_v61 = vadd.f32 %v729_v50, %v646_v60  ;;  %v744_v1 = vadd.f32 %v742_v63, %v651_v0 }
 0x16e   : > { %v1315_v62 = vmul.f32 -1.442695, %v733_v61  ;;  %v1316_v2 = vmul.f32 -1.442695, %v744_v1  ;;  %v762_v5 = vpop.permute.xlu0 %761 }
 0x16f   : > { %v653_v11 = vpop.permute.xlu1 %652 }
 0x170   : > { %1479 = vpow2.f32 %v1315_v62 }
 0x171   : > { %1481 = vpow2.f32 %v1316_v2 }
 0x172   : > { %v656_v8 = vpop.permute.xlu0 %655 }
 0x173   : > { %v658_v12 = vsel %vm645_vm5, %v653_v11, %v656_v8 }
 0x17d   : > { %v1480_v3 = vpop.eup %1479 }
 0x17e   : > { %v737_v4 = vadd.f32 1.0, %v1480_v3  ;;  %v1482_v6 = vpop.eup %1481 }
 0x17f   : > { %v748_v7 = vadd.f32 1.0, %v1482_v6 }
 0x180   : > { %1483 = vrcp.f32 %v737_v4 }
 0x181   : > { %1485 = vrcp.f32 %v748_v7 }
 0x18d   : > { %v1484_v9 = vpop.eup %1483 }
 0x18e   : > { %v764_v10 = vmul.f32 %v1484_v9, %v762_v5  ;;  %v1486_v14 = vpop.eup %1485 }
 0x18f   : > { %v767_v15 = vsub.f32 1.0, %v1486_v14  ;;  %v769_v18 = vmul.f32 %v1486_v14, %v1708_v31  ;;  %v783_v31 = vpop.permute.xlu0 %782 }
 0x190   : > { %v765_v13 = vadd.f32 %v764_v10, %v658_v12  ;;  %v785_v33 = vsel %vm645_vm5, %v783_v31, %v1758_v56 }
 0x192   : > { %1487 = vtanh.f32 %v765_v13 }
 0x19f   : > { %v1488_v16 = vpop.eup %1487 }
 0x1a0   : > { %v768_v17 = vmul.f32 %v1488_v16, %v767_v15 }
 0x1a2   : > { %v770_v19 = vadd.f32 %v769_v18, %v768_v17 }
 0x1a4   : > { %771 = vst.msk [vmem:[#allocation4] sm:$0xff] %vm659_vm3, %v770_v19  ;;  %1440 = vmatmul.mubr.msk.f32.vlgmr.msra.gmra.mxu1 %vm659_vm3, %v770_v19 }
 0x1a5   : > { %1454 = vmatpush3.msra.mxu1 %v1670_v22  ;;  %1461 = vmatprep.mubr.msk.f32.mxu1 %vm1530_vm2, %v1528_v26 }
 0x1a6   : > { %1455 = vmatprep.subr.mxu1 %v1528_v26 }
 0x1a7   : > { %1456 = vmatpush3.msra.mxu1 %v1684_v27 }
 0x1a8   : > { %1457 = vmatprep.subr.mxu1 %v1528_v26 }
 0x1a9   : > { %1458 = vmatpush3.msra.mxu1 %v1693_v29 }
 0x1aa   : > { %1459 = vmatprep.subr.mxu1 %v1528_v26  ;;  %v778_v26 = vpop.permute.xlu1 %777 }
 0x1ab   : > { %v1777_v20 = vld [vmem:[#allocation4] sm:$0xff]  ;;  %1460 = vmatpush3.msra.mxu1 %v1703_v30  ;;  %v780_v27 = vsel %vm645_vm5, %v773_v57, %v778_v26 }
 0x1ac   : > { %1154 = vst.msk [vmem:[%s1605_s24] sm:$0xff] %vm645_vm5, %v1777_v20 }
 0x264   : > { %v862_v21 = vpop.f32.mrf.mxu1 }
 0x265   : > { %v884_v22 = vadd.f32 %v862_v21, %v1749_v53  ;;  %874 = vrot.lane.b32.xlu1 %v862_v21, %s1533_s26  ;;  %v866_v28 = vadd.f32 %v862_v21, %v780_v27 }
 0x266   : > { %v1441_v23 = vpop.f32.mrf.mxu1 }
 0x267   : > { %886 = vrot.lane.b32.xlu0 %v884_v22, %s1529_s21  ;;  %v1319_v29 = vmul.f32 -1.442695, %v866_v28 }
 0x269   : > { %786 = vrot.lane.b32.xlu1 %v773_v57, %s1533_s26  ;;  %1489 = vpow2.f32 %v1319_v29  ;;  %v1026_v57 = vld [vmem:[#allocation3] sm:$0xff] }
 0x26b   : > { %789 = vrot.lane.b32.xlu0 %v1758_v56, %s1531_s23 }
 0x26d   : > { %903 = vrot.lane.b32.xlu1 %v901_v24, %s1532_s25 }
 0x26f   : > { %908 = vrot.lane.b32.xlu0 %v899_v25, %s1531_s23 }
 0x276   : > { %v1490_v30 = vpop.eup %1489 }
 0x277   : > { %v870_v32 = vadd.f32 1.0, %v1490_v30 }
 0x279   : > { %1491 = vrcp.f32 %v870_v32 }
 0x286   : > { %v1492_v40 = vpop.eup %1491 }
 0x2d7   : > { %v875_v34 = vpop.permute.xlu1 %874 }
 0x2d8   : > { %v877_v35 = vadd.f32 %v875_v34, %v785_v33 }
 0x2d9   : > { %v887_v37 = vpop.permute.xlu0 %886 }
 0x2da   : > { %v1320_v36 = vmul.f32 -1.442695, %v877_v35  ;;  %v889_v42 = vmul.f32 %v1492_v40, %v887_v37 }
 0x2db   : > { %v787_v39 = vpop.permute.xlu1 %786 }
 0x2dc   : > { %1493 = vpow2.f32 %v1320_v36 }
 0x2dd   : > { %v790_v38 = vpop.permute.xlu0 %789 }
 0x2de   : > { %v792_v41 = vsel %vm645_vm5, %v787_v39, %v790_v38 }
 0x2df   : > { %v890_v45 = vadd.f32 %v889_v42, %v792_v41  ;;  %v904_v59 = vpop.permute.xlu1 %903 }
 0x2e0   : > { %v906_v60 = vsel %vm645_vm5, %v899_v25, %v904_v59 }
 0x2e1   : > { %v909_v0 = vpop.permute.xlu0 %908 }
 0x2e2   : > { %v911_v2 = vsel %vm645_vm5, %v909_v0, %v901_v24 }
 0x2e9   : > { %v1494_v43 = vpop.eup %1493 }
 0x2ea   : > { %v881_v44 = vadd.f32 1.0, %v1494_v43 }
 0x2ec   : > { %1495 = vrcp.f32 %v881_v44 }
 0x2ed   : > { %1497 = vtanh.f32 %v890_v45 }
 0x2f9   : > { %v1496_v46 = vpop.eup %1495 }
 0x2fa   : > { %v892_v47 = vsub.f32 1.0, %v1496_v46  ;;  %v1498_v48 = vpop.eup %1497  ;;  %v894_v50 = vmul.f32 %v1496_v46, %v770_v19 }
 0x2fc   : > { %v893_v49 = vmul.f32 %v1498_v48, %v892_v47 }
 0x2fe   : > { %v895_v51 = vadd.f32 %v894_v50, %v893_v49 }
 0x300   : > { %897 = vst.msk [vmem:[#allocation4 + $0x8] sm:$0xff] %vm659_vm3, %v895_v51  ;;  %1451 = vmatmul.mubr.msk.f32.vlgmr.msra.gmra.mxu0 %vm659_vm3, %v895_v51 }
 0x307   : > { %v1151_v52 = vld [vmem:[#allocation4 + $0x8] sm:$0xff] }
 0x308   : > { %1155 = vst.msk [vmem:[%s1605_s24 + $0x8] sm:$0xff] %vm645_vm5, %v1151_v52 }
 0x3c0   : > { %v988_v54 = vpop.f32.mrf.mxu0 }
 0x3c1   : > { %v1010_v55 = vadd.f32 %v988_v54, %v1749_v53  ;;  %1000 = vrot.lane.b32.xlu1 %v988_v54, %s1533_s26  ;;  %v992_v61 = vadd.f32 %v988_v54, %v906_v60 }
 0x3c2   : > { %v1452_v56 = vpop.f32.mrf.mxu0 }
 0x3c3   : > { %1012 = vrot.lane.b32.xlu0 %v1010_v55, %s1529_s21  ;;  %v1322_v62 = vmul.f32 -1.442695, %v992_v61 }
 0x3c5   : > { %912 = vrot.lane.b32.xlu1 %v899_v25, %s1533_s26  ;;  %1499 = vpow2.f32 %v1322_v62 }
 0x3c7   : > { %915 = vrot.lane.b32.xlu0 %v901_v24, %s1531_s23 }
 0x3c9   : > { %1028 = vrot.lane.b32.xlu1 %v1026_v57, %s1532_s25 }
 0x3cb   : > { %1033 = vrot.lane.b32.xlu0 %v1025_v58, %s1531_s23 }
 0x3d2   : > { %v1500_v63 = vpop.eup %1499 }
 0x3d3   : > { %v996_v1 = vadd.f32 1.0, %v1500_v63 }
 0x3d5   : > { %1501 = vrcp.f32 %v996_v1 }
 0x3e2   : > { %v1502_v9 = vpop.eup %1501 }
 0x433   : > { %v1001_v3 = vpop.permute.xlu1 %1000 }
 0x434   : > { %v1003_v4 = vadd.f32 %v1001_v3, %v911_v2 }
 0x435   : > { %v1013_v6 = vpop.permute.xlu0 %1012 }
 0x436   : > { %v1323_v5 = vmul.f32 -1.442695, %v1003_v4  ;;  %v1015_v11 = vmul.f32 %v1502_v9, %v1013_v6 }
 0x437   : > { %v913_v8 = vpop.permute.xlu1 %912 }
 0x438   : > { %1503 = vpow2.f32 %v1323_v5 }
 0x439   : > { %v916_v7 = vpop.permute.xlu0 %915 }
 0x43a   : > { %v918_v10 = vsel %vm645_vm5, %v913_v8, %v916_v7 }
 0x43b   : > { %v1016_v14 = vadd.f32 %v1015_v11, %v918_v10  ;;  %v1029_v26 = vpop.permute.xlu1 %1028 }
 0x43c   : > { %v1031_v27 = vsel %vm645_vm5, %v1025_v58, %v1029_v26 }
 0x43d   : > { %v1034_v30 = vpop.permute.xlu0 %1033 }
 0x43e   : > { %v1036_v32 = vsel %vm645_vm5, %v1034_v30, %v1026_v57 }
 0x445   : > { %v1504_v12 = vpop.eup %1503 }
 0x446   : > { %v1007_v13 = vadd.f32 1.0, %v1504_v12 }
 0x448   : > { %1505 = vrcp.f32 %v1007_v13 }
 0x449   : > { %1507 = vtanh.f32 %v1016_v14 }
 0x455   : > { %v1506_v15 = vpop.eup %1505 }
 0x456   : > { %v1018_v16 = vsub.f32 1.0, %v1506_v15  ;;  %v1508_v17 = vpop.eup %1507  ;;  %v1020_v19 = vmul.f32 %v1506_v15, %v895_v51 }
 0x458   : > { %v1019_v18 = vmul.f32 %v1508_v17, %v1018_v16 }
 0x45a   : > { %v1021_v21 = vadd.f32 %v1020_v19, %v1019_v18 }
 0x45c   : > { %1023 = vst.msk [vmem:[#allocation4 + $0x10] sm:$0xff] %vm659_vm3, %v1021_v21  ;;  %1462 = vmatmul.mubr.msk.f32.vlgmr.msra.gmra.mxu1 %vm659_vm3, %v1021_v21 }
 0x463   : > { %v1152_v22 = vld [vmem:[#allocation4 + $0x10] sm:$0xff] }
 0x464   : > { %1156 = vst.msk [vmem:[%s1605_s24 + $0x10] sm:$0xff] %vm645_vm5, %v1152_v22 }
 0x51c   : > { %v1113_v23 = vpop.f32.mrf.mxu1 }
 0x51d   : > { %v1135_v24 = vadd.f32 %v1113_v23, %v1749_v53  ;;  %1125 = vrot.lane.b32.xlu1 %v1113_v23, %s1533_s26  ;;  %v1117_v53 = vadd.f32 %v1113_v23, %v1031_v27 }
 0x51e   : > { %v1463_v25 = vpop.f32.mrf.mxu1 }
 0x51f   : > { %1137 = vrot.lane.b32.xlu0 %v1135_v24, %s1529_s21  ;;  %v1325_v28 = vmul.f32 -1.442695, %v1117_v53 }
 0x521   : > { %1037 = vrot.lane.b32.xlu1 %v1025_v58, %s1533_s26  ;;  %1509 = vpow2.f32 %v1325_v28 }
 0x523   : > { %1040 = vrot.lane.b32.xlu0 %v1026_v57, %s1531_s23 }
 0x525   : > { %1160 = vrot.lane.b32.xlu1 %v1777_v20, %s1531_s23 }
 0x527   : > { %1167 = vrot.lane.b32.xlu0 %v1151_v52, %s1531_s23 }
 0x529   : > { %1174 = vrot.lane.b32.xlu1 %v1152_v22, %s1531_s23 }
 0x52e   : > { %v1510_v29 = vpop.eup %1509 }
 0x52f   : > { %v1121_v31 = vadd.f32 1.0, %v1510_v29 }
 0x531   : > { %1511 = vrcp.f32 %v1121_v31 }
 0x53e   : > { %v1512_v41 = vpop.eup %1511 }
 0x58f   : > { %v1126_v33 = vpop.permute.xlu1 %1125 }
 0x590   : > { %v1128_v20 = vadd.f32 %v1126_v33, %v1036_v32 }
 0x591   : > { %v1138_v34 = vpop.permute.xlu0 %1137 }
 0x592   : > { %v1326_v35 = vmul.f32 -1.442695, %v1128_v20  ;;  %v1140_v43 = vmul.f32 %v1512_v41, %v1138_v34 }
 0x593   : > { %v1038_v36 = vpop.permute.xlu1 %1037 }
 0x594   : > { %1513 = vpow2.f32 %v1326_v35 }
 0x595   : > { %v1041_v37 = vpop.permute.xlu0 %1040 }
 0x596   : > { %v1043_v42 = vsel %vm645_vm5, %v1038_v36, %v1041_v37 }
 0x597   : > { %v1161_v38 = vpop.permute.xlu1 %1160  ;;  %v1141_v46 = vadd.f32 %v1140_v43, %v1043_v42 }
 0x598   : > { %1327 = vst.msk [vmem:[%s1610_s27 + $0x18] sm:$0xff] %vm645_vm5, %v1161_v38 }
 0x599   : > { %v1168_v39 = vpop.permute.xlu0 %1167 }
 0x59a   : > { %1328 = vst.msk [vmem:[%s1610_s27 + $0x10] sm:$0xff] %vm645_vm5, %v1168_v39 }
 0x59b   : > { %v1175_v40 = vpop.permute.xlu1 %1174 }
 0x59c   : > { %1329 = vst.msk [vmem:[%s1610_s27 + $0x8] sm:$0xff] %vm645_vm5, %v1175_v40 }
 0x5a1   : > { %v1514_v44 = vpop.eup %1513 }
 0x5a2   : > { %v1132_v45 = vadd.f32 1.0, %v1514_v44 }
 0x5a4   : > { %1515 = vrcp.f32 %v1132_v45 }
 0x5a5   : > { %1517 = vtanh.f32 %v1141_v46 }
 0x5b1   : > { %v1516_v47 = vpop.eup %1515 }
 0x5b2   : > { %v1143_v48 = vsub.f32 1.0, %v1516_v47  ;;  %v1518_v49 = vpop.eup %1517  ;;  %v1145_v50 = vmul.f32 %v1516_v47, %v1021_v21 }
 0x5b4   : > { %v1144_v51 = vmul.f32 %v1518_v49, %v1143_v48 }
 0x5b6   : > { %v1146_v52 = vadd.f32 %v1145_v50, %v1144_v51 }
 0x5b8   : > { %1148 = vst.msk [vmem:[#allocation4 + $0x18] sm:$0xff] %vm659_vm3, %v1146_v52  ;;  %1149 = vst.msk [vmem:[#allocation5] sm:$0xff] %vm659_vm3, %v1146_v52 }
 0x5bf   : > { %v1153_v54 = vld [vmem:[#allocation4 + $0x18] sm:$0xff] }
 0x5c0   : > { %1157 = vst.msk [vmem:[%s1605_s24 + $0x18] sm:$0xff] %vm645_vm5, %v1153_v54  ;;  %1181 = vrot.lane.b32.xlu0 %v1153_v54, %s1531_s23 }
 0x632   : > { %v1182_v55 = vpop.permute.xlu0 %1181 }
 0x633   : > { %1184 = vst.msk [vmem:[%s1610_s27] sm:$0xff] %vm645_vm5, %v1182_v55 }
 0x634 PF: > { %s20_s30 = sadd.s32 1, %s1525_s30  }
 0x635   : > { %p17_p6 = scmp.ge.s32.totalorder %s20_s30, 4  }
 0x637   :  { %19 = sbr.rel (!%p17_p6) target bundleno = 1 (0x1), region = 113 }

// kernel: dnn_forward_pallas.7
= control target key start
LH: loop header
LB: loop body
LE: loop exit
PB: predicated region body
PF: predicated region fallthrough
CT: control target
= control target key end

     0   :  { %vm48_vm0 = vcmask 130048   ;;  %vm345_vm1 = vcmask 523264   ;;  %vm475_vm2 = vcmask 7168   ;;  %s812_s3 = inlined_call_operand.vmem [shape: f32[16,64], index: 3, kind: input, shape index: {}]   ;;  %s813_s2 = inlined_call_operand.vmem [shape: f32[16,64], index: 2, kind: input, shape index: {}]   ;;  %s814_s1 = inlined_call_operand.vmem [shape: f32[64,16], index: 1, kind: input, shape index: {}]   ;;  %s815_s0 = inlined_call_operand.vmem [shape: f32[64,16], index: 0, kind: input, shape index: {}]   ;;  %s816_s5 = inlined_call_operand.vmem [shape: f32[64,1], index: 5, kind: input, shape index: {}]   ;;  %s817_s6 = inlined_call_operand.<no memory space> [shape: f32[1,1], index: 6, kind: input, shape index: {}]   ;;  %s818_s4 = inlined_call_operand.vmem [shape: f32[1,64], index: 4, kind: input, shape index: {}]   ;;  %s819_s7 = inlined_call_operand.vmem [shape: f32[64,1], index: 7, kind: output, shape index: {}]  }
   0x1   :  { %v47_v0 = vld [vmem:[%s812_s3 + $0x8] sm:$0xff]  ;;  %v46_v2 = vld [vmem:[%s812_s3] sm:$0xff]  ;;  %v40_v8 = vld [vmem:[%s814_s1 + $0x10] sm:$0xff]  ;;  %v12_v28 = vstv %s817_s6 }
   0x2   :  { %v37_v1 = vld [vmem:[%s813_s2 + $0x8] sm:$0xff]  ;;  %550 = vmatprep.subr.mxu0 %v47_v0  ;;  %v36_v3 = vld [vmem:[%s813_s2] sm:$0xff]  ;;  %v30_v9 = vld [vmem:[%s815_s0 + $0x10] sm:$0xff]  ;;  %13 = vst [vmem:[#allocation2] sm:$0x1] %v12_v28 }
   0x3   :  { %566 = vmatprep.subr.mxu1 %v37_v1  ;;  %v38_v4 = vld [vmem:[%s814_s1] sm:$0xff]  ;;  %551 = vmatpush3.msra.mxu0 %v47_v0  ;;  %v39_v6 = vld [vmem:[%s814_s1 + $0x8] sm:$0xff]  ;;  %v337_v10 = vld [vmem:[%s816_s5 + $0x38] sm:$0xff] }
   0x4   :  { %567 = vmatpush3.msra.mxu1 %v37_v1  ;;  %v28_v5 = vld [vmem:[%s815_s0] sm:$0xff]  ;;  %552 = vmatprep.subr.mxu0 %v46_v2  ;;  %v29_v7 = vld [vmem:[%s815_s0 + $0x8] sm:$0xff]  ;;  %v41_v11 = vld [vmem:[%s814_s1 + $0x18] sm:$0xff] }
   0x5   :  { %568 = vmatprep.subr.mxu1 %v36_v3  ;;  %553 = vmatpush3.msra.mxu0 %v46_v2  ;;  %v31_v12 = vld [vmem:[%s815_s0 + $0x18] sm:$0xff]  ;;  %v42_v13 = vld [vmem:[%s814_s1 + $0x20] sm:$0xff]  ;;  %v336_v15 = vld [vmem:[%s816_s5 + $0x30] sm:$0xff] }
   0x6   :  { %554 = vmatprep.mubr.msk.f32.mxu0 %vm48_vm0, %v38_v4  ;;  %569 = vmatpush3.msra.mxu1 %v36_v3  ;;  %v32_v14 = vld [vmem:[%s815_s0 + $0x20] sm:$0xff]  ;;  %v43_v16 = vld [vmem:[%s814_s1 + $0x28] sm:$0xff]  ;;  %v44_v18 = vld [vmem:[%s814_s1 + $0x30] sm:$0xff] }
   0x7   :  { %570 = vmatprep.mubr.msk.f32.mxu1 %vm48_vm0, %v28_v5  ;;  %555 = vmatmul.mubr.msk.f32.vlgmr.msra.gmra.mxu0 %vm48_vm0, %v39_v6  ;;  %v33_v17 = vld [vmem:[%s815_s0 + $0x28] sm:$0xff]  ;;  %v34_v19 = vld [vmem:[%s815_s0 + $0x30] sm:$0xff]  ;;  %v45_v21 = vld [vmem:[%s814_s1 + $0x38] sm:$0xff] }
   0x8   :  { %571 = vmatmul.mubr.msk.f32.vlgmr.msra.gmra.mxu1 %vm48_vm0, %v29_v7  ;;  %557 = vmatprep.mubr.msk.f32.mxu0 %vm48_vm0, %v40_v8  ;;  %v335_v20 = vld [vmem:[%s816_s5 + $0x28] sm:$0xff]  ;;  %v35_v22 = vld [vmem:[%s815_s0 + $0x38] sm:$0xff]  ;;  %v334_v23 = vld [vmem:[%s816_s5 + $0x20] sm:$0xff] }
   0x9   :  { %573 = vmatprep.mubr.msk.f32.mxu1 %vm48_vm0, %v30_v9  ;;  %582 = vmatprep.subr.mxu0 %v337_v10  ;;  %v333_v24 = vld [vmem:[%s816_s5 + $0x18] sm:$0xff]  ;;  %v332_v25 = vld [vmem:[%s816_s5 + $0x10] sm:$0xff]  ;;  %v331_v26 = vld [vmem:[%s816_s5 + $0x8] sm:$0xff] }
   0xa   :  { %610 = vmatprep.subr.mxu1 %v337_v10  ;;  %583 = vmatpush3.msra.mxu0 %v337_v10  ;;  %v330_v27 = vld [vmem:[%s816_s5] sm:$0xff] }
   0xb   :  { %618 = vmatpush3.msra.mxu1 %v337_v10  ;;  %558 = vmatmul.mubr.msk.f32.gmra.mxu0 %vm48_vm0, %v41_v11  ;;  %v504_v32 = vld [vmem:[%s818_s4] ss:$0 sm:$0xff] }
   0xc   :  { %574 = vmatmul.mubr.msk.f32.gmra.mxu1 %vm48_vm0, %v31_v12  ;;  %560 = vmatprep.mubr.msk.f32.mxu0 %vm48_vm0, %v42_v13  ;;  %v505_v6 = vld [vmem:[#allocation2] ss:$0 sm:$0xff] }
   0xd   :  { %576 = vmatprep.mubr.msk.f32.mxu1 %vm48_vm0, %v32_v14  ;;  %584 = vmatprep.subr.mxu0 %v336_v15 }
   0xe   :  { %611 = vmatprep.subr.mxu1 %v336_v15  ;;  %585 = vmatpush3.msra.mxu0 %v336_v15 }
   0xf   :  { %619 = vmatpush3.msra.mxu1 %v336_v15  ;;  %561 = vmatmul.mubr.msk.f32.gmra.mxu0 %vm48_vm0, %v43_v16 }
  0x10   :  { %577 = vmatmul.mubr.msk.f32.gmra.mxu1 %vm48_vm0, %v33_v17  ;;  %563 = vmatprep.mubr.msk.f32.mxu0 %vm48_vm0, %v44_v18 }
  0x11   :  { %579 = vmatprep.mubr.msk.f32.mxu1 %vm48_vm0, %v34_v19  ;;  %586 = vmatprep.subr.mxu0 %v335_v20 }
  0x12   :  { %612 = vmatprep.subr.mxu1 %v335_v20  ;;  %587 = vmatpush3.msra.mxu0 %v335_v20 }
  0x13   :  { %620 = vmatpush3.msra.mxu1 %v335_v20  ;;  %564 = vmatmul.mubr.msk.f32.gmra.mxu0 %vm48_vm0, %v45_v21 }
  0x14   :  { %580 = vmatmul.mubr.msk.f32.gmra.mxu1 %vm48_vm0, %v35_v22  ;;  %588 = vmatprep.subr.mxu0 %v334_v23 }
  0x15   :  { %613 = vmatprep.subr.mxu1 %v334_v23  ;;  %589 = vmatpush3.msra.mxu0 %v334_v23 }
  0x16   :  { %621 = vmatpush3.msra.mxu1 %v334_v23  ;;  %590 = vmatprep.subr.mxu0 %v333_v24 }
  0x17   :  { %614 = vmatprep.subr.mxu1 %v333_v24  ;;  %591 = vmatpush3.msra.mxu0 %v333_v24 }
  0x18   :  { %622 = vmatpush3.msra.mxu1 %v333_v24  ;;  %592 = vmatprep.subr.mxu0 %v332_v25 }
  0x19   :  { %615 = vmatprep.subr.mxu1 %v332_v25  ;;  %593 = vmatpush3.msra.mxu0 %v332_v25 }
  0x1a   :  { %623 = vmatpush3.msra.mxu1 %v332_v25  ;;  %594 = vmatprep.subr.mxu0 %v331_v26 }
  0x1b   :  { %616 = vmatprep.subr.mxu1 %v331_v26  ;;  %595 = vmatpush3.msra.mxu0 %v331_v26 }
  0x1c   :  { %624 = vmatpush3.msra.mxu1 %v331_v26  ;;  %596 = vmatprep.subr.mxu0 %v330_v27 }
  0x1d   :  { %617 = vmatprep.subr.mxu1 %v330_v27  ;;  %597 = vmatpush3.msra.mxu0 %v330_v27 }
  0x1e   :  { %625 = vmatpush3.msra.mxu1 %v330_v27 }
  0xc7   :  { %v556_v29 = vpop.f32.mrf.mxu0 }
  0xc8   :  { %v572_v30 = vpop.f32.mrf.mxu1 }
  0xc9   :  { %v274_v31 = vadd.f32 %v572_v30, %v556_v29  ;;  %v139_v33 = vpop.f32.mrf.mxu0 }
  0xca   :  { %v268_v34 = vpop.f32.mrf.mxu1 }
  0xcb   :  { %v269_v35 = vadd.f32 %v268_v34, %v139_v33  ;;  %v315_v36 = vadd.f32 %v504_v32, %v274_v31  ;;  %v559_v37 = vpop.f32.mrf.mxu0 }
  0xcc   :  { %v575_v38 = vpop.f32.mrf.mxu1 }
  0xcd   :  { %v314_v39 = vadd.f32 %v504_v32, %v269_v35  ;;  %v284_v40 = vadd.f32 %v575_v38, %v559_v37  ;;  %v149_v41 = vpop.f32.mrf.mxu0  ;;  %v323_v45 = vmax.f32 %v315_v36, 0.0 }
  0xce   :  { %v278_v42 = vpop.f32.mrf.mxu1 }
  0xcf   :  { %v322_v43 = vmax.f32 %v314_v39, 0.0  ;;  %v279_v44 = vadd.f32 %v278_v42, %v149_v41  ;;  %v317_v46 = vadd.f32 %v504_v32, %v284_v40  ;;  %v562_v47 = vpop.f32.mrf.mxu0 }
  0xd0   :  { %v578_v48 = vpop.f32.mrf.mxu1 }
  0xd1   :  { %v316_v49 = vadd.f32 %v504_v32, %v279_v44  ;;  %v294_v50 = vadd.f32 %v578_v48, %v562_v47  ;;  %598 = vmatprep.mubr.msk.f32.mxu0 %vm345_vm1, %v322_v43  ;;  %v159_v51 = vpop.f32.mrf.mxu0  ;;  %v325_v55 = vmax.f32 %v317_v46, 0.0 }
  0xd2   :  { %v288_v52 = vpop.f32.mrf.mxu1  ;;  %599 = vmatmul.mubr.msk.f32.vlgmr.msra.gmra.mxu0 %vm345_vm1, %v323_v45 }
  0xd3   :  { %v324_v53 = vmax.f32 %v316_v49, 0.0  ;;  %v289_v54 = vadd.f32 %v288_v52, %v159_v51  ;;  %v319_v56 = vadd.f32 %v504_v32, %v294_v50  ;;  %v565_v57 = vpop.f32.mrf.mxu0 }
  0xd4   :  { %v581_v58 = vpop.f32.mrf.mxu1 }
  0xd5   :  { %v318_v59 = vadd.f32 %v504_v32, %v289_v54  ;;  %v304_v60 = vadd.f32 %v581_v58, %v565_v57  ;;  %601 = vmatprep.mubr.msk.f32.mxu0 %vm345_vm1, %v324_v53  ;;  %v169_v61 = vpop.f32.mrf.mxu0  ;;  %v327_v1 = vmax.f32 %v319_v56, 0.0 }
  0xd6   :  { %v298_v62 = vpop.f32.mrf.mxu1  ;;  %602 = vmatmul.mubr.msk.f32.gmra.mxu0 %vm345_vm1, %v325_v55 }
  0xd7   :  { %v326_v63 = vmax.f32 %v318_v59, 0.0  ;;  %v299_v0 = vadd.f32 %v298_v62, %v169_v61  ;;  %v321_v2 = vadd.f32 %v504_v32, %v304_v60 }
  0xd9   :  { %v320_v3 = vadd.f32 %v504_v32, %v299_v0  ;;  %604 = vmatprep.mubr.msk.f32.mxu1 %vm345_vm1, %v326_v63  ;;  %v329_v5 = vmax.f32 %v321_v2, 0.0 }
  0xda   :  { %605 = vmatmul.mubr.msk.f32.vlgmr.msra.gmra.mxu1 %vm345_vm1, %v327_v1 }
  0xdb   :  { %v328_v4 = vmax.f32 %v320_v3, 0.0 }
  0xdd   :  { %607 = vmatprep.mubr.msk.f32.mxu1 %vm345_vm1, %v328_v4 }
  0xde   :  { %608 = vmatmul.mubr.msk.f32.gmra.mxu1 %vm345_vm1, %v329_v5 }
 0x192   :  { %v600_v7 = vpop.f32.mrf.mxu0 }
 0x193   :  { %v442_v8 = vadd.f32 %v600_v7, %v505_v6 }
 0x194   :  { %v436_v9 = vpop.f32.mrf.mxu0 }
 0x195   :  { %477 = vst.msk [vmem:[%s819_s7 + $0x8] sm:$0xff] %vm475_vm2, %v442_v8  ;;  %v437_v10 = vadd.f32 %v505_v6, %v436_v9 }
 0x196   :  { %v603_v11 = vpop.f32.mrf.mxu0 }
 0x197   :  { %476 = vst.msk [vmem:[%s819_s7] sm:$0xff] %vm475_vm2, %v437_v10  ;;  %v452_v12 = vadd.f32 %v603_v11, %v505_v6 }
 0x198   :  { %v446_v13 = vpop.f32.mrf.mxu0 }
 0x199   :  { %479 = vst.msk [vmem:[%s819_s7 + $0x18] sm:$0xff] %vm475_vm2, %v452_v12  ;;  %v447_v14 = vadd.f32 %v505_v6, %v446_v13 }
 0x19a   :  { %v606_v15 = vpop.f32.mrf.mxu1 }
 0x19b   :  { %478 = vst.msk [vmem:[%s819_s7 + $0x10] sm:$0xff] %vm475_vm2, %v447_v14  ;;  %v462_v16 = vadd.f32 %v606_v15, %v505_v6 }
 0x19c   :  { %v456_v17 = vpop.f32.mrf.mxu1 }
 0x19d   :  { %481 = vst.msk [vmem:[%s819_s7 + $0x28] sm:$0xff] %vm475_vm2, %v462_v16  ;;  %v457_v18 = vadd.f32 %v505_v6, %v456_v17 }
 0x19e   :  { %v609_v19 = vpop.f32.mrf.mxu1 }
 0x19f   :  { %480 = vst.msk [vmem:[%s819_s7 + $0x20] sm:$0xff] %vm475_vm2, %v457_v18  ;;  %v472_v20 = vadd.f32 %v609_v19, %v505_v6 }
 0x1a0   :  { %v466_v21 = vpop.f32.mrf.mxu1 }
 0x1a1   :  { %483 = vst.msk [vmem:[%s819_s7 + $0x38] sm:$0xff] %vm475_vm2, %v472_v20  ;;  %v467_v22 = vadd.f32 %v505_v6, %v466_v21 }
 0x1a3   :  { %482 = vst.msk [vmem:[%s819_s7 + $0x30] sm:$0xff] %vm475_vm2, %v467_v22 }

// kernel: dnn_forward_pallas.6
= control target key start
LH: loop header
LB: loop body
LE: loop exit
PB: predicated region body
PF: predicated region fallthrough
CT: control target
= control target key end

     0   :  { %s1996_s25 = smov 0   ;;  %s2255_s0 = inlined_call_operand.vmem [shape: f32[64,16], index: 0, kind: input, shape index: {}, may-alias: {0,2}]   ;;  %s2256_s1 = inlined_call_operand.vmem [shape: f32[64,16], index: 1, kind: input, shape index: {}, may-alias: {1,3}]   ;;  %s2257_s2 = inlined_call_operand.vmem [shape: f32[64,16], index: 2, kind: input, shape index: {}, may-alias: {0,2}]   ;;  %s2258_s3 = inlined_call_operand.vmem [shape: f32[64,16], index: 3, kind: input, shape index: {}, may-alias: {1,3}]   ;;  %s2259_s4 = inlined_call_operand.vmem [shape: f32[16,48], index: 4, kind: input, shape index: {}]   ;;  %s2260_s5 = inlined_call_operand.vmem [shape: f32[16,48], index: 5, kind: input, shape index: {}]   ;;  %s2261_s6 = inlined_call_operand.vmem [shape: f32[16,48], index: 6, kind: input, shape index: {}]   ;;  %s2262_s7 = inlined_call_operand.vmem [shape: f32[16,48], index: 7, kind: input, shape index: {}]   ;;  %s2263_s8 = inlined_call_operand.vmem [shape: f32[1,48], index: 8, kind: input, shape index: {}]   ;;  %s2264_s9 = inlined_call_operand.vmem [shape: f32[1,48], index: 9, kind: input, shape index: {}]   ;;  %s2265_s10 = inlined_call_operand.vmem [shape: f32[32,96], index: 10, kind: input, shape index: {}]   ;;  %s2266_s11 = inlined_call_operand.vmem [shape: f32[1,32], index: 11, kind: input, shape index: {}]   ;;  %s2267_s12 = inlined_call_operand.vmem [shape: f32[64,16], index: 12, kind: output, shape index: {0}]   ;;  %s2268_s13 = inlined_call_operand.vmem [shape: f32[64,16], index: 13, kind: output, shape index: {1}]  }
   0x1   :  { %2270 = sst [smem:[#allocation7_spill]] %s2255_s0 }
   0x2 LB: > { %2271 = sst [smem:[#allocation6_spill]] %s1917_s25  ;;  %s1674_s26 = sadd.s32 4294967295, %s1917_s25   ;;  %s1917_s25 = sphi %s1996_s25, %s24_s25  }
   0x3   : > { %p1678_p0 = scmp.ge.s32.totalorder %s1917_s25, 1  ;;  %p434_p1 = scmp.lt.s32.totalorder %s1917_s25, 3 }
   0x5   : > { %p435_p2 = pnand %p1678_p0, %p434_p1 }
   0x6   : > { %s1679_s27 = sshll.u32 (!%p435_p2), %s1674_s26, 2  ;;  %s513_s28 = ssub.s32 (!%p435_p2), 1, %s1674_s26 }
   0x7   : > { %438 = sbr.rel (%p435_p2) target bundleno = 1588 (0x634), region = 68  ;;  %p502_p3 = scmp.lt.s32.totalorder (!%p435_p2), %s1679_s27, 7 }
   0x8   : > { %s1683_s29 = sshll.u32 (!%p435_p2), %s513_s28, 2  ;;  %s2272_s0 = sld [smem:[#allocation7_spill]] (!%p435_p2) }
   0x9   : > { %p515_p4 = scmp.lt.s32.totalorder (!%p435_p2), %s1683_s29, 7  ;;  %p1691_p5 = scmp.ne.s32.totalorder (!%p435_p2), %s1674_s26, 0 }
   0xc   : > { %s2275_s27 = smov (!%p502_p3, %s1679_s27), 7  ;;  %s2277_s29 = smov (!%p515_p4, %s1683_s29), 7 }
   0xd   : > { %s1680_s30 = sshll.u32 %s2275_s27, 3  ;;  %s1684_s20 = sshll.u32 %s2277_s29, 3 }
   0xe   : > { %s2007_s16 = scalar_lea.vmem %s2272_s0, %s1680_s30  ;;  %s2012_s19 = scalar_lea.vmem %s2256_s1, %s1680_s30 }
   0xf   : > { %s2017_s23 = scalar_lea.vmem %s2267_s12, %s1680_s30  ;;  %s2022_s27 = scalar_lea.vmem %s2257_s2, %s1684_s20 }
  0x10   : > { %s2027_s15 = scalar_lea.vmem %s2258_s3, %s1684_s20  ;;  %s2032_s18 = scalar_lea.vmem %s2268_s13, %s1684_s20 }
  0x11   : > { %546 = sbr.rel (%p1691_p5) target bundleno = 24 (0x18), region = 72 }
  0x16   : > { %vm547_vm0 = vcmask 261120   ;;  %v1919_v0 = vmov 0.0  }
  0x17   : > { %548 = vst.msk [vmem:[#allocation5] sm:$0xff] %vm547_vm0, %v1919_v0 }
  0x18 PF: > { %v566_v1 = vld [vmem:[%s2260_s5 + $0x8] sm:$0xff]  ;;  %v565_v3 = vld [vmem:[%s2260_s5] sm:$0xff]  ;;  %vm567_vm1 = vcmask 130048   ;;  %v563_v11 = vld [vmem:[%s2012_s19 + $0x10] sm:$0xff]  ;;  %v1920_v25 = vmov 0.0   ;;  %s1921_s24 = smov 64  }
  0x19   : > { %v554_v2 = vld [vmem:[%s2259_s4 + $0x8] sm:$0xff]  ;;  %1772 = vmatprep.subr.mxu0 %v566_v1  ;;  %v553_v4 = vld [vmem:[%s2259_s4] sm:$0xff]  ;;  %v551_v12 = vld [vmem:[%s2007_s16 + $0x10] sm:$0xff]  ;;  %vm1922_vm2 = vmmov 0   ;;  %vm1019_vm3 = vcmask 261120   ;;  %vm973_vm4 = vcmask 392192  }
  0x1a   : > { %1782 = vmatprep.subr.mxu1 %v554_v2  ;;  %v561_v5 = vld [vmem:[%s2012_s19] sm:$0xff]  ;;  %1773 = vmatpush3.msra.mxu0 %v566_v1  ;;  %v562_v7 = vld [vmem:[%s2012_s19 + $0x8] sm:$0xff]  ;;  %v564_v13 = vld [vmem:[%s2012_s19 + $0x18] sm:$0xff]  ;;  %s1923_s21 = smov 112   ;;  %s1925_s19 = smov 16  }
  0x1b   : > { %1783 = vmatpush3.msra.mxu1 %v554_v2  ;;  %v549_v6 = vld [vmem:[%s2007_s16] sm:$0xff]  ;;  %1774 = vmatprep.subr.mxu0 %v565_v3  ;;  %v550_v8 = vld [vmem:[%s2007_s16 + $0x8] sm:$0xff]  ;;  %v552_v14 = vld [vmem:[%s2007_s16 + $0x18] sm:$0xff]  ;;  %s1924_s16 = smov 96  }
  0x1c   : > { %1784 = vmatprep.subr.mxu1 %v553_v4  ;;  %1775 = vmatpush3.msra.mxu0 %v565_v3  ;;  %v767_v9 = vld [vmem:[%s2262_s7 + $0x8] sm:$0xff]  ;;  %v766_v15 = vld [vmem:[%s2262_s7] sm:$0xff]  ;;  %v764_v21 = vld [vmem:[%s2027_s15 + $0x10] sm:$0xff] }
  0x1d   : > { %1776 = vmatprep.mubr.msk.f32.mxu0 %vm567_vm1, %v561_v5  ;;  %v560_v10 = vld [vmem:[%s2261_s6 + $0x8] sm:$0xff]  ;;  %1785 = vmatpush3.msra.mxu1 %v553_v4  ;;  %v559_v16 = vld [vmem:[%s2261_s6] sm:$0xff]  ;;  %v557_v22 = vld [vmem:[%s2022_s27 + $0x10] sm:$0xff] }
  0x1e   : > { %1786 = vmatprep.mubr.msk.f32.mxu1 %vm567_vm1, %v549_v6  ;;  %1777 = vmatmul.mubr.msk.f32.vlgmr.msra.gmra.mxu0 %vm567_vm1, %v562_v7  ;;  %v762_v17 = vld [vmem:[%s2027_s15] sm:$0xff]  ;;  %v763_v19 = vld [vmem:[%s2027_s15 + $0x8] sm:$0xff]  ;;  %v2085_v23 = vld [vmem:[%s2265_s10 + $0x18] sm:$0xff] }
  0x1f   : > { %1787 = vmatmul.mubr.msk.f32.vlgmr.msra.gmra.mxu1 %vm567_vm1, %v550_v8  ;;  %1792 = vmatprep.subr.mxu0 %v767_v9  ;;  %v555_v18 = vld [vmem:[%s2022_s27] sm:$0xff]  ;;  %v556_v20 = vld [vmem:[%s2022_s27 + $0x8] sm:$0xff]  ;;  %v765_v26 = vld [vmem:[%s2027_s15 + $0x18] sm:$0xff] }
  0x20   : > { %1802 = vmatprep.subr.mxu1 %v560_v10  ;;  %1793 = vmatpush3.msra.mxu0 %v767_v9  ;;  %v1713_v24 = vld [vmem:[%s2266_s11] ss:$0 sm:$0xff]  ;;  %v558_v27 = vld [vmem:[%s2022_s27 + $0x18] sm:$0xff]  ;;  %v2101_v28 = vld [vmem:[%s2265_s10 + $0x10] sm:$0xff] }
  0x21   : > { %1803 = vmatpush3.msra.mxu1 %v560_v10  ;;  %1779 = vmatprep.mubr.msk.f32.mxu0 %vm567_vm1, %v563_v11  ;;  %v2110_v29 = vld [vmem:[%s2265_s10 + $0x8] sm:$0xff]  ;;  %v2119_v30 = vld [vmem:[%s2265_s10] sm:$0xff] }
  0x22   : > { %1789 = vmatprep.mubr.msk.f32.mxu1 %vm567_vm1, %v551_v12  ;;  %1780 = vmatmul.mubr.msk.f32.gmra.mxu0 %vm567_vm1, %v564_v13  ;;  %v2123_v31 = vld [vmem:[#allocation5] sm:$0xff] }
  0x23   : > { %1790 = vmatmul.mubr.msk.f32.gmra.mxu1 %vm567_vm1, %v552_v14  ;;  %1794 = vmatprep.subr.mxu0 %v766_v15  ;;  %v1708_v34 = vld [vmem:[%s2263_s8] ss:$0 sm:$0xff] }
  0x24   : > { %1804 = vmatprep.subr.mxu1 %v559_v16  ;;  %1795 = vmatpush3.msra.mxu0 %v766_v15  ;;  %v1709_v50 = vld [vmem:[%s2264_s9] ss:$0 sm:$0xff] }
  0x25   : > { %1805 = vmatpush3.msra.mxu1 %v559_v16  ;;  %1796 = vmatprep.mubr.msk.f32.mxu0 %vm567_vm1, %v762_v17 }
  0x26   : > { %1806 = vmatprep.mubr.msk.f32.mxu1 %vm567_vm1, %v555_v18  ;;  %1797 = vmatmul.mubr.msk.f32.vlgmr.msra.gmra.mxu0 %vm567_vm1, %v763_v19 }
  0x27   : > { %1807 = vmatmul.mubr.msk.f32.vlgmr.msra.gmra.mxu1 %vm567_vm1, %v556_v20  ;;  %1812 = vmatprep.subr.mxu0 %v1920_v25 }
  0x28   : > { %1799 = vmatprep.mubr.msk.f32.mxu0 %vm567_vm1, %v764_v21  ;;  %1809 = vmatprep.mubr.msk.f32.mxu1 %vm567_vm1, %v557_v22 }
  0x29   : > { %1813 = vmatpush3.msra.mxu0 %v2085_v23  ;;  %1116 = vrot.lane.b32.xlu0 %v1713_v24, %s1921_s24 }
  0x2a   : > { %1814 = vmatprep.subr.mxu0 %v1920_v25  ;;  %1800 = vmatmul.mubr.msk.f32.gmra.mxu0 %vm567_vm1, %v765_v26 }
  0x2b   : > { %1810 = vmatmul.mubr.msk.f32.gmra.mxu1 %vm567_vm1, %v558_v27  ;;  %1815 = vmatpush3.msra.mxu0 %v2101_v28 }
  0x2c   : > { %1820 = vmatprep.mubr.msk.f32.mxu0 %vm1922_vm2, %v1920_v25  ;;  %1816 = vmatprep.subr.mxu0 %v1920_v25 }
  0x2d   : > { %1823 = vmatprep.subr.mxu1 %v1920_v25  ;;  %1817 = vmatpush3.msra.mxu0 %v2110_v29 }
  0x2e   : > { %1824 = vmatpush3.msra.mxu1 %v2085_v23  ;;  %1818 = vmatprep.subr.mxu0 %v1920_v25 }
  0x2f   : > { %1825 = vmatprep.subr.mxu1 %v1920_v25  ;;  %1819 = vmatpush3.msra.mxu0 %v2119_v30 }
  0x30   : > { %1826 = vmatpush3.msra.mxu1 %v2101_v28  ;;  %1821 = vmatmul.mubr.msk.f32.vlgmr.msra.gmra.mxu0 %vm1019_vm3, %v2123_v31 }
  0x31   : > { %1827 = vmatprep.subr.mxu1 %v1920_v25  ;;  %1831 = vmatprep.mubr.msk.f32.mxu1 %vm1922_vm2, %v1920_v25 }
  0x32   : > { %1828 = vmatpush3.msra.mxu1 %v2110_v29  ;;  %1834 = vmatprep.subr.mxu0 %v1920_v25 }
  0x33   : > { %1829 = vmatprep.subr.mxu1 %v1920_v25  ;;  %1835 = vmatpush3.msra.mxu0 %v2085_v23 }
  0x34   : > { %1830 = vmatpush3.msra.mxu1 %v2119_v30  ;;  %1836 = vmatprep.subr.mxu0 %v1920_v25 }
  0x35   : > { %1842 = vmatprep.mubr.msk.f32.mxu0 %vm1922_vm2, %v1920_v25  ;;  %1837 = vmatpush3.msra.mxu0 %v2101_v28 }
  0x36   : > { %1845 = vmatprep.subr.mxu1 %v1920_v25  ;;  %1838 = vmatprep.subr.mxu0 %v1920_v25 }
  0x37   : > { %1839 = vmatpush3.msra.mxu0 %v2110_v29 }
  0x38   : > { %1840 = vmatprep.subr.mxu0 %v1920_v25 }
  0x39   : > { %1841 = vmatpush3.msra.mxu0 %v2119_v30 }
  0x9b   : > { %v2165_v5 = vpop.permute.xlu0 %1116 }
  0xde   : > { %v1778_v32 = vpop.f32.mrf.mxu0 }
  0xdf   : > { %v1788_v33 = vpop.f32.mrf.mxu1 }
  0xe0   : > { %v749_v35 = vadd.f32 %v1788_v33, %v1778_v32  ;;  %v646_v36 = vpop.f32.mrf.mxu0 }
  0xe1   : > { %v743_v37 = vpop.f32.mrf.mxu1 }
  0xe2   : > { %v970_v38 = vadd.f32 %v1708_v34, %v749_v35  ;;  %v744_v39 = vadd.f32 %v743_v37, %v646_v36  ;;  %v1781_v40 = vpop.f32.mrf.mxu0 }
  0xe3   : > { %v1791_v41 = vpop.f32.mrf.mxu1 }
  0xe4   : > { %975 = vst.msk [vmem:[#allocation2 + $0x8] sm:$0xff] %vm973_vm4, %v970_v38  ;;  %v969_v42 = vadd.f32 %v1708_v34, %v744_v39  ;;  %v759_v43 = vadd.f32 %v1791_v41, %v1781_v40  ;;  %v656_v44 = vpop.f32.mrf.mxu0 }
  0xe5   : > { %v753_v45 = vpop.f32.mrf.mxu1 }
  0xe6   : > { %974 = vst.msk [vmem:[#allocation2] sm:$0xff] %vm973_vm4, %v969_v42  ;;  %v972_v46 = vadd.f32 %v1708_v34, %v759_v43  ;;  %v754_v47 = vadd.f32 %v753_v45, %v656_v44  ;;  %v1798_v48 = vpop.f32.mrf.mxu0 }
  0xe7   : > { %v1808_v49 = vpop.f32.mrf.mxu1 }
  0xe8   : > { %977 = vst.msk [vmem:[#allocation2 + $0x18] sm:$0xff] %vm973_vm4, %v972_v46  ;;  %v971_v51 = vadd.f32 %v1708_v34, %v754_v47  ;;  %v949_v52 = vadd.f32 %v1808_v49, %v1798_v48  ;;  %v846_v53 = vpop.f32.mrf.mxu0 }
  0xe9   : > { %v943_v54 = vpop.f32.mrf.mxu1 }
  0xea   : > { %976 = vst.msk [vmem:[#allocation2 + $0x10] sm:$0xff] %vm973_vm4, %v971_v51  ;;  %v986_v55 = vadd.f32 %v1709_v50, %v949_v52  ;;  %v944_v56 = vadd.f32 %v943_v54, %v846_v53  ;;  %v1801_v57 = vpop.f32.mrf.mxu0 }
  0xeb   : > { %v1811_v58 = vpop.f32.mrf.mxu1  ;;  %v1133_v9 = vld [vmem:[#allocation2 + $0x8] sm:$0xff] }
  0xec   : > { %990 = vst.msk [vmem:[#allocation3 + $0x8] sm:$0xff] %vm973_vm4, %v986_v55  ;;  %v985_v59 = vadd.f32 %v1709_v50, %v944_v56  ;;  %v959_v60 = vadd.f32 %v1811_v58, %v1801_v57  ;;  %v856_v61 = vpop.f32.mrf.mxu0 }
  0xed   : > { %v953_v62 = vpop.f32.mrf.mxu1  ;;  %v999_v63 = vld [vmem:[#allocation2] sm:$0xff] }
  0xee   : > { %989 = vst.msk [vmem:[#allocation3] sm:$0xff] %vm973_vm4, %v985_v59  ;;  %v988_v0 = vadd.f32 %v1709_v50, %v959_v60  ;;  %v954_v1 = vadd.f32 %v953_v62, %v856_v61  ;;  %1008 = vrot.lane.b32.xlu1 %v999_v63, %s1923_s21 }
  0xf0   : > { %992 = vst.msk [vmem:[#allocation3 + $0x18] sm:$0xff] %vm973_vm4, %v988_v0  ;;  %v987_v2 = vadd.f32 %v1709_v50, %v954_v1  ;;  %v1089_v3 = vpop.f32.mrf.mxu0 }
  0xf1   : > { %v1119_v7 = vadd.f32 %v2165_v5, %v1089_v3 }
  0xf2   : > { %991 = vst.msk [vmem:[#allocation3 + $0x10] sm:$0xff] %vm973_vm4, %v987_v2  ;;  %1101 = vrot.lane.b32.xlu1 %v1089_v3, %s1924_s16  ;;  %v1822_v4 = vpop.f32.mrf.mxu0 }
  0xf6   : > { %1012 = vrot.lane.b32.xlu1 %v999_v63, %s1924_s16 }
  0xf7   : > { %v1001_v6 = vld [vmem:[#allocation3 + $0x18] sm:$0xff] }
  0xf8   : > { %1003 = vrot.lane.b32.xlu0 %v1001_v6, %s1925_s19 }
  0xf9   : > { %v2170_v8 = vld [vmem:[#allocation3 + $0x10] sm:$0xff] }
  0xfa   : > { %1137 = vrot.lane.b32.xlu1 %v2170_v8, %s1925_s19 }
  0xfc   : > { %1121 = vrot.lane.b32.xlu0 %v1119_v7, %s1921_s24 }
 0x100   : > { %1015 = vrot.lane.b32.xlu0 %v1001_v6, %s1923_s21 }
 0x104   : > { %1142 = vrot.lane.b32.xlu0 %v1133_v9, %s1923_s21 }
 0x160   : > { %v1009_v10 = vpop.permute.xlu1 %1008 }
 0x161   : > { %v1011_v16 = vsel %vm567_vm1, %v1009_v10, %v1001_v6  ;;  %v1385_v10 = vld [vmem:[#allocation2 + $0x18] sm:$0xff] }
 0x164   : > { %v1102_v15 = vpop.permute.xlu1 %1101 }
 0x165   : > { %v1104_v17 = vadd.f32 %v1102_v15, %v1011_v16 }
 0x167   : > { %v1712_v18 = vmul.f32 -1.442695, %v1104_v17 }
 0x168   : > { %v1013_v32 = vpop.permute.xlu1 %1012 }
 0x16a   : > { %v1004_v11 = vpop.permute.xlu0 %1003 }
 0x16b   : > { %v1006_v12 = vsel %vm567_vm1, %v999_v63, %v1004_v11 }
 0x16c   : > { %v1093_v13 = vadd.f32 %v1089_v3, %v1006_v12 }
 0x16e   : > { %v1711_v14 = vmul.f32 -1.442695, %v1093_v13  ;;  %v1122_v21 = vpop.permute.xlu0 %1121 }
 0x170   : > { %1871 = vpow2.f32 %v1711_v14 }
 0x171   : > { %1873 = vpow2.f32 %v1712_v18 }
 0x172   : > { %v1016_v26 = vpop.permute.xlu0 %1015 }
 0x173   : > { %v1018_v34 = vsel %vm567_vm1, %v1013_v32, %v1016_v26 }
 0x176   : > { %v1143_v47 = vpop.permute.xlu0 %1142 }
 0x177   : > { %v1145_v49 = vsel %vm567_vm1, %v1143_v47, %v2170_v8 }
 0x17d   : > { %v1872_v19 = vpop.eup %1871 }
 0x17e   : > { %v1097_v20 = vadd.f32 1.0, %v1872_v19  ;;  %v1874_v22 = vpop.eup %1873 }
 0x17f   : > { %v1108_v24 = vadd.f32 1.0, %v1874_v22 }
 0x180   : > { %1875 = vrcp.f32 %v1097_v20 }
 0x181   : > { %1877 = vrcp.f32 %v1108_v24 }
 0x18d   : > { %v1876_v27 = vpop.eup %1875 }
 0x18e   : > { %v1124_v33 = vmul.f32 %v1876_v27, %v1122_v21  ;;  %v1878_v36 = vpop.eup %1877 }
 0x18f   : > { %v1127_v37 = vsub.f32 1.0, %v1878_v36  ;;  %v1129_v40 = vmul.f32 %v1878_v36, %v2123_v31 }
 0x190   : > { %v1125_v35 = vadd.f32 %v1124_v33, %v1018_v34 }
 0x192   : > { %1879 = vtanh.f32 %v1125_v35 }
 0x19f   : > { %v1880_v38 = vpop.eup %1879 }
 0x1a0   : > { %v1128_v39 = vmul.f32 %v1880_v38, %v1127_v37 }
 0x1a2   : > { %v1130_v41 = vadd.f32 %v1129_v40, %v1128_v39 }
 0x1a4   : > { %1131 = vst.msk [vmem:[#allocation4] sm:$0xff] %vm1019_vm3, %v1130_v41  ;;  %1832 = vmatmul.mubr.msk.f32.vlgmr.msra.gmra.mxu1 %vm1019_vm3, %v1130_v41 }
 0x1a5   : > { %1846 = vmatpush3.msra.mxu1 %v2085_v23  ;;  %1853 = vmatprep.mubr.msk.f32.mxu1 %vm1922_vm2, %v1920_v25 }
 0x1a6   : > { %1847 = vmatprep.subr.mxu1 %v1920_v25 }
 0x1a7   : > { %1848 = vmatpush3.msra.mxu1 %v2101_v28  ;;  %v1259_v28 = vld [vmem:[#allocation2 + $0x10] sm:$0xff] }
 0x1a8   : > { %1849 = vmatprep.subr.mxu1 %v1920_v25 }
 0x1a9   : > { %1850 = vmatpush3.msra.mxu1 %v2110_v29  ;;  %v1138_v29 = vpop.permute.xlu1 %1137 }
 0x1aa   : > { %1851 = vmatprep.subr.mxu1 %v1920_v25  ;;  %v1261_v25 = vld [vmem:[#allocation3 + $0x8] sm:$0xff] }
 0x1ab   : > { %v2191_v31 = vld [vmem:[#allocation4] sm:$0xff]  ;;  %1852 = vmatpush3.msra.mxu1 %v2119_v30  ;;  %v1140_v30 = vsel %vm567_vm1, %v1133_v9, %v1138_v29 }
 0x1ac   : > { %1514 = vst.msk [vmem:[%s2017_s23] sm:$0xff] %vm567_vm1, %v2191_v31 }
 0x264   : > { %v1222_v23 = vpop.f32.mrf.mxu1 }
 0x265   : > { %v1244_v42 = vadd.f32 %v1222_v23, %v2165_v5  ;;  %1234 = vrot.lane.b32.xlu1 %v1222_v23, %s1924_s16  ;;  %v1226_v44 = vadd.f32 %v1222_v23, %v1140_v30 }
 0x266   : > { %v1833_v43 = vpop.f32.mrf.mxu1 }
 0x267   : > { %1246 = vrot.lane.b32.xlu0 %v1244_v42, %s1921_s24  ;;  %v1715_v45 = vmul.f32 -1.442695, %v1226_v44 }
 0x269   : > { %1146 = vrot.lane.b32.xlu1 %v1133_v9, %s1924_s16  ;;  %1881 = vpow2.f32 %v1715_v45  ;;  %v1386_v9 = vld [vmem:[#allocation3] sm:$0xff] }
 0x26b   : > { %1149 = vrot.lane.b32.xlu0 %v2170_v8, %s1923_s21 }
 0x26d   : > { %1263 = vrot.lane.b32.xlu1 %v1261_v25, %s1925_s19 }
 0x26f   : > { %1268 = vrot.lane.b32.xlu0 %v1259_v28, %s1923_s21 }
 0x276   : > { %v1882_v46 = vpop.eup %1881 }
 0x277   : > { %v1230_v48 = vadd.f32 1.0, %v1882_v46 }
 0x279   : > { %1883 = vrcp.f32 %v1230_v48 }
 0x286   : > { %v1884_v56 = vpop.eup %1883 }
 0x2d7   : > { %v1235_v50 = vpop.permute.xlu1 %1234 }
 0x2d8   : > { %v1237_v51 = vadd.f32 %v1235_v50, %v1145_v49 }
 0x2d9   : > { %v1247_v53 = vpop.permute.xlu0 %1246 }
 0x2da   : > { %v1716_v52 = vmul.f32 -1.442695, %v1237_v51  ;;  %v1249_v58 = vmul.f32 %v1884_v56, %v1247_v53 }
 0x2db   : > { %v1147_v55 = vpop.permute.xlu1 %1146 }
 0x2dc   : > { %1885 = vpow2.f32 %v1716_v52 }
 0x2dd   : > { %v1150_v54 = vpop.permute.xlu0 %1149 }
 0x2de   : > { %v1152_v57 = vsel %vm567_vm1, %v1147_v55, %v1150_v54 }
 0x2df   : > { %v1250_v61 = vadd.f32 %v1249_v58, %v1152_v57  ;;  %v1264_v11 = vpop.permute.xlu1 %1263 }
 0x2e0   : > { %v1266_v12 = vsel %vm567_vm1, %v1259_v28, %v1264_v11 }
 0x2e1   : > { %v1269_v16 = vpop.permute.xlu0 %1268 }
 0x2e2   : > { %v1271_v18 = vsel %vm567_vm1, %v1269_v16, %v1261_v25 }
 0x2e9   : > { %v1886_v59 = vpop.eup %1885 }
 0x2ea   : > { %v1241_v60 = vadd.f32 1.0, %v1886_v59 }
 0x2ec   : > { %1887 = vrcp.f32 %v1241_v60 }
 0x2ed   : > { %1889 = vtanh.f32 %v1250_v61 }
 0x2f9   : > { %v1888_v62 = vpop.eup %1887 }
 0x2fa   : > { %v1252_v63 = vsub.f32 1.0, %v1888_v62  ;;  %v1890_v0 = vpop.eup %1889  ;;  %v1254_v2 = vmul.f32 %v1888_v62, %v1130_v41 }
 0x2fc   : > { %v1253_v1 = vmul.f32 %v1890_v0, %v1252_v63 }
 0x2fe   : > { %v1255_v3 = vadd.f32 %v1254_v2, %v1253_v1 }
 0x300   : > { %1257 = vst.msk [vmem:[#allocation4 + $0x8] sm:$0xff] %vm1019_vm3, %v1255_v3  ;;  %1843 = vmatmul.mubr.msk.f32.vlgmr.msra.gmra.mxu0 %vm1019_vm3, %v1255_v3 }
 0x307   : > { %v1511_v4 = vld [vmem:[#allocation4 + $0x8] sm:$0xff] }
 0x308   : > { %1515 = vst.msk [vmem:[%s2017_s23 + $0x8] sm:$0xff] %vm567_vm1, %v1511_v4 }
 0x3c0   : > { %v1348_v6 = vpop.f32.mrf.mxu0 }
 0x3c1   : > { %v1370_v7 = vadd.f32 %v1348_v6, %v2165_v5  ;;  %1360 = vrot.lane.b32.xlu1 %v1348_v6, %s1924_s16  ;;  %v1352_v13 = vadd.f32 %v1348_v6, %v1266_v12 }
 0x3c2   : > { %v1844_v8 = vpop.f32.mrf.mxu0 }
 0x3c3   : > { %1372 = vrot.lane.b32.xlu0 %v1370_v7, %s1921_s24  ;;  %v1718_v14 = vmul.f32 -1.442695, %v1352_v13 }
 0x3c5   : > { %1272 = vrot.lane.b32.xlu1 %v1259_v28, %s1924_s16  ;;  %1891 = vpow2.f32 %v1718_v14 }
 0x3c7   : > { %1275 = vrot.lane.b32.xlu0 %v1261_v25, %s1923_s21 }
 0x3c9   : > { %1388 = vrot.lane.b32.xlu1 %v1386_v9, %s1925_s19 }
 0x3cb   : > { %1393 = vrot.lane.b32.xlu0 %v1385_v10, %s1923_s21 }
 0x3d2   : > { %v1892_v15 = vpop.eup %1891 }
 0x3d3   : > { %v1356_v17 = vadd.f32 1.0, %v1892_v15 }
 0x3d5   : > { %1893 = vrcp.f32 %v1356_v17 }
 0x3e2   : > { %v1894_v27 = vpop.eup %1893 }
 0x433   : > { %v1361_v19 = vpop.permute.xlu1 %1360 }
 0x434   : > { %v1363_v20 = vadd.f32 %v1361_v19, %v1271_v18 }
 0x435   : > { %v1373_v22 = vpop.permute.xlu0 %1372 }
 0x436   : > { %v1719_v21 = vmul.f32 -1.442695, %v1363_v20  ;;  %v1375_v33 = vmul.f32 %v1894_v27, %v1373_v22 }
 0x437   : > { %v1273_v26 = vpop.permute.xlu1 %1272 }
 0x438   : > { %1895 = vpow2.f32 %v1719_v21 }
 0x439   : > { %v1276_v24 = vpop.permute.xlu0 %1275 }
 0x43a   : > { %v1278_v32 = vsel %vm567_vm1, %v1273_v26, %v1276_v24 }
 0x43b   : > { %v1376_v36 = vadd.f32 %v1375_v33, %v1278_v32  ;;  %v1389_v29 = vpop.permute.xlu1 %1388 }
 0x43c   : > { %v1391_v30 = vsel %vm567_vm1, %v1385_v10, %v1389_v29 }
 0x43d   : > { %v1394_v46 = vpop.permute.xlu0 %1393 }
 0x43e   : > { %v1396_v48 = vsel %vm567_vm1, %v1394_v46, %v1386_v9 }
 0x445   : > { %v1896_v34 = vpop.eup %1895 }
 0x446   : > { %v1367_v35 = vadd.f32 1.0, %v1896_v34 }
 0x448   : > { %1897 = vrcp.f32 %v1367_v35 }
 0x449   : > { %1899 = vtanh.f32 %v1376_v36 }
 0x455   : > { %v1898_v37 = vpop.eup %1897 }
 0x456   : > { %v1378_v38 = vsub.f32 1.0, %v1898_v37  ;;  %v1900_v39 = vpop.eup %1899  ;;  %v1380_v41 = vmul.f32 %v1898_v37, %v1255_v3 }
 0x458   : > { %v1379_v40 = vmul.f32 %v1900_v39, %v1378_v38 }
 0x45a   : > { %v1381_v23 = vadd.f32 %v1380_v41, %v1379_v40 }
 0x45c   : > { %1383 = vst.msk [vmem:[#allocation4 + $0x10] sm:$0xff] %vm1019_vm3, %v1381_v23  ;;  %1854 = vmatmul.mubr.msk.f32.vlgmr.msra.gmra.mxu1 %vm1019_vm3, %v1381_v23 }
 0x463   : > { %v1512_v42 = vld [vmem:[#allocation4 + $0x10] sm:$0xff] }
 0x464   : > { %1516 = vst.msk [vmem:[%s2017_s23 + $0x10] sm:$0xff] %vm567_vm1, %v1512_v42 }
 0x51c   : > { %v1473_v43 = vpop.f32.mrf.mxu1 }
 0x51d   : > { %v1495_v25 = vadd.f32 %v1473_v43, %v2165_v5  ;;  %1485 = vrot.lane.b32.xlu1 %v1473_v43, %s1924_s16  ;;  %v1477_v5 = vadd.f32 %v1473_v43, %v1391_v30 }
 0x51e   : > { %v1855_v28 = vpop.f32.mrf.mxu1 }
 0x51f   : > { %1497 = vrot.lane.b32.xlu0 %v1495_v25, %s1921_s24  ;;  %v1721_v44 = vmul.f32 -1.442695, %v1477_v5 }
 0x521   : > { %1397 = vrot.lane.b32.xlu1 %v1385_v10, %s1924_s16  ;;  %1901 = vpow2.f32 %v1721_v44 }
 0x523   : > { %1400 = vrot.lane.b32.xlu0 %v1386_v9, %s1923_s21 }
 0x525   : > { %1520 = vrot.lane.b32.xlu1 %v2191_v31, %s1923_s21 }
 0x527   : > { %1527 = vrot.lane.b32.xlu0 %v1511_v4, %s1923_s21 }
 0x529   : > { %1534 = vrot.lane.b32.xlu1 %v1512_v42, %s1923_s21 }
 0x52e   : > { %v1902_v45 = vpop.eup %1901 }
 0x52f   : > { %v1481_v47 = vadd.f32 1.0, %v1902_v45 }
 0x531   : > { %1903 = vrcp.f32 %v1481_v47 }
 0x53e   : > { %v1904_v57 = vpop.eup %1903 }
 0x58f   : > { %v1486_v49 = vpop.permute.xlu1 %1485 }
 0x590   : > { %v1488_v31 = vadd.f32 %v1486_v49, %v1396_v48 }
 0x591   : > { %v1498_v50 = vpop.permute.xlu0 %1497 }
 0x592   : > { %v1722_v51 = vmul.f32 -1.442695, %v1488_v31  ;;  %v1500_v59 = vmul.f32 %v1904_v57, %v1498_v50 }
 0x593   : > { %v1398_v52 = vpop.permute.xlu1 %1397 }
 0x594   : > { %1905 = vpow2.f32 %v1722_v51 }
 0x595   : > { %v1401_v53 = vpop.permute.xlu0 %1400 }
 0x596   : > { %v1403_v58 = vsel %vm567_vm1, %v1398_v52, %v1401_v53 }
 0x597   : > { %v1521_v54 = vpop.permute.xlu1 %1520  ;;  %v1501_v62 = vadd.f32 %v1500_v59, %v1403_v58 }
 0x598   : > { %1723 = vst.msk [vmem:[%s2032_s18 + $0x18] sm:$0xff] %vm567_vm1, %v1521_v54 }
 0x599   : > { %v1528_v55 = vpop.permute.xlu0 %1527 }
 0x59a   : > { %1724 = vst.msk [vmem:[%s2032_s18 + $0x10] sm:$0xff] %vm567_vm1, %v1528_v55 }
 0x59b   : > { %v1535_v56 = vpop.permute.xlu1 %1534 }
 0x59c   : > { %1725 = vst.msk [vmem:[%s2032_s18 + $0x8] sm:$0xff] %vm567_vm1, %v1535_v56 }
 0x5a1   : > { %v1906_v60 = vpop.eup %1905 }
 0x5a2   : > { %v1492_v61 = vadd.f32 1.0, %v1906_v60 }
 0x5a4   : > { %1907 = vrcp.f32 %v1492_v61 }
 0x5a5   : > { %1909 = vtanh.f32 %v1501_v62 }
 0x5b1   : > { %v1908_v63 = vpop.eup %1907 }
 0x5b2   : > { %v1503_v0 = vsub.f32 1.0, %v1908_v63  ;;  %v1910_v1 = vpop.eup %1909  ;;  %v1505_v2 = vmul.f32 %v1908_v63, %v1381_v23 }
 0x5b4   : > { %v1504_v3 = vmul.f32 %v1910_v1, %v1503_v0 }
 0x5b6   : > { %v1506_v4 = vadd.f32 %v1505_v2, %v1504_v3 }
 0x5b8   : > { %1508 = vst.msk [vmem:[#allocation4 + $0x18] sm:$0xff] %vm1019_vm3, %v1506_v4  ;;  %1509 = vst.msk [vmem:[#allocation5] sm:$0xff] %vm1019_vm3, %v1506_v4 }
 0x5bf   : > { %v1513_v6 = vld [vmem:[#allocation4 + $0x18] sm:$0xff] }
 0x5c0   : > { %1517 = vst.msk [vmem:[%s2017_s23 + $0x18] sm:$0xff] %vm567_vm1, %v1513_v6  ;;  %1541 = vrot.lane.b32.xlu0 %v1513_v6, %s1923_s21 }
 0x632   : > { %v1542_v7 = vpop.permute.xlu0 %1541 }
 0x633   : > { %1544 = vst.msk [vmem:[%s2032_s18] sm:$0xff] %vm567_vm1, %v1542_v7 }
 0x634 PF: > { %s2273_s0 = sld [smem:[#allocation6_spill]] }
 0x63a   : > { %s24_s25 = sadd.s32 1, %s2273_s0  }
 0x63b   : > { %p21_p6 = scmp.ge.s32.totalorder %s24_s25, 4  }
 0x63d   :  { %23 = sbr.rel (!%p21_p6) target bundleno = 2 (0x2), region = 135 }

</bundles_post_ra>
